<compile_context>
chip_gen: v6e
topology: v6e:2x2x1
jax: 0.10.0
libtpu: 0.0.40
codegen_flags: <defaults>
</compile_context>

<pallas_src>
import functools
import math

import jax
import jax.numpy as jnp
from jax.experimental import pallas as pl
from jax.experimental.pallas import tpu as pltpu


def _default_vmem_limit():
    """~48 MiB on v7x (64 MiB VMEM), ~96 MiB on v5e/v6e (128 MiB VMEM)."""
    try:
        cap = pltpu.get_tpu_info().vmem_capacity_bytes
    except Exception:
        cap = 64 * 1024 * 1024
    return min(int(cap) * 3 // 4, 96 * 1024 * 1024)


_VMEM_LIMIT = _default_vmem_limit()


def _round_up(x, m):
    return ((x + m - 1) // m) * m


def _gelu_f32(x):
    # exact (erf-based) GELU, matching torch.nn.GELU default
    return 0.5 * x * (1.0 + jax.lax.erf(x * (1.0 / math.sqrt(2.0))))


def _layernorm_f32(x, g, b, eps):
    mu = jnp.mean(x, axis=-1, keepdims=True)
    var = jnp.mean((x - mu) * (x - mu), axis=-1, keepdims=True)
    return (x - mu) * jax.lax.rsqrt(var + eps) * g + b


# ----------------------------- Pallas kernels ------------------------------ #

def _embed_kernel(p_ref, w_ref, b_ref, tp_ref, o_ref, *, n_patch):
    """Patch embedding + cls token + positional embedding for one batch element.
    p_ref:(1,np,K) f32 im2col patches, w_ref:(K,D) bf16, b_ref:(1,D) f32,
    tp_ref:(N_pad,D) f32 (row0 = cls+pos[0], rows 1..np = pos, pad rows = 0),
    o_ref:(1,N_pad,D) f32 token stream (padded rows zeroed)."""
    n_pad = tp_ref.shape[0]
    d = w_ref.shape[1]
    emb = jnp.dot(p_ref[0].astype(jnp.bfloat16), w_ref[...],
                  preferred_element_type=jnp.float32)
    emb = emb + b_ref[...].astype(jnp.float32) + tp_ref[1:1 + n_patch, :]
    o_ref[0, 0:1, :] = tp_ref[0:1, :].astype(o_ref.dtype)          # cls token row
    o_ref[0, 1:1 + n_patch, :] = emb.astype(o_ref.dtype)           # patch tokens
    if n_pad > 1 + n_patch:                                        # zero the pad rows
        o_ref[0, 1 + n_patch:, :] = jnp.zeros((n_pad - 1 - n_patch, d), o_ref.dtype)


def pallas_patch_embed(patches, w, b, tokpos):
    B, n_patch, K = patches.shape
    n_pad, D = tokpos.shape
    kernel = functools.partial(_embed_kernel, n_patch=n_patch)
    return pl.pallas_call(
        kernel,
        out_shape=jax.ShapeDtypeStruct((B, n_pad, D), jnp.float32),
        grid=(B,),
        in_specs=[
            pl.BlockSpec((1, n_patch, K), lambda i: (i, 0, 0)),
            pl.BlockSpec((K, D), lambda i: (0, 0)),
            pl.BlockSpec((1, D), lambda i: (0, 0)),
            pl.BlockSpec((n_pad, D), lambda i: (0, 0)),
        ],
        out_specs=pl.BlockSpec((1, n_pad, D), lambda i: (i, 0, 0)),
        compiler_params=pltpu.CompilerParams(
            dimension_semantics=("parallel",),
            vmem_limit_bytes=_VMEM_LIMIT,
        ),
    )(patches, w, b.reshape(1, D), tokpos)


def _block_kernel(x_ref, g1_ref, b1_ref, qkvw_ref, qkvb_ref, pw_ref, pb_ref,
                  g2_ref, b2_ref, w1_ref, fb1_ref, w2_ref, fb2_ref,
                  gf_ref, bf_ref, o_ref, *rest,
                  num_heads, head_dim, n_real, eps, write_attn, final_ln):
    """One fused transformer block for one batch element:
       out = [LNf]( x + MLP(LN2( x + Proj(MHA(QKV(LN1(x)))) )) )
    Padded key columns (index >= n_real) are masked with -1e30 before softmax.
    The attention-scale is pre-folded into the Q weights."""
    if write_attn:
        a_ref, qkv_scr = rest
    else:
        (qkv_scr,) = rest

    D = num_heads * head_dim
    x = x_ref[0].astype(jnp.float32)                      # (N_pad, D) residual stream
    n_pad = x.shape[0]

    # ---- LN1 + fused QKV projection (bf16 MXU operands, f32 accumulation) ----
    xn = _layernorm_f32(x, g1_ref[...], b1_ref[...], eps)
    qkv = jnp.dot(xn.astype(jnp.bfloat16), qkvw_ref[...],
                  preferred_element_type=jnp.float32) + qkvb_ref[...]
    qkv_scr[...] = qkv.astype(jnp.bfloat16)               # lane-dense (N_pad, 3D) bf16

    # ---- multi-head attention + output projection + residual ----
    if n_pad > n_real:
        col = jax.lax.broadcasted_iota(jnp.int32, (n_pad, n_pad), 1)
        key_bias = jnp.where(col < n_real, 0.0, -1e30).astype(jnp.float32)
    else:
        key_bias = None

    acc = x + pb_ref[...].astype(jnp.float32)             # residual + proj bias
    for h in range(num_heads):
        lo = h * head_dim
        hi = lo + head_dim
        q = qkv_scr[:, lo:hi]                             # (N_pad, Dh) bf16, pre-scaled
        k = qkv_scr[:, D + lo:D + hi]
        v = qkv_scr[:, 2 * D + lo:2 * D + hi]
        s = jax.lax.dot_general(q, k, (((1,), (1,)), ((), ())),
                                preferred_element_type=jnp.float32)  # (N_pad, N_pad)
        if key_bias is not None:
            s = s + key_bias                               # mask padded keys
        s = s - jnp.max(s, axis=-1, keepdims=True)
        e = jnp.exp(s)
        # exact normalization (torch-softmax fidelity for the returned attention)
        p = e * (1.0 / jnp.sum(e, axis=-1, keepdims=True))
        if write_attn:
            a_ref[0, h] = p.astype(a_ref.dtype)
        ctx = jnp.dot(p.astype(jnp.bfloat16), v, preferred_element_type=jnp.float32)
        # fold the output projection into the per-head loop
        acc = acc + jnp.dot(ctx.astype(jnp.bfloat16), pw_ref[lo:hi, :],
                            preferred_element_type=jnp.float32)

    # ---- LN2 + MLP (fc1 + GELU + fc2) + residual ----
    xn2 = _layernorm_f32(acc, g2_ref[...], b2_ref[...], eps)
    hmid = jnp.dot(xn2.astype(jnp.bfloat16), w1_ref[...],
                   preferred_element_type=jnp.float32) + fb1_ref[...]
    hmid = _gelu_f32(hmid)
    y = jnp.dot(hmid.astype(jnp.bfloat16), w2_ref[...],
                preferred_element_type=jnp.float32) + fb2_ref[...]
    out = acc + y
    if final_ln:                                           # final LayerNorm fused in
        out = _layernorm_f32(out, gf_ref[...], bf_ref[...], eps)
    o_ref[0] = out.astype(o_ref.dtype)


def pallas_block(x, lp, lnf_g, lnf_b, *, num_heads, head_dim, n_real,
                 write_attn, final_ln, eps=1e-6):
    """x:(B,N_pad,D) f32.  Returns (block output (B,N_pad,D), attn|None)."""
    B, Np, D = x.shape
    Hm = lp["fc1_w"].shape[1]
    kernel = functools.partial(_block_kernel, num_heads=num_heads, head_dim=head_dim,
                               n_real=n_real, eps=eps, write_attn=write_attn,
                               final_ln=final_ln)
    vec = lambda n: pl.BlockSpec((1, n), lambda i: (0, 0))
    mat = lambda r, c: pl.BlockSpec((r, c), lambda i: (0, 0))
    in_specs = [
        pl.BlockSpec((1, Np, D), lambda i: (i, 0, 0)),   # x
        vec(D), vec(D),                                  # ln1 gamma/beta
        mat(D, 3 * D), vec(3 * D),                       # qkv w/b (scale folded into Q)
        mat(D, D), vec(D),                               # proj w/b
        vec(D), vec(D),                                  # ln2 gamma/beta
        mat(D, Hm), vec(Hm),                             # fc1 w/b
        mat(Hm, D), vec(D),                              # fc2 w/b
        vec(D), vec(D),                                  # final LN gamma/beta
    ]
    if write_attn:
        out_shape = (jax.ShapeDtypeStruct((B, Np, D), jnp.float32),
                     jax.ShapeDtypeStruct((B, num_heads, Np, Np), jnp.float32))
        out_specs = (pl.BlockSpec((1, Np, D), lambda i: (i, 0, 0)),
                     pl.BlockSpec((1, num_heads, Np, Np), lambda i: (i, 0, 0, 0)))
    else:
        out_shape = jax.ShapeDtypeStruct((B, Np, D), jnp.float32)
        out_specs = pl.BlockSpec((1, Np, D), lambda i: (i, 0, 0))
    out = pl.pallas_call(
        kernel,
        out_shape=out_shape,
        grid=(B,),
        in_specs=in_specs,
        out_specs=out_specs,
        scratch_shapes=[pltpu.VMEM((Np, 3 * D), jnp.bfloat16)],   # qkv activation
        compiler_params=pltpu.CompilerParams(
            dimension_semantics=("parallel",),
            vmem_limit_bytes=_VMEM_LIMIT,
        ),
    )(x,
      lp["ln1_g"].reshape(1, D), lp["ln1_b"].reshape(1, D),
      lp["qkv_w"], lp["qkv_b"].reshape(1, 3 * D),
      lp["proj_w"], lp["proj_b"].reshape(1, D),
      lp["ln2_g"].reshape(1, D), lp["ln2_b"].reshape(1, D),
      lp["fc1_w"], lp["fc1_b"].reshape(1, Hm),
      lp["fc2_w"], lp["fc2_b"].reshape(1, D),
      lnf_g.reshape(1, D), lnf_b.reshape(1, D))
    if write_attn:
        return out[0], out[1]
    return out, None


# --------------------------- ViT backbone (DINO) ---------------------------- #

class DinoFeaturizerPallas:
    """Scaled-down DINO ViT featurizer; forward returns (feat NCHW, last-block attn)."""

    def __init__(self, patch_size=8, embed_dim=128, depth=2, num_heads=4,
                 mlp_ratio=4, img_size=32, in_chans=3, seed=0):
        assert embed_dim % 128 == 0, "keep embed_dim lane-dense (multiple of 128)"
        self.patch_size = patch_size
        self.embed_dim = embed_dim
        self.depth = depth
        self.num_heads = num_heads
        self.head_dim = embed_dim // num_heads
        self.scale = self.head_dim ** -0.5
        self.grid = img_size // patch_size
        self.num_patches = self.grid * self.grid
        self.seq_len = self.num_patches + 1            # + cls token
        self.n_pad = _round_up(self.seq_len, 8)        # sublane-dense token count
        hidden = embed_dim * mlp_ratio

        key = jax.random.PRNGKey(seed)

        def nxt():
            nonlocal key
            key, sub = jax.random.split(key)
            return sub

        def init(shape, s=0.02):
            return (s * jax.random.normal(nxt(), shape)).astype(jnp.float32)

        zeros = lambda shape: jnp.zeros(shape, jnp.float32)
        ones = lambda shape: jnp.ones(shape, jnp.float32)
        bf16 = lambda a: a.astype(jnp.bfloat16)

        # patch embed: Conv2d(C, D, kernel=P, stride=P) -> matmul weight (C*P*P, D), bf16
        self.patch_w = bf16(init((in_chans * patch_size * patch_size, embed_dim)))
        self.patch_b = zeros((embed_dim,))
        # cls token + positional embedding merged into one padded "tokpos" table
        cls_token = init((1, embed_dim))
        pos_embed = init((self.seq_len, embed_dim))
        tokpos = jnp.zeros((self.n_pad, embed_dim), jnp.float32)
        tokpos = tokpos.at[:self.seq_len].set(pos_embed)
        tokpos = tokpos.at[0].add(cls_token[0])
        self.tokpos = tokpos

        self.layers = []
        for _ in range(depth):
            qkv_w = init((embed_dim, 3 * embed_dim))
            qkv_b = zeros((3 * embed_dim,))
            # fold the 1/sqrt(head_dim) attention scale into the Q projection (one-time)
            qkv_w = qkv_w.at[:, :embed_dim].multiply(self.scale)
            qkv_b = qkv_b.at[:embed_dim].multiply(self.scale)
            self.layers.append(dict(
                ln1_g=ones((embed_dim,)), ln1_b=zeros((embed_dim,)),
                qkv_w=bf16(qkv_w), qkv_b=qkv_b,
                proj_w=bf16(init((embed_dim, embed_dim))), proj_b=zeros((embed_dim,)),
                ln2_g=ones((embed_dim,)), ln2_b=zeros((embed_dim,)),
                fc1_w=bf16(init((embed_dim, hidden))), fc1_b=zeros((hidden,)),
                fc2_w=bf16(init((hidden, embed_dim))), fc2_b=zeros((embed_dim,)),
            ))
        self.ln_f_g = ones((embed_dim,))
        self.ln_f_b = zeros((embed_dim,))

    def forward(self, img):
        """img: (B, C, H, W) NCHW float32.
        Returns (feat: (B, D, H/P, W/P), attn: (B, heads, N, N)) with N = #patches+1."""
        B, C, Hh, Ww = img.shape
        P, D = self.patch_size, self.embed_dim
        assert Hh % P == 0 and Ww % P == 0
        hp, wp = Hh // P, Ww // P
        n_patch = hp * wp
        assert n_patch == self.num_patches

        # patch extraction (im2col) stays in XLA glue.
        # TODO(synk): fold the (C,P,P) window gather into the patch-embed kernel's
        #             index_map (Element-indexed BlockSpec) to avoid this HBM pass.
        patches = img.reshape(B, C, hp, P, wp, P).transpose(0, 2, 4, 1, 3, 5)
        patches = patches.reshape(B, n_patch, C * P * P)

        # patch embed + cls token + pos embed, padded to n_pad tokens (1 pallas_call)
        x = pallas_patch_embed(patches, self.patch_w, self.patch_b, self.tokpos)

        attn = None
        for l in range(self.depth):
            last = (l == self.depth - 1)
            x, a = pallas_block(x, self.layers[l], self.ln_f_g, self.ln_f_b,
                                num_heads=self.num_heads, head_dim=self.head_dim,
                                n_real=self.seq_len, write_attn=last, final_ln=last)
            if a is not None:
                attn = a

        # drop cls + padded tokens, reshape patch tokens to NCHW feature map.
        # TODO(synk): write feat in D-major layout directly from the last block kernel
        #             to remove this transpose at large image sizes.
        feat = x[:, 1:1 + n_patch, :].transpose(0, 2, 1).reshape(B, D, hp, wp)
        attn = attn[:, :, :self.seq_len, :self.seq_len]
        return feat, attn


# --------------------------------- driver ---------------------------------- #

if __name__ == "__main__":
    B, C, H, W = 2, 3, 32, 32
    model = DinoFeaturizerPallas(patch_size=8, embed_dim=128, depth=2, num_heads=4,
                                 img_size=H, in_chans=C, seed=0)

    img = jax.random.normal(jax.random.PRNGKey(0), (B, C, H, W), dtype=jnp.float32)

    fwd = jax.jit(model.forward)
    feat, attn = fwd(img)
    feat = jax.block_until_ready(feat)
    attn = jax.block_until_ready(attn)

    N = (H // 8) * (W // 8) + 1
    assert feat.shape == (B, 128, H // 8, W // 8), feat.shape
    assert attn.shape == (B, 4, N, N), attn.shape
    assert jnp.all(jnp.isfinite(feat)) and jnp.all(jnp.isfinite(attn))
    # softmax rows sum to ~1 (exact normalization; padded keys masked to zero prob)
    assert jnp.allclose(attn.sum(-1), 1.0, atol=1e-3), \
        float(jnp.max(jnp.abs(attn.sum(-1) - 1.0)))

    print("KERNEL_OK")
</pallas_src>

<mosaic_0001>
module attributes {stable_mosaic.version = 11 : i64} {
  func.func @_embed_kernel(%arg0: i32, %arg1: memref<1x16x192xf32, #tpu.memory_space<vmem>>, %arg2: memref<192x128xbf16, #tpu.memory_space<vmem>>, %arg3: memref<1x128xf32, #tpu.memory_space<vmem>>, %arg4: memref<24x128xf32, #tpu.memory_space<vmem>>, %arg5: memref<1x24x128xf32, #tpu.memory_space<vmem>>) attributes {dimension_semantics = [#tpu.dimension_semantics<parallel>], iteration_bounds = array<i64: 2>, scalar_prefetch = 0 : i64, scratch_operands = 0 : i64, tpu.core_type = #tpu.core_type<tc>, window_params = [{transform_indices = @transform_0, window_bounds = array<i64: 1, 16, 192>}, {pipeline_mode = #tpu.pipeline_mode<synchronous>, transform_indices = @transform_1, window_bounds = array<i64: 192, 128>}, {pipeline_mode = #tpu.pipeline_mode<synchronous>, transform_indices = @transform_2, window_bounds = array<i64: 1, 128>}, {pipeline_mode = #tpu.pipeline_mode<synchronous>, transform_indices = @transform_3, window_bounds = array<i64: 24, 128>}, {transform_indices = @transform_4, window_bounds = array<i64: 1, 24, 128>}]} {
    %c0 = arith.constant 0 : index
    %c0_0 = arith.constant 0 : index
    %c0_1 = arith.constant 0 : index
    %0 = vector.load %arg1[%c0, %c0_0, %c0_1] : memref<1x16x192xf32, #tpu.memory_space<vmem>>, vector<1x16x192xf32>
    %1 = vector.shape_cast %0 : vector<1x16x192xf32> to vector<16x192xf32>
    %2 = arith.truncf %1 : vector<16x192xf32> to vector<16x192xbf16>
    %c0_2 = arith.constant 0 : index
    %c0_3 = arith.constant 0 : index
    %3 = vector.load %arg2[%c0_2, %c0_3] : memref<192x128xbf16, #tpu.memory_space<vmem>>, vector<192x128xbf16>
    %cst = arith.constant dense<0.000000e+00> : vector<16x128xf32>
    %4 = tpu.matmul %2, %3, %cst {dimension_numbers = #tpu.dot_dimension_numbers<[1], [0], [0], [1], [0, 0, 1, 1], [], []>} : vector<16x192xbf16>, vector<192x128xbf16>, vector<16x128xf32> -> vector<16x128xf32>
    %c0_4 = arith.constant 0 : index
    %c0_5 = arith.constant 0 : index
    %5 = vector.load %arg3[%c0_4, %c0_5] : memref<1x128xf32, #tpu.memory_space<vmem>>, vector<1x128xf32>
    %6 = vector.broadcast %5 : vector<1x128xf32> to vector<16x128xf32>
    %7 = arith.addf %4, %6 : vector<16x128xf32>
    %c1 = arith.constant 1 : index
    %c0_6 = arith.constant 0 : index
    %8 = vector.load %arg4[%c1, %c0_6] : memref<24x128xf32, #tpu.memory_space<vmem>>, vector<16x128xf32>
    %9 = arith.addf %7, %8 : vector<16x128xf32>
    %c0_7 = arith.constant 0 : index
    %c0_8 = arith.constant 0 : index
    %10 = vector.load %arg4[%c0_7, %c0_8] : memref<24x128xf32, #tpu.memory_space<vmem>>, vector<1x128xf32>
    %c0_9 = arith.constant 0 : index
    %c0_10 = arith.constant 0 : index
    %c0_11 = arith.constant 0 : index
    %11 = vector.load %arg5[%c0_9, %c0_10, %c0_11] : memref<1x24x128xf32, #tpu.memory_space<vmem>>, vector<1x1x128xf32>
    %12 = vector.shape_cast %11 : vector<1x1x128xf32> to vector<1x128xf32>
    %13 = vector.shape_cast %10 : vector<1x128xf32> to vector<1x1x128xf32>
    tpu.vector_store %arg5[%c0_9, %c0_10, %c0_11], %13 {strides = array<i32>} : memref<1x24x128xf32, #tpu.memory_space<vmem>>, vector<1x1x128xf32>,
    %c0_12 = arith.constant 0 : index
    %c1_13 = arith.constant 1 : index
    %c0_14 = arith.constant 0 : index
    %14 = vector.load %arg5[%c0_12, %c1_13, %c0_14] : memref<1x24x128xf32, #tpu.memory_space<vmem>>, vector<1x16x128xf32>
    %15 = vector.shape_cast %14 : vector<1x16x128xf32> to vector<16x128xf32>
    %16 = vector.shape_cast %9 : vector<16x128xf32> to vector<1x16x128xf32>
    tpu.vector_store %arg5[%c0_12, %c1_13, %c0_14], %16 {strides = array<i32>} : memref<1x24x128xf32, #tpu.memory_space<vmem>>, vector<1x16x128xf32>,
    %cst_15 = arith.constant 0.000000e+00 : f32
    %17 = vector.broadcast %cst_15 : f32 to vector<7x128xf32>
    %c0_16 = arith.constant 0 : index
    %c17 = arith.constant 17 : index
    %c0_17 = arith.constant 0 : index
    %18 = vector.load %arg5[%c0_16, %c17, %c0_17] : memref<1x24x128xf32, #tpu.memory_space<vmem>>, vector<1x7x128xf32>
    %19 = vector.shape_cast %18 : vector<1x7x128xf32> to vector<7x128xf32>
    %20 = vector.shape_cast %17 : vector<7x128xf32> to vector<1x7x128xf32>
    tpu.vector_store %arg5[%c0_16, %c17, %c0_17], %20 {strides = array<i32>} : memref<1x24x128xf32, #tpu.memory_space<vmem>>, vector<1x7x128xf32>,
    return
  }
  func.func @transform_0(%arg0: i32) -> (i32, i32, i32) {
    %c0_i32 = arith.constant 0 : i32
    %c0_i32_0 = arith.constant 0 : i32
    %c0_i32_1 = arith.constant 0 : i32
    return %arg0, %c0_i32, %c0_i32_0 : i32, i32, i32
  }
  func.func @transform_1(%arg0: i32) -> (i32, i32) {
    %c0_i32 = arith.constant 0 : i32
    %c0_i32_0 = arith.constant 0 : i32
    %c0_i32_1 = arith.constant 0 : i32
    return %c0_i32, %c0_i32_0 : i32, i32
  }
  func.func @transform_2(%arg0: i32) -> (i32, i32) {
    %c0_i32 = arith.constant 0 : i32
    %c0_i32_0 = arith.constant 0 : i32
    %c0_i32_1 = arith.constant 0 : i32
    return %c0_i32, %c0_i32_0 : i32, i32
  }
  func.func @transform_3(%arg0: i32) -> (i32, i32) {
    %c0_i32 = arith.constant 0 : i32
    %c0_i32_0 = arith.constant 0 : i32
    %c0_i32_1 = arith.constant 0 : i32
    return %c0_i32, %c0_i32_0 : i32, i32
  }
  func.func @transform_4(%arg0: i32) -> (i32, i32, i32) {
    %c0_i32 = arith.constant 0 : i32
    %c0_i32_0 = arith.constant 0 : i32
    %c0_i32_1 = arith.constant 0 : i32
    return %arg0, %c0_i32, %c0_i32_0 : i32, i32, i32
  }
}

module attributes {stable_mosaic.version = 11 : i64} {
  func.func @_block_kernel(%arg0: i32, %arg1: memref<1x24x128xf32, #tpu.memory_space<vmem>>, %arg2: memref<1x128xf32, #tpu.memory_space<vmem>>, %arg3: memref<1x128xf32, #tpu.memory_space<vmem>>, %arg4: memref<128x384xbf16, #tpu.memory_space<vmem>>, %arg5: memref<1x384xf32, #tpu.memory_space<vmem>>, %arg6: memref<128x128xbf16, #tpu.memory_space<vmem>>, %arg7: memref<1x128xf32, #tpu.memory_space<vmem>>, %arg8: memref<1x128xf32, #tpu.memory_space<vmem>>, %arg9: memref<1x128xf32, #tpu.memory_space<vmem>>, %arg10: memref<128x512xbf16, #tpu.memory_space<vmem>>, %arg11: memref<1x512xf32, #tpu.memory_space<vmem>>, %arg12: memref<512x128xbf16, #tpu.memory_space<vmem>>, %arg13: memref<1x128xf32, #tpu.memory_space<vmem>>, %arg14: memref<1x128xf32, #tpu.memory_space<vmem>>, %arg15: memref<1x128xf32, #tpu.memory_space<vmem>>, %arg16: memref<1x24x128xf32, #tpu.memory_space<vmem>>, %arg17: memref<24x384xbf16, #tpu.memory_space<vmem>>) attributes {dimension_semantics = [#tpu.dimension_semantics<parallel>], iteration_bounds = array<i64: 2>, scalar_prefetch = 0 : i64, scratch_operands = 1 : i64, tpu.core_type = #tpu.core_type<tc>, window_params = [{transform_indices = @transform_0, window_bounds = array<i64: 1, 24, 128>}, {pipeline_mode = #tpu.pipeline_mode<synchronous>, transform_indices = @transform_1, window_bounds = array<i64: 1, 128>}, {pipeline_mode = #tpu.pipeline_mode<synchronous>, transform_indices = @transform_2, window_bounds = array<i64: 1, 128>}, {pipeline_mode = #tpu.pipeline_mode<synchronous>, transform_indices = @transform_3, window_bounds = array<i64: 128, 384>}, {pipeline_mode = #tpu.pipeline_mode<synchronous>, transform_indices = @transform_4, window_bounds = array<i64: 1, 384>}, {pipeline_mode = #tpu.pipeline_mode<synchronous>, transform_indices = @transform_5, window_bounds = array<i64: 128, 128>}, {pipeline_mode = #tpu.pipeline_mode<synchronous>, transform_indices = @transform_6, window_bounds = array<i64: 1, 128>}, {pipeline_mode = #tpu.pipeline_mode<synchronous>, transform_indices = @transform_7, window_bounds = array<i64: 1, 128>}, {pipeline_mode = #tpu.pipeline_mode<synchronous>, transform_indices = @transform_8, window_bounds = array<i64: 1, 128>}, {pipeline_mode = #tpu.pipeline_mode<synchronous>, transform_indices = @transform_9, window_bounds = array<i64: 128, 512>}, {pipeline_mode = #tpu.pipeline_mode<synchronous>, transform_indices = @transform_10, window_bounds = array<i64: 1, 512>}, {pipeline_mode = #tpu.pipeline_mode<synchronous>, transform_indices = @transform_11, window_bounds = array<i64: 512, 128>}, {pipeline_mode = #tpu.pipeline_mode<synchronous>, transform_indices = @transform_12, window_bounds = array<i64: 1, 128>}, {pipeline_mode = #tpu.pipeline_mode<synchronous>, transform_indices = @transform_13, window_bounds = array<i64: 1, 128>}, {pipeline_mode = #tpu.pipeline_mode<synchronous>, transform_indices = @transform_14, window_bounds = array<i64: 1, 128>}, {transform_indices = @transform_15, window_bounds = array<i64: 1, 24, 128>}]} {
    %c0 = arith.constant 0 : index
    %c0_0 = arith.constant 0 : index
    %c0_1 = arith.constant 0 : index
    %0 = vector.load %arg1[%c0, %c0_0, %c0_1] : memref<1x24x128xf32, #tpu.memory_space<vmem>>, vector<1x24x128xf32>
    %1 = vector.shape_cast %0 : vector<1x24x128xf32> to vector<24x128xf32>
    %c0_2 = arith.constant 0 : index
    %c0_3 = arith.constant 0 : index
    %2 = vector.load %arg2[%c0_2, %c0_3] : memref<1x128xf32, #tpu.memory_space<vmem>>, vector<1x128xf32>
    %c0_4 = arith.constant 0 : index
    %c0_5 = arith.constant 0 : index
    %3 = vector.load %arg3[%c0_4, %c0_5] : memref<1x128xf32, #tpu.memory_space<vmem>>, vector<1x128xf32>
    %cst = arith.constant dense<0.000000e+00> : vector<24xf32>
    %4 = vector.multi_reduction <add>, %1, %cst [1] : vector<24x128xf32> to vector<24xf32>
    %5 = vector.shape_cast %4 : vector<24xf32> to vector<24x1xf32>
    %cst_6 = arith.constant 1.280000e+02 : f32
    %6 = vector.broadcast %cst_6 : f32 to vector<24x1xf32>
    %7 = arith.divf %5, %6 : vector<24x1xf32>
    %8 = vector.broadcast %7 : vector<24x1xf32> to vector<24x128xf32>
    %9 = arith.subf %1, %8 : vector<24x128xf32>
    %10 = vector.broadcast %7 : vector<24x1xf32> to vector<24x128xf32>
    %11 = arith.subf %1, %10 : vector<24x128xf32>
    %12 = arith.mulf %9, %11 : vector<24x128xf32>
    %cst_7 = arith.constant dense<0.000000e+00> : vector<24xf32>
    %13 = vector.multi_reduction <add>, %12, %cst_7 [1] : vector<24x128xf32> to vector<24xf32>
    %14 = vector.shape_cast %13 : vector<24xf32> to vector<24x1xf32>
    %cst_8 = arith.constant 1.280000e+02 : f32
    %15 = vector.broadcast %cst_8 : f32 to vector<24x1xf32>
    %16 = arith.divf %14, %15 : vector<24x1xf32>
    %17 = vector.broadcast %7 : vector<24x1xf32> to vector<24x128xf32>
    %18 = arith.subf %1, %17 : vector<24x128xf32>
    %cst_9 = arith.constant 9.99999997E-7 : f32
    %19 = vector.broadcast %cst_9 : f32 to vector<24x1xf32>
    %20 = arith.addf %16, %19 : vector<24x1xf32>
    %21 = math.rsqrt %20 : vector<24x1xf32>
    %22 = vector.broadcast %21 : vector<24x1xf32> to vector<24x128xf32>
    %23 = arith.mulf %18, %22 : vector<24x128xf32>
    %24 = vector.broadcast %2 : vector<1x128xf32> to vector<24x128xf32>
    %25 = arith.mulf %23, %24 : vector<24x128xf32>
    %26 = vector.broadcast %3 : vector<1x128xf32> to vector<24x128xf32>
    %27 = arith.addf %25, %26 : vector<24x128xf32>
    %28 = arith.truncf %27 : vector<24x128xf32> to vector<24x128xbf16>
    %c0_10 = arith.constant 0 : index
    %c0_11 = arith.constant 0 : index
    %29 = vector.load %arg4[%c0_10, %c0_11] : memref<128x384xbf16, #tpu.memory_space<vmem>>, vector<128x384xbf16>
    %cst_12 = arith.constant dense<0.000000e+00> : vector<24x384xf32>
    %30 = tpu.matmul %28, %29, %cst_12 {dimension_numbers = #tpu.dot_dimension_numbers<[1], [0], [0], [1], [0, 0, 1, 1], [], []>} : vector<24x128xbf16>, vector<128x384xbf16>, vector<24x384xf32> -> vector<24x384xf32>
    %c0_13 = arith.constant 0 : index
    %c0_14 = arith.constant 0 : index
    %31 = vector.load %arg5[%c0_13, %c0_14] : memref<1x384xf32, #tpu.memory_space<vmem>>, vector<1x384xf32>
    %32 = vector.broadcast %31 : vector<1x384xf32> to vector<24x384xf32>
    %33 = arith.addf %30, %32 : vector<24x384xf32>
    %34 = arith.truncf %33 : vector<24x384xf32> to vector<24x384xbf16>
    %c0_15 = arith.constant 0 : index
    %c0_16 = arith.constant 0 : index
    %35 = vector.load %arg17[%c0_15, %c0_16] : memref<24x384xbf16, #tpu.memory_space<vmem>>, vector<24x384xbf16>
    tpu.vector_store %arg17[%c0_15, %c0_16], %34 {strides = array<i32>} : memref<24x384xbf16, #tpu.memory_space<vmem>>, vector<24x384xbf16>,
    %36 = tpu.iota {dimensions = array<i32: 1>} : vector<24x24xi32>
    %c17_i32 = arith.constant 17 : i32
    %37 = vector.broadcast %c17_i32 : i32 to vector<24x24xi32>
    %38 = arith.cmpi slt, %36, %37 : vector<24x24xi32>
    %cst_17 = arith.constant 0.000000e+00 : f32
    %cst_18 = arith.constant -1.000000e+30 : f32
    %39 = vector.broadcast %cst_17 : f32 to vector<24x24xf32>
    %40 = vector.broadcast %cst_18 : f32 to vector<24x24xf32>
    %41 = arith.select %38, %39, %40 : vector<24x24xi1>, vector<24x24xf32>
    %c0_19 = arith.constant 0 : index
    %c0_20 = arith.constant 0 : index
    %42 = vector.load %arg7[%c0_19, %c0_20] : memref<1x128xf32, #tpu.memory_space<vmem>>, vector<1x128xf32>
    %43 = vector.broadcast %42 : vector<1x128xf32> to vector<24x128xf32>
    %44 = arith.addf %1, %43 : vector<24x128xf32>
    %c0_21 = arith.constant 0 : index
    %c0_22 = arith.constant 0 : index
    %45 = vector.load %arg17[%c0_21, %c0_22] : memref<24x384xbf16, #tpu.memory_space<vmem>>, vector<24x32xbf16>
    %c0_23 = arith.constant 0 : index
    %c128 = arith.constant 128 : index
    %46 = vector.load %arg17[%c0_23, %c128] : memref<24x384xbf16, #tpu.memory_space<vmem>>, vector<24x32xbf16>
    %c0_24 = arith.constant 0 : index
    %c256 = arith.constant 256 : index
    %47 = vector.load %arg17[%c0_24, %c256] : memref<24x384xbf16, #tpu.memory_space<vmem>>, vector<24x32xbf16>
    %cst_25 = arith.constant dense<0.000000e+00> : vector<24x24xf32>
    %48 = tpu.matmul %45, %46, %cst_25 {dimension_numbers = #tpu.dot_dimension_numbers<[1], [1], [0], [0], [0, 0, 1, 0], [], []>} : vector<24x32xbf16>, vector<24x32xbf16>, vector<24x24xf32> -> vector<24x24xf32>
    %49 = arith.addf %48, %41 : vector<24x24xf32>
    %cst_26 = arith.constant dense<0xFF800000> : vector<24xf32>
    %50 = vector.multi_reduction <maximumf>, %49, %cst_26 [1] : vector<24x24xf32> to vector<24xf32>
    %51 = vector.shape_cast %50 : vector<24xf32> to vector<24x1xf32>
    %52 = vector.broadcast %51 : vector<24x1xf32> to vector<24x24xf32>
    %53 = arith.subf %49, %52 : vector<24x24xf32>
    %54 = math.exp %53 : vector<24x24xf32>
    %cst_27 = arith.constant dense<0.000000e+00> : vector<24xf32>
    %55 = vector.multi_reduction <add>, %54, %cst_27 [1] : vector<24x24xf32> to vector<24xf32>
    %56 = vector.shape_cast %55 : vector<24xf32> to vector<24x1xf32>
    %cst_28 = arith.constant 1.000000e+00 : f32
    %57 = vector.broadcast %cst_28 : f32 to vector<24x1xf32>
    %58 = arith.divf %57, %56 : vector<24x1xf32>
    %59 = vector.broadcast %58 : vector<24x1xf32> to vector<24x24xf32>
    %60 = arith.mulf %54, %59 : vector<24x24xf32>
    %61 = arith.truncf %60 : vector<24x24xf32> to vector<24x24xbf16>
    %cst_29 = arith.constant dense<0.000000e+00> : vector<24x32xf32>
    %62 = tpu.matmul %61, %47, %cst_29 {dimension_numbers = #tpu.dot_dimension_numbers<[1], [0], [0], [1], [0, 0, 1, 1], [], []>} : vector<24x24xbf16>, vector<24x32xbf16>, vector<24x32xf32> -> vector<24x32xf32>
    %63 = arith.truncf %62 : vector<24x32xf32> to vector<24x32xbf16>
    %c0_30 = arith.constant 0 : index
    %c0_31 = arith.constant 0 : index
    %64 = vector.load %arg6[%c0_30, %c0_31] : memref<128x128xbf16, #tpu.memory_space<vmem>>, vector<32x128xbf16>
    %cst_32 = arith.constant dense<0.000000e+00> : vector<24x128xf32>
    %65 = tpu.matmul %63, %64, %cst_32 {dimension_numbers = #tpu.dot_dimension_numbers<[1], [0], [0], [1], [0, 0, 1, 1], [], []>} : vector<24x32xbf16>, vector<32x128xbf16>, vector<24x128xf32> -> vector<24x128xf32>
    %66 = arith.addf %44, %65 : vector<24x128xf32>
    %c0_33 = arith.constant 0 : index
    %c32 = arith.constant 32 : index
    %67 = vector.load %arg17[%c0_33, %c32] : memref<24x384xbf16, #tpu.memory_space<vmem>>, vector<24x32xbf16>
    %c0_34 = arith.constant 0 : index
    %c160 = arith.constant 160 : index
    %68 = vector.load %arg17[%c0_34, %c160] : memref<24x384xbf16, #tpu.memory_space<vmem>>, vector<24x32xbf16>
    %c0_35 = arith.constant 0 : index
    %c288 = arith.constant 288 : index
    %69 = vector.load %arg17[%c0_35, %c288] : memref<24x384xbf16, #tpu.memory_space<vmem>>, vector<24x32xbf16>
    %cst_36 = arith.constant dense<0.000000e+00> : vector<24x24xf32>
    %70 = tpu.matmul %67, %68, %cst_36 {dimension_numbers = #tpu.dot_dimension_numbers<[1], [1], [0], [0], [0, 0, 1, 0], [], []>} : vector<24x32xbf16>, vector<24x32xbf16>, vector<24x24xf32> -> vector<24x24xf32>
    %71 = arith.addf %70, %41 : vector<24x24xf32>
    %cst_37 = arith.constant dense<0xFF800000> : vector<24xf32>
    %72 = vector.multi_reduction <maximumf>, %71, %cst_37 [1] : vector<24x24xf32> to vector<24xf32>
    %73 = vector.shape_cast %72 : vector<24xf32> to vector<24x1xf32>
    %74 = vector.broadcast %73 : vector<24x1xf32> to vector<24x24xf32>
    %75 = arith.subf %71, %74 : vector<24x24xf32>
    %76 = math.exp %75 : vector<24x24xf32>
    %cst_38 = arith.constant dense<0.000000e+00> : vector<24xf32>
    %77 = vector.multi_reduction <add>, %76, %cst_38 [1] : vector<24x24xf32> to vector<24xf32>
    %78 = vector.shape_cast %77 : vector<24xf32> to vector<24x1xf32>
    %cst_39 = arith.constant 1.000000e+00 : f32
    %79 = vector.broadcast %cst_39 : f32 to vector<24x1xf32>
    %80 = arith.divf %79, %78 : vector<24x1xf32>
    %81 = vector.broadcast %80 : vector<24x1xf32> to vector<24x24xf32>
    %82 = arith.mulf %76, %81 : vector<24x24xf32>
    %83 = arith.truncf %82 : vector<24x24xf32> to vector<24x24xbf16>
    %cst_40 = arith.constant dense<0.000000e+00> : vector<24x32xf32>
    %84 = tpu.matmul %83, %69, %cst_40 {dimension_numbers = #tpu.dot_dimension_numbers<[1], [0], [0], [1], [0, 0, 1, 1], [], []>} : vector<24x24xbf16>, vector<24x32xbf16>, vector<24x32xf32> -> vector<24x32xf32>
    %85 = arith.truncf %84 : vector<24x32xf32> to vector<24x32xbf16>
    %c32_41 = arith.constant 32 : index
    %c0_42 = arith.constant 0 : index
    %86 = vector.load %arg6[%c32_41, %c0_42] : memref<128x128xbf16, #tpu.memory_space<vmem>>, vector<32x128xbf16>
    %cst_43 = arith.constant dense<0.000000e+00> : vector<24x128xf32>
    %87 = tpu.matmul %85, %86, %cst_43 {dimension_numbers = #tpu.dot_dimension_numbers<[1], [0], [0], [1], [0, 0, 1, 1], [], []>} : vector<24x32xbf16>, vector<32x128xbf16>, vector<24x128xf32> -> vector<24x128xf32>
    %88 = arith.addf %66, %87 : vector<24x128xf32>
    %c0_44 = arith.constant 0 : index
    %c64 = arith.constant 64 : index
    %89 = vector.load %arg17[%c0_44, %c64] : memref<24x384xbf16, #tpu.memory_space<vmem>>, vector<24x32xbf16>
    %c0_45 = arith.constant 0 : index
    %c192 = arith.constant 192 : index
    %90 = vector.load %arg17[%c0_45, %c192] : memref<24x384xbf16, #tpu.memory_space<vmem>>, vector<24x32xbf16>
    %c0_46 = arith.constant 0 : index
    %c320 = arith.constant 320 : index
    %91 = vector.load %arg17[%c0_46, %c320] : memref<24x384xbf16, #tpu.memory_space<vmem>>, vector<24x32xbf16>
    %cst_47 = arith.constant dense<0.000000e+00> : vector<24x24xf32>
    %92 = tpu.matmul %89, %90, %cst_47 {dimension_numbers = #tpu.dot_dimension_numbers<[1], [1], [0], [0], [0, 0, 1, 0], [], []>} : vector<24x32xbf16>, vector<24x32xbf16>, vector<24x24xf32> -> vector<24x24xf32>
    %93 = arith.addf %92, %41 : vector<24x24xf32>
    %cst_48 = arith.constant dense<0xFF800000> : vector<24xf32>
    %94 = vector.multi_reduction <maximumf>, %93, %cst_48 [1] : vector<24x24xf32> to vector<24xf32>
    %95 = vector.shape_cast %94 : vector<24xf32> to vector<24x1xf32>
    %96 = vector.broadcast %95 : vector<24x1xf32> to vector<24x24xf32>
    %97 = arith.subf %93, %96 : vector<24x24xf32>
    %98 = math.exp %97 : vector<24x24xf32>
    %cst_49 = arith.constant dense<0.000000e+00> : vector<24xf32>
    %99 = vector.multi_reduction <add>, %98, %cst_49 [1] : vector<24x24xf32> to vector<24xf32>
    %100 = vector.shape_cast %99 : vector<24xf32> to vector<24x1xf32>
    %cst_50 = arith.constant 1.000000e+00 : f32
    %101 = vector.broadcast %cst_50 : f32 to vector<24x1xf32>
    %102 = arith.divf %101, %100 : vector<24x1xf32>
    %103 = vector.broadcast %102 : vector<24x1xf32> to vector<24x24xf32>
    %104 = arith.mulf %98, %103 : vector<24x24xf32>
    %105 = arith.truncf %104 : vector<24x24xf32> to vector<24x24xbf16>
    %cst_51 = arith.constant dense<0.000000e+00> : vector<24x32xf32>
    %106 = tpu.matmul %105, %91, %cst_51 {dimension_numbers = #tpu.dot_dimension_numbers<[1], [0], [0], [1], [0, 0, 1, 1], [], []>} : vector<24x24xbf16>, vector<24x32xbf16>, vector<24x32xf32> -> vector<24x32xf32>
    %107 = arith.truncf %106 : vector<24x32xf32> to vector<24x32xbf16>
    %c64_52 = arith.constant 64 : index
    %c0_53 = arith.constant 0 : index
    %108 = vector.load %arg6[%c64_52, %c0_53] : memref<128x128xbf16, #tpu.memory_space<vmem>>, vector<32x128xbf16>
    %cst_54 = arith.constant dense<0.000000e+00> : vector<24x128xf32>
    %109 = tpu.matmul %107, %108, %cst_54 {dimension_numbers = #tpu.dot_dimension_numbers<[1], [0], [0], [1], [0, 0, 1, 1], [], []>} : vector<24x32xbf16>, vector<32x128xbf16>, vector<24x128xf32> -> vector<24x128xf32>
    %110 = arith.addf %88, %109 : vector<24x128xf32>
    %c0_55 = arith.constant 0 : index
    %c96 = arith.constant 96 : index
    %111 = vector.load %arg17[%c0_55, %c96] : memref<24x384xbf16, #tpu.memory_space<vmem>>, vector<24x32xbf16>
    %c0_56 = arith.constant 0 : index
    %c224 = arith.constant 224 : index
    %112 = vector.load %arg17[%c0_56, %c224] : memref<24x384xbf16, #tpu.memory_space<vmem>>, vector<24x32xbf16>
    %c0_57 = arith.constant 0 : index
    %c352 = arith.constant 352 : index
    %113 = vector.load %arg17[%c0_57, %c352] : memref<24x384xbf16, #tpu.memory_space<vmem>>, vector<24x32xbf16>
    %cst_58 = arith.constant dense<0.000000e+00> : vector<24x24xf32>
    %114 = tpu.matmul %111, %112, %cst_58 {dimension_numbers = #tpu.dot_dimension_numbers<[1], [1], [0], [0], [0, 0, 1, 0], [], []>} : vector<24x32xbf16>, vector<24x32xbf16>, vector<24x24xf32> -> vector<24x24xf32>
    %115 = arith.addf %114, %41 : vector<24x24xf32>
    %cst_59 = arith.constant dense<0xFF800000> : vector<24xf32>
    %116 = vector.multi_reduction <maximumf>, %115, %cst_59 [1] : vector<24x24xf32> to vector<24xf32>
    %117 = vector.shape_cast %116 : vector<24xf32> to vector<24x1xf32>
    %118 = vector.broadcast %117 : vector<24x1xf32> to vector<24x24xf32>
    %119 = arith.subf %115, %118 : vector<24x24xf32>
    %120 = math.exp %119 : vector<24x24xf32>
    %cst_60 = arith.constant dense<0.000000e+00> : vector<24xf32>
    %121 = vector.multi_reduction <add>, %120, %cst_60 [1] : vector<24x24xf32> to vector<24xf32>
    %122 = vector.shape_cast %121 : vector<24xf32> to vector<24x1xf32>
    %cst_61 = arith.constant 1.000000e+00 : f32
    %123 = vector.broadcast %cst_61 : f32 to vector<24x1xf32>
    %124 = arith.divf %123, %122 : vector<24x1xf32>
    %125 = vector.broadcast %124 : vector<24x1xf32> to vector<24x24xf32>
    %126 = arith.mulf %120, %125 : vector<24x24xf32>
    %127 = arith.truncf %126 : vector<24x24xf32> to vector<24x24xbf16>
    %cst_62 = arith.constant dense<0.000000e+00> : vector<24x32xf32>
    %128 = tpu.matmul %127, %113, %cst_62 {dimension_numbers = #tpu.dot_dimension_numbers<[1], [0], [0], [1], [0, 0, 1, 1], [], []>} : vector<24x24xbf16>, vector<24x32xbf16>, vector<24x32xf32> -> vector<24x32xf32>
    %129 = arith.truncf %128 : vector<24x32xf32> to vector<24x32xbf16>
    %c96_63 = arith.constant 96 : index
    %c0_64 = arith.constant 0 : index
    %130 = vector.load %arg6[%c96_63, %c0_64] : memref<128x128xbf16, #tpu.memory_space<vmem>>, vector<32x128xbf16>
    %cst_65 = arith.constant dense<0.000000e+00> : vector<24x128xf32>
    %131 = tpu.matmul %129, %130, %cst_65 {dimension_numbers = #tpu.dot_dimension_numbers<[1], [0], [0], [1], [0, 0, 1, 1], [], []>} : vector<24x32xbf16>, vector<32x128xbf16>, vector<24x128xf32> -> vector<24x128xf32>
    %132 = arith.addf %110, %131 : vector<24x128xf32>
    %c0_66 = arith.constant 0 : index
    %c0_67 = arith.constant 0 : index
    %133 = vector.load %arg8[%c0_66, %c0_67] : memref<1x128xf32, #tpu.memory_space<vmem>>, vector<1x128xf32>
    %c0_68 = arith.constant 0 : index
    %c0_69 = arith.constant 0 : index
    %134 = vector.load %arg9[%c0_68, %c0_69] : memref<1x128xf32, #tpu.memory_space<vmem>>, vector<1x128xf32>
    %cst_70 = arith.constant dense<0.000000e+00> : vector<24xf32>
    %135 = vector.multi_reduction <add>, %132, %cst_70 [1] : vector<24x128xf32> to vector<24xf32>
    %136 = vector.shape_cast %135 : vector<24xf32> to vector<24x1xf32>
    %cst_71 = arith.constant 1.280000e+02 : f32
    %137 = vector.broadcast %cst_71 : f32 to vector<24x1xf32>
    %138 = arith.divf %136, %137 : vector<24x1xf32>
    %139 = vector.broadcast %138 : vector<24x1xf32> to vector<24x128xf32>
    %140 = arith.subf %132, %139 : vector<24x128xf32>
    %141 = vector.broadcast %138 : vector<24x1xf32> to vector<24x128xf32>
    %142 = arith.subf %132, %141 : vector<24x128xf32>
    %143 = arith.mulf %140, %142 : vector<24x128xf32>
    %cst_72 = arith.constant dense<0.000000e+00> : vector<24xf32>
    %144 = vector.multi_reduction <add>, %143, %cst_72 [1] : vector<24x128xf32> to vector<24xf32>
    %145 = vector.shape_cast %144 : vector<24xf32> to vector<24x1xf32>
    %cst_73 = arith.constant 1.280000e+02 : f32
    %146 = vector.broadcast %cst_73 : f32 to vector<24x1xf32>
    %147 = arith.divf %145, %146 : vector<24x1xf32>
    %148 = vector.broadcast %138 : vector<24x1xf32> to vector<24x128xf32>
    %149 = arith.subf %132, %148 : vector<24x128xf32>
    %cst_74 = arith.constant 9.99999997E-7 : f32
    %150 = vector.broadcast %cst_74 : f32 to vector<24x1xf32>
    %151 = arith.addf %147, %150 : vector<24x1xf32>
    %152 = math.rsqrt %151 : vector<24x1xf32>
    %153 = vector.broadcast %152 : vector<24x1xf32> to vector<24x128xf32>
    %154 = arith.mulf %149, %153 : vector<24x128xf32>
    %155 = vector.broadcast %133 : vector<1x128xf32> to vector<24x128xf32>
    %156 = arith.mulf %154, %155 : vector<24x128xf32>
    %157 = vector.broadcast %134 : vector<1x128xf32> to vector<24x128xf32>
    %158 = arith.addf %156, %157 : vector<24x128xf32>
    %159 = arith.truncf %158 : vector<24x128xf32> to vector<24x128xbf16>
    %c0_75 = arith.constant 0 : index
    %c0_76 = arith.constant 0 : index
    %160 = vector.load %arg10[%c0_75, %c0_76] : memref<128x512xbf16, #tpu.memory_space<vmem>>, vector<128x512xbf16>
    %cst_77 = arith.constant dense<0.000000e+00> : vector<24x512xf32>
    %161 = tpu.matmul %159, %160, %cst_77 {dimension_numbers = #tpu.dot_dimension_numbers<[1], [0], [0], [1], [0, 0, 1, 1], [], []>} : vector<24x128xbf16>, vector<128x512xbf16>, vector<24x512xf32> -> vector<24x512xf32>
    %c0_78 = arith.constant 0 : index
    %c0_79 = arith.constant 0 : index
    %162 = vector.load %arg11[%c0_78, %c0_79] : memref<1x512xf32, #tpu.memory_space<vmem>>, vector<1x512xf32>
    %163 = vector.broadcast %162 : vector<1x512xf32> to vector<24x512xf32>
    %164 = arith.addf %161, %163 : vector<24x512xf32>
    %cst_80 = arith.constant 5.000000e-01 : f32
    %165 = vector.broadcast %cst_80 : f32 to vector<24x512xf32>
    %166 = arith.mulf %165, %164 : vector<24x512xf32>
    %cst_81 = arith.constant 0.707106769 : f32
    %167 = vector.broadcast %cst_81 : f32 to vector<24x512xf32>
    %168 = arith.mulf %164, %167 : vector<24x512xf32>
    %169 = math.erf %168 : vector<24x512xf32>
    %cst_82 = arith.constant 1.000000e+00 : f32
    %170 = vector.broadcast %cst_82 : f32 to vector<24x512xf32>
    %171 = arith.addf %170, %169 : vector<24x512xf32>
    %172 = arith.mulf %166, %171 : vector<24x512xf32>
    %173 = arith.truncf %172 : vector<24x512xf32> to vector<24x512xbf16>
    %c0_83 = arith.constant 0 : index
    %c0_84 = arith.constant 0 : index
    %174 = vector.load %arg12[%c0_83, %c0_84] : memref<512x128xbf16, #tpu.memory_space<vmem>>, vector<512x128xbf16>
    %cst_85 = arith.constant dense<0.000000e+00> : vector<24x128xf32>
    %175 = tpu.matmul %173, %174, %cst_85 {dimension_numbers = #tpu.dot_dimension_numbers<[1], [0], [0], [1], [0, 0, 1, 1], [], []>} : vector<24x512xbf16>, vector<512x128xbf16>, vector<24x128xf32> -> vector<24x128xf32>
    %c0_86 = arith.constant 0 : index
    %c0_87 = arith.constant 0 : index
    %176 = vector.load %arg13[%c0_86, %c0_87] : memref<1x128xf32, #tpu.memory_space<vmem>>, vector<1x128xf32>
    %177 = vector.broadcast %176 : vector<1x128xf32> to vector<24x128xf32>
    %178 = arith.addf %175, %177 : vector<24x128xf32>
    %179 = arith.addf %132, %178 : vector<24x128xf32>
    %c0_88 = arith.constant 0 : index
    %c0_89 = arith.constant 0 : index
    %c0_90 = arith.constant 0 : index
    %180 = vector.load %arg16[%c0_88, %c0_89, %c0_90] : memref<1x24x128xf32, #tpu.memory_space<vmem>>, vector<1x24x128xf32>
    %181 = vector.shape_cast %180 : vector<1x24x128xf32> to vector<24x128xf32>
    %182 = vector.shape_cast %179 : vector<24x128xf32> to vector<1x24x128xf32>
    tpu.vector_store %arg16[%c0_88, %c0_89, %c0_90], %182 {strides = array<i32>} : memref<1x24x128xf32, #tpu.memory_space<vmem>>, vector<1x24x128xf32>,
    return
  }
  func.func @transform_0(%arg0: i32) -> (i32, i32, i32) {
    %c0_i32 = arith.constant 0 : i32
    %c0_i32_0 = arith.constant 0 : i32
    %c0_i32_1 = arith.constant 0 : i32
    return %arg0, %c0_i32, %c0_i32_0 : i32, i32, i32
  }
  func.func @transform_1(%arg0: i32) -> (i32, i32) {
    %c0_i32 = arith.constant 0 : i32
    %c0_i32_0 = arith.constant 0 : i32
    %c0_i32_1 = arith.constant 0 : i32
    return %c0_i32, %c0_i32_0 : i32, i32
  }
  func.func @transform_2(%arg0: i32) -> (i32, i32) {
    %c0_i32 = arith.constant 0 : i32
    %c0_i32_0 = arith.constant 0 : i32
    %c0_i32_1 = arith.constant 0 : i32
    return %c0_i32, %c0_i32_0 : i32, i32
  }
  func.func @transform_3(%arg0: i32) -> (i32, i32) {
    %c0_i32 = arith.constant 0 : i32
    %c0_i32_0 = arith.constant 0 : i32
    %c0_i32_1 = arith.constant 0 : i32
    return %c0_i32, %c0_i32_0 : i32, i32
  }
  func.func @transform_4(%arg0: i32) -> (i32, i32) {
    %c0_i32 = arith.constant 0 : i32
    %c0_i32_0 = arith.constant 0 : i32
    %c0_i32_1 = arith.constant 0 : i32
    return %c0_i32, %c0_i32_0 : i32, i32
  }
  func.func @transform_5(%arg0: i32) -> (i32, i32) {
    %c0_i32 = arith.constant 0 : i32
    %c0_i32_0 = arith.constant 0 : i32
    %c0_i32_1 = arith.constant 0 : i32
    return %c0_i32, %c0_i32_0 : i32, i32
  }
  func.func @transform_6(%arg0: i32) -> (i32, i32) {
    %c0_i32 = arith.constant 0 : i32
    %c0_i32_0 = arith.constant 0 : i32
    %c0_i32_1 = arith.constant 0 : i32
    return %c0_i32, %c0_i32_0 : i32, i32
  }
  func.func @transform_7(%arg0: i32) -> (i32, i32) {
    %c0_i32 = arith.constant 0 : i32
    %c0_i32_0 = arith.constant 0 : i32
    %c0_i32_1 = arith.constant 0 : i32
    return %c0_i32, %c0_i32_0 : i32, i32
  }
  func.func @transform_8(%arg0: i32) -> (i32, i32) {
    %c0_i32 = arith.constant 0 : i32
    %c0_i32_0 = arith.constant 0 : i32
    %c0_i32_1 = arith.constant 0 : i32
    return %c0_i32, %c0_i32_0 : i32, i32
  }
  func.func @transform_9(%arg0: i32) -> (i32, i32) {
    %c0_i32 = arith.constant 0 : i32
    %c0_i32_0 = arith.constant 0 : i32
    %c0_i32_1 = arith.constant 0 : i32
    return %c0_i32, %c0_i32_0 : i32, i32
  }
  func.func @transform_10(%arg0: i32) -> (i32, i32) {
    %c0_i32 = arith.constant 0 : i32
    %c0_i32_0 = arith.constant 0 : i32
    %c0_i32_1 = arith.constant 0 : i32
    return %c0_i32, %c0_i32_0 : i32, i32
  }
  func.func @transform_11(%arg0: i32) -> (i32, i32) {
    %c0_i32 = arith.constant 0 : i32
    %c0_i32_0 = arith.constant 0 : i32
    %c0_i32_1 = arith.constant 0 : i32
    return %c0_i32, %c0_i32_0 : i32, i32
  }
  func.func @transform_12(%arg0: i32) -> (i32, i32) {
    %c0_i32 = arith.constant 0 : i32
    %c0_i32_0 = arith.constant 0 : i32
    %c0_i32_1 = arith.constant 0 : i32
    return %c0_i32, %c0_i32_0 : i32, i32
  }
  func.func @transform_13(%arg0: i32) -> (i32, i32) {
    %c0_i32 = arith.constant 0 : i32
    %c0_i32_0 = arith.constant 0 : i32
    %c0_i32_1 = arith.constant 0 : i32
    return %c0_i32, %c0_i32_0 : i32, i32
  }
  func.func @transform_14(%arg0: i32) -> (i32, i32) {
    %c0_i32 = arith.constant 0 : i32
    %c0_i32_0 = arith.constant 0 : i32
    %c0_i32_1 = arith.constant 0 : i32
    return %c0_i32, %c0_i32_0 : i32, i32
  }
  func.func @transform_15(%arg0: i32) -> (i32, i32, i32) {
    %c0_i32 = arith.constant 0 : i32
    %c0_i32_0 = arith.constant 0 : i32
    %c0_i32_1 = arith.constant 0 : i32
    return %arg0, %c0_i32, %c0_i32_0 : i32, i32, i32
  }
}

module attributes {stable_mosaic.version = 11 : i64} {
  func.func @_block_kernel(%arg0: i32, %arg1: memref<1x24x128xf32, #tpu.memory_space<vmem>>, %arg2: memref<1x128xf32, #tpu.memory_space<vmem>>, %arg3: memref<1x128xf32, #tpu.memory_space<vmem>>, %arg4: memref<128x384xbf16, #tpu.memory_space<vmem>>, %arg5: memref<1x384xf32, #tpu.memory_space<vmem>>, %arg6: memref<128x128xbf16, #tpu.memory_space<vmem>>, %arg7: memref<1x128xf32, #tpu.memory_space<vmem>>, %arg8: memref<1x128xf32, #tpu.memory_space<vmem>>, %arg9: memref<1x128xf32, #tpu.memory_space<vmem>>, %arg10: memref<128x512xbf16, #tpu.memory_space<vmem>>, %arg11: memref<1x512xf32, #tpu.memory_space<vmem>>, %arg12: memref<512x128xbf16, #tpu.memory_space<vmem>>, %arg13: memref<1x128xf32, #tpu.memory_space<vmem>>, %arg14: memref<1x128xf32, #tpu.memory_space<vmem>>, %arg15: memref<1x128xf32, #tpu.memory_space<vmem>>, %arg16: memref<1x24x128xf32, #tpu.memory_space<vmem>>, %arg17: memref<1x4x24x24xf32, #tpu.memory_space<vmem>>, %arg18: memref<24x384xbf16, #tpu.memory_space<vmem>>) attributes {dimension_semantics = [#tpu.dimension_semantics<parallel>], iteration_bounds = array<i64: 2>, scalar_prefetch = 0 : i64, scratch_operands = 1 : i64, tpu.core_type = #tpu.core_type<tc>, window_params = [{transform_indices = @transform_0, window_bounds = array<i64: 1, 24, 128>}, {pipeline_mode = #tpu.pipeline_mode<synchronous>, transform_indices = @transform_1, window_bounds = array<i64: 1, 128>}, {pipeline_mode = #tpu.pipeline_mode<synchronous>, transform_indices = @transform_2, window_bounds = array<i64: 1, 128>}, {pipeline_mode = #tpu.pipeline_mode<synchronous>, transform_indices = @transform_3, window_bounds = array<i64: 128, 384>}, {pipeline_mode = #tpu.pipeline_mode<synchronous>, transform_indices = @transform_4, window_bounds = array<i64: 1, 384>}, {pipeline_mode = #tpu.pipeline_mode<synchronous>, transform_indices = @transform_5, window_bounds = array<i64: 128, 128>}, {pipeline_mode = #tpu.pipeline_mode<synchronous>, transform_indices = @transform_6, window_bounds = array<i64: 1, 128>}, {pipeline_mode = #tpu.pipeline_mode<synchronous>, transform_indices = @transform_7, window_bounds = array<i64: 1, 128>}, {pipeline_mode = #tpu.pipeline_mode<synchronous>, transform_indices = @transform_8, window_bounds = array<i64: 1, 128>}, {pipeline_mode = #tpu.pipeline_mode<synchronous>, transform_indices = @transform_9, window_bounds = array<i64: 128, 512>}, {pipeline_mode = #tpu.pipeline_mode<synchronous>, transform_indices = @transform_10, window_bounds = array<i64: 1, 512>}, {pipeline_mode = #tpu.pipeline_mode<synchronous>, transform_indices = @transform_11, window_bounds = array<i64: 512, 128>}, {pipeline_mode = #tpu.pipeline_mode<synchronous>, transform_indices = @transform_12, window_bounds = array<i64: 1, 128>}, {pipeline_mode = #tpu.pipeline_mode<synchronous>, transform_indices = @transform_13, window_bounds = array<i64: 1, 128>}, {pipeline_mode = #tpu.pipeline_mode<synchronous>, transform_indices = @transform_14, window_bounds = array<i64: 1, 128>}, {transform_indices = @transform_15, window_bounds = array<i64: 1, 24, 128>}, {transform_indices = @transform_16, window_bounds = array<i64: 1, 4, 24, 24>}]} {
    %c0 = arith.constant 0 : index
    %c0_0 = arith.constant 0 : index
    %c0_1 = arith.constant 0 : index
    %0 = vector.load %arg1[%c0, %c0_0, %c0_1] : memref<1x24x128xf32, #tpu.memory_space<vmem>>, vector<1x24x128xf32>
    %1 = vector.shape_cast %0 : vector<1x24x128xf32> to vector<24x128xf32>
    %c0_2 = arith.constant 0 : index
    %c0_3 = arith.constant 0 : index
    %2 = vector.load %arg2[%c0_2, %c0_3] : memref<1x128xf32, #tpu.memory_space<vmem>>, vector<1x128xf32>
    %c0_4 = arith.constant 0 : index
    %c0_5 = arith.constant 0 : index
    %3 = vector.load %arg3[%c0_4, %c0_5] : memref<1x128xf32, #tpu.memory_space<vmem>>, vector<1x128xf32>
    %cst = arith.constant dense<0.000000e+00> : vector<24xf32>
    %4 = vector.multi_reduction <add>, %1, %cst [1] : vector<24x128xf32> to vector<24xf32>
    %5 = vector.shape_cast %4 : vector<24xf32> to vector<24x1xf32>
    %cst_6 = arith.constant 1.280000e+02 : f32
    %6 = vector.broadcast %cst_6 : f32 to vector<24x1xf32>
    %7 = arith.divf %5, %6 : vector<24x1xf32>
    %8 = vector.broadcast %7 : vector<24x1xf32> to vector<24x128xf32>
    %9 = arith.subf %1, %8 : vector<24x128xf32>
    %10 = vector.broadcast %7 : vector<24x1xf32> to vector<24x128xf32>
    %11 = arith.subf %1, %10 : vector<24x128xf32>
    %12 = arith.mulf %9, %11 : vector<24x128xf32>
    %cst_7 = arith.constant dense<0.000000e+00> : vector<24xf32>
    %13 = vector.multi_reduction <add>, %12, %cst_7 [1] : vector<24x128xf32> to vector<24xf32>
    %14 = vector.shape_cast %13 : vector<24xf32> to vector<24x1xf32>
    %cst_8 = arith.constant 1.280000e+02 : f32
    %15 = vector.broadcast %cst_8 : f32 to vector<24x1xf32>
    %16 = arith.divf %14, %15 : vector<24x1xf32>
    %17 = vector.broadcast %7 : vector<24x1xf32> to vector<24x128xf32>
    %18 = arith.subf %1, %17 : vector<24x128xf32>
    %cst_9 = arith.constant 9.99999997E-7 : f32
    %19 = vector.broadcast %cst_9 : f32 to vector<24x1xf32>
    %20 = arith.addf %16, %19 : vector<24x1xf32>
    %21 = math.rsqrt %20 : vector<24x1xf32>
    %22 = vector.broadcast %21 : vector<24x1xf32> to vector<24x128xf32>
    %23 = arith.mulf %18, %22 : vector<24x128xf32>
    %24 = vector.broadcast %2 : vector<1x128xf32> to vector<24x128xf32>
    %25 = arith.mulf %23, %24 : vector<24x128xf32>
    %26 = vector.broadcast %3 : vector<1x128xf32> to vector<24x128xf32>
    %27 = arith.addf %25, %26 : vector<24x128xf32>
    %28 = arith.truncf %27 : vector<24x128xf32> to vector<24x128xbf16>
    %c0_10 = arith.constant 0 : index
    %c0_11 = arith.constant 0 : index
    %29 = vector.load %arg4[%c0_10, %c0_11] : memref<128x384xbf16, #tpu.memory_space<vmem>>, vector<128x384xbf16>
    %cst_12 = arith.constant dense<0.000000e+00> : vector<24x384xf32>
    %30 = tpu.matmul %28, %29, %cst_12 {dimension_numbers = #tpu.dot_dimension_numbers<[1], [0], [0], [1], [0, 0, 1, 1], [], []>} : vector<24x128xbf16>, vector<128x384xbf16>, vector<24x384xf32> -> vector<24x384xf32>
    %c0_13 = arith.constant 0 : index
    %c0_14 = arith.constant 0 : index
    %31 = vector.load %arg5[%c0_13, %c0_14] : memref<1x384xf32, #tpu.memory_space<vmem>>, vector<1x384xf32>
    %32 = vector.broadcast %31 : vector<1x384xf32> to vector<24x384xf32>
    %33 = arith.addf %30, %32 : vector<24x384xf32>
    %34 = arith.truncf %33 : vector<24x384xf32> to vector<24x384xbf16>
    %c0_15 = arith.constant 0 : index
    %c0_16 = arith.constant 0 : index
    %35 = vector.load %arg18[%c0_15, %c0_16] : memref<24x384xbf16, #tpu.memory_space<vmem>>, vector<24x384xbf16>
    tpu.vector_store %arg18[%c0_15, %c0_16], %34 {strides = array<i32>} : memref<24x384xbf16, #tpu.memory_space<vmem>>, vector<24x384xbf16>,
    %36 = tpu.iota {dimensions = array<i32: 1>} : vector<24x24xi32>
    %c17_i32 = arith.constant 17 : i32
    %37 = vector.broadcast %c17_i32 : i32 to vector<24x24xi32>
    %38 = arith.cmpi slt, %36, %37 : vector<24x24xi32>
    %cst_17 = arith.constant 0.000000e+00 : f32
    %cst_18 = arith.constant -1.000000e+30 : f32
    %39 = vector.broadcast %cst_17 : f32 to vector<24x24xf32>
    %40 = vector.broadcast %cst_18 : f32 to vector<24x24xf32>
    %41 = arith.select %38, %39, %40 : vector<24x24xi1>, vector<24x24xf32>
    %c0_19 = arith.constant 0 : index
    %c0_20 = arith.constant 0 : index
    %42 = vector.load %arg7[%c0_19, %c0_20] : memref<1x128xf32, #tpu.memory_space<vmem>>, vector<1x128xf32>
    %43 = vector.broadcast %42 : vector<1x128xf32> to vector<24x128xf32>
    %44 = arith.addf %1, %43 : vector<24x128xf32>
    %c0_21 = arith.constant 0 : index
    %c0_22 = arith.constant 0 : index
    %45 = vector.load %arg18[%c0_21, %c0_22] : memref<24x384xbf16, #tpu.memory_space<vmem>>, vector<24x32xbf16>
    %c0_23 = arith.constant 0 : index
    %c128 = arith.constant 128 : index
    %46 = vector.load %arg18[%c0_23, %c128] : memref<24x384xbf16, #tpu.memory_space<vmem>>, vector<24x32xbf16>
    %c0_24 = arith.constant 0 : index
    %c256 = arith.constant 256 : index
    %47 = vector.load %arg18[%c0_24, %c256] : memref<24x384xbf16, #tpu.memory_space<vmem>>, vector<24x32xbf16>
    %cst_25 = arith.constant dense<0.000000e+00> : vector<24x24xf32>
    %48 = tpu.matmul %45, %46, %cst_25 {dimension_numbers = #tpu.dot_dimension_numbers<[1], [1], [0], [0], [0, 0, 1, 0], [], []>} : vector<24x32xbf16>, vector<24x32xbf16>, vector<24x24xf32> -> vector<24x24xf32>
    %49 = arith.addf %48, %41 : vector<24x24xf32>
    %cst_26 = arith.constant dense<0xFF800000> : vector<24xf32>
    %50 = vector.multi_reduction <maximumf>, %49, %cst_26 [1] : vector<24x24xf32> to vector<24xf32>
    %51 = vector.shape_cast %50 : vector<24xf32> to vector<24x1xf32>
    %52 = vector.broadcast %51 : vector<24x1xf32> to vector<24x24xf32>
    %53 = arith.subf %49, %52 : vector<24x24xf32>
    %54 = math.exp %53 : vector<24x24xf32>
    %cst_27 = arith.constant dense<0.000000e+00> : vector<24xf32>
    %55 = vector.multi_reduction <add>, %54, %cst_27 [1] : vector<24x24xf32> to vector<24xf32>
    %56 = vector.shape_cast %55 : vector<24xf32> to vector<24x1xf32>
    %cst_28 = arith.constant 1.000000e+00 : f32
    %57 = vector.broadcast %cst_28 : f32 to vector<24x1xf32>
    %58 = arith.divf %57, %56 : vector<24x1xf32>
    %59 = vector.broadcast %58 : vector<24x1xf32> to vector<24x24xf32>
    %60 = arith.mulf %54, %59 : vector<24x24xf32>
    %c0_29 = arith.constant 0 : index
    %c0_30 = arith.constant 0 : index
    %c0_31 = arith.constant 0 : index
    %c0_32 = arith.constant 0 : index
    %61 = vector.load %arg17[%c0_29, %c0_30, %c0_31, %c0_32] : memref<1x4x24x24xf32, #tpu.memory_space<vmem>>, vector<1x1x24x24xf32>
    %62 = vector.shape_cast %61 : vector<1x1x24x24xf32> to vector<24x24xf32>
    %63 = vector.shape_cast %60 : vector<24x24xf32> to vector<1x1x24x24xf32>
    tpu.vector_store %arg17[%c0_29, %c0_30, %c0_31, %c0_32], %63 {strides = array<i32>} : memref<1x4x24x24xf32, #tpu.memory_space<vmem>>, vector<1x1x24x24xf32>,
    %64 = arith.truncf %60 : vector<24x24xf32> to vector<24x24xbf16>
    %cst_33 = arith.constant dense<0.000000e+00> : vector<24x32xf32>
    %65 = tpu.matmul %64, %47, %cst_33 {dimension_numbers = #tpu.dot_dimension_numbers<[1], [0], [0], [1], [0, 0, 1, 1], [], []>} : vector<24x24xbf16>, vector<24x32xbf16>, vector<24x32xf32> -> vector<24x32xf32>
    %66 = arith.truncf %65 : vector<24x32xf32> to vector<24x32xbf16>
    %c0_34 = arith.constant 0 : index
    %c0_35 = arith.constant 0 : index
    %67 = vector.load %arg6[%c0_34, %c0_35] : memref<128x128xbf16, #tpu.memory_space<vmem>>, vector<32x128xbf16>
    %cst_36 = arith.constant dense<0.000000e+00> : vector<24x128xf32>
    %68 = tpu.matmul %66, %67, %cst_36 {dimension_numbers = #tpu.dot_dimension_numbers<[1], [0], [0], [1], [0, 0, 1, 1], [], []>} : vector<24x32xbf16>, vector<32x128xbf16>, vector<24x128xf32> -> vector<24x128xf32>
    %69 = arith.addf %44, %68 : vector<24x128xf32>
    %c0_37 = arith.constant 0 : index
    %c32 = arith.constant 32 : index
    %70 = vector.load %arg18[%c0_37, %c32] : memref<24x384xbf16, #tpu.memory_space<vmem>>, vector<24x32xbf16>
    %c0_38 = arith.constant 0 : index
    %c160 = arith.constant 160 : index
    %71 = vector.load %arg18[%c0_38, %c160] : memref<24x384xbf16, #tpu.memory_space<vmem>>, vector<24x32xbf16>
    %c0_39 = arith.constant 0 : index
    %c288 = arith.constant 288 : index
    %72 = vector.load %arg18[%c0_39, %c288] : memref<24x384xbf16, #tpu.memory_space<vmem>>, vector<24x32xbf16>
    %cst_40 = arith.constant dense<0.000000e+00> : vector<24x24xf32>
    %73 = tpu.matmul %70, %71, %cst_40 {dimension_numbers = #tpu.dot_dimension_numbers<[1], [1], [0], [0], [0, 0, 1, 0], [], []>} : vector<24x32xbf16>, vector<24x32xbf16>, vector<24x24xf32> -> vector<24x24xf32>
    %74 = arith.addf %73, %41 : vector<24x24xf32>
    %cst_41 = arith.constant dense<0xFF800000> : vector<24xf32>
    %75 = vector.multi_reduction <maximumf>, %74, %cst_41 [1] : vector<24x24xf32> to vector<24xf32>
    %76 = vector.shape_cast %75 : vector<24xf32> to vector<24x1xf32>
    %77 = vector.broadcast %76 : vector<24x1xf32> to vector<24x24xf32>
    %78 = arith.subf %74, %77 : vector<24x24xf32>
    %79 = math.exp %78 : vector<24x24xf32>
    %cst_42 = arith.constant dense<0.000000e+00> : vector<24xf32>
    %80 = vector.multi_reduction <add>, %79, %cst_42 [1] : vector<24x24xf32> to vector<24xf32>
    %81 = vector.shape_cast %80 : vector<24xf32> to vector<24x1xf32>
    %cst_43 = arith.constant 1.000000e+00 : f32
    %82 = vector.broadcast %cst_43 : f32 to vector<24x1xf32>
    %83 = arith.divf %82, %81 : vector<24x1xf32>
    %84 = vector.broadcast %83 : vector<24x1xf32> to vector<24x24xf32>
    %85 = arith.mulf %79, %84 : vector<24x24xf32>
    %c0_44 = arith.constant 0 : index
    %c1 = arith.constant 1 : index
    %c0_45 = arith.constant 0 : index
    %c0_46 = arith.constant 0 : index
    %86 = vector.load %arg17[%c0_44, %c1, %c0_45, %c0_46] : memref<1x4x24x24xf32, #tpu.memory_space<vmem>>, vector<1x1x24x24xf32>
    %87 = vector.shape_cast %86 : vector<1x1x24x24xf32> to vector<24x24xf32>
    %88 = vector.shape_cast %85 : vector<24x24xf32> to vector<1x1x24x24xf32>
    tpu.vector_store %arg17[%c0_44, %c1, %c0_45, %c0_46], %88 {strides = array<i32>} : memref<1x4x24x24xf32, #tpu.memory_space<vmem>>, vector<1x1x24x24xf32>,
    %89 = arith.truncf %85 : vector<24x24xf32> to vector<24x24xbf16>
    %cst_47 = arith.constant dense<0.000000e+00> : vector<24x32xf32>
    %90 = tpu.matmul %89, %72, %cst_47 {dimension_numbers = #tpu.dot_dimension_numbers<[1], [0], [0], [1], [0, 0, 1, 1], [], []>} : vector<24x24xbf16>, vector<24x32xbf16>, vector<24x32xf32> -> vector<24x32xf32>
    %91 = arith.truncf %90 : vector<24x32xf32> to vector<24x32xbf16>
    %c32_48 = arith.constant 32 : index
    %c0_49 = arith.constant 0 : index
    %92 = vector.load %arg6[%c32_48, %c0_49] : memref<128x128xbf16, #tpu.memory_space<vmem>>, vector<32x128xbf16>
    %cst_50 = arith.constant dense<0.000000e+00> : vector<24x128xf32>
    %93 = tpu.matmul %91, %92, %cst_50 {dimension_numbers = #tpu.dot_dimension_numbers<[1], [0], [0], [1], [0, 0, 1, 1], [], []>} : vector<24x32xbf16>, vector<32x128xbf16>, vector<24x128xf32> -> vector<24x128xf32>
    %94 = arith.addf %69, %93 : vector<24x128xf32>
    %c0_51 = arith.constant 0 : index
    %c64 = arith.constant 64 : index
    %95 = vector.load %arg18[%c0_51, %c64] : memref<24x384xbf16, #tpu.memory_space<vmem>>, vector<24x32xbf16>
    %c0_52 = arith.constant 0 : index
    %c192 = arith.constant 192 : index
    %96 = vector.load %arg18[%c0_52, %c192] : memref<24x384xbf16, #tpu.memory_space<vmem>>, vector<24x32xbf16>
    %c0_53 = arith.constant 0 : index
    %c320 = arith.constant 320 : index
    %97 = vector.load %arg18[%c0_53, %c320] : memref<24x384xbf16, #tpu.memory_space<vmem>>, vector<24x32xbf16>
    %cst_54 = arith.constant dense<0.000000e+00> : vector<24x24xf32>
    %98 = tpu.matmul %95, %96, %cst_54 {dimension_numbers = #tpu.dot_dimension_numbers<[1], [1], [0], [0], [0, 0, 1, 0], [], []>} : vector<24x32xbf16>, vector<24x32xbf16>, vector<24x24xf32> -> vector<24x24xf32>
    %99 = arith.addf %98, %41 : vector<24x24xf32>
    %cst_55 = arith.constant dense<0xFF800000> : vector<24xf32>
    %100 = vector.multi_reduction <maximumf>, %99, %cst_55 [1] : vector<24x24xf32> to vector<24xf32>
    %101 = vector.shape_cast %100 : vector<24xf32> to vector<24x1xf32>
    %102 = vector.broadcast %101 : vector<24x1xf32> to vector<24x24xf32>
    %103 = arith.subf %99, %102 : vector<24x24xf32>
    %104 = math.exp %103 : vector<24x24xf32>
    %cst_56 = arith.constant dense<0.000000e+00> : vector<24xf32>
    %105 = vector.multi_reduction <add>, %104, %cst_56 [1] : vector<24x24xf32> to vector<24xf32>
    %106 = vector.shape_cast %105 : vector<24xf32> to vector<24x1xf32>
    %cst_57 = arith.constant 1.000000e+00 : f32
    %107 = vector.broadcast %cst_57 : f32 to vector<24x1xf32>
    %108 = arith.divf %107, %106 : vector<24x1xf32>
    %109 = vector.broadcast %108 : vector<24x1xf32> to vector<24x24xf32>
    %110 = arith.mulf %104, %109 : vector<24x24xf32>
    %c0_58 = arith.constant 0 : index
    %c2 = arith.constant 2 : index
    %c0_59 = arith.constant 0 : index
    %c0_60 = arith.constant 0 : index
    %111 = vector.load %arg17[%c0_58, %c2, %c0_59, %c0_60] : memref<1x4x24x24xf32, #tpu.memory_space<vmem>>, vector<1x1x24x24xf32>
    %112 = vector.shape_cast %111 : vector<1x1x24x24xf32> to vector<24x24xf32>
    %113 = vector.shape_cast %110 : vector<24x24xf32> to vector<1x1x24x24xf32>
    tpu.vector_store %arg17[%c0_58, %c2, %c0_59, %c0_60], %113 {strides = array<i32>} : memref<1x4x24x24xf32, #tpu.memory_space<vmem>>, vector<1x1x24x24xf32>,
    %114 = arith.truncf %110 : vector<24x24xf32> to vector<24x24xbf16>
    %cst_61 = arith.constant dense<0.000000e+00> : vector<24x32xf32>
    %115 = tpu.matmul %114, %97, %cst_61 {dimension_numbers = #tpu.dot_dimension_numbers<[1], [0], [0], [1], [0, 0, 1, 1], [], []>} : vector<24x24xbf16>, vector<24x32xbf16>, vector<24x32xf32> -> vector<24x32xf32>
    %116 = arith.truncf %115 : vector<24x32xf32> to vector<24x32xbf16>
    %c64_62 = arith.constant 64 : index
    %c0_63 = arith.constant 0 : index
    %117 = vector.load %arg6[%c64_62, %c0_63] : memref<128x128xbf16, #tpu.memory_space<vmem>>, vector<32x128xbf16>
    %cst_64 = arith.constant dense<0.000000e+00> : vector<24x128xf32>
    %118 = tpu.matmul %116, %117, %cst_64 {dimension_numbers = #tpu.dot_dimension_numbers<[1], [0], [0], [1], [0, 0, 1, 1], [], []>} : vector<24x32xbf16>, vector<32x128xbf16>, vector<24x128xf32> -> vector<24x128xf32>
    %119 = arith.addf %94, %118 : vector<24x128xf32>
    %c0_65 = arith.constant 0 : index
    %c96 = arith.constant 96 : index
    %120 = vector.load %arg18[%c0_65, %c96] : memref<24x384xbf16, #tpu.memory_space<vmem>>, vector<24x32xbf16>
    %c0_66 = arith.constant 0 : index
    %c224 = arith.constant 224 : index
    %121 = vector.load %arg18[%c0_66, %c224] : memref<24x384xbf16, #tpu.memory_space<vmem>>, vector<24x32xbf16>
    %c0_67 = arith.constant 0 : index
    %c352 = arith.constant 352 : index
    %122 = vector.load %arg18[%c0_67, %c352] : memref<24x384xbf16, #tpu.memory_space<vmem>>, vector<24x32xbf16>
    %cst_68 = arith.constant dense<0.000000e+00> : vector<24x24xf32>
    %123 = tpu.matmul %120, %121, %cst_68 {dimension_numbers = #tpu.dot_dimension_numbers<[1], [1], [0], [0], [0, 0, 1, 0], [], []>} : vector<24x32xbf16>, vector<24x32xbf16>, vector<24x24xf32> -> vector<24x24xf32>
    %124 = arith.addf %123, %41 : vector<24x24xf32>
    %cst_69 = arith.constant dense<0xFF800000> : vector<24xf32>
    %125 = vector.multi_reduction <maximumf>, %124, %cst_69 [1] : vector<24x24xf32> to vector<24xf32>
    %126 = vector.shape_cast %125 : vector<24xf32> to vector<24x1xf32>
    %127 = vector.broadcast %126 : vector<24x1xf32> to vector<24x24xf32>
    %128 = arith.subf %124, %127 : vector<24x24xf32>
    %129 = math.exp %128 : vector<24x24xf32>
    %cst_70 = arith.constant dense<0.000000e+00> : vector<24xf32>
    %130 = vector.multi_reduction <add>, %129, %cst_70 [1] : vector<24x24xf32> to vector<24xf32>
    %131 = vector.shape_cast %130 : vector<24xf32> to vector<24x1xf32>
    %cst_71 = arith.constant 1.000000e+00 : f32
    %132 = vector.broadcast %cst_71 : f32 to vector<24x1xf32>
    %133 = arith.divf %132, %131 : vector<24x1xf32>
    %134 = vector.broadcast %133 : vector<24x1xf32> to vector<24x24xf32>
    %135 = arith.mulf %129, %134 : vector<24x24xf32>
    %c0_72 = arith.constant 0 : index
    %c3 = arith.constant 3 : index
    %c0_73 = arith.constant 0 : index
    %c0_74 = arith.constant 0 : index
    %136 = vector.load %arg17[%c0_72, %c3, %c0_73, %c0_74] : memref<1x4x24x24xf32, #tpu.memory_space<vmem>>, vector<1x1x24x24xf32>
    %137 = vector.shape_cast %136 : vector<1x1x24x24xf32> to vector<24x24xf32>
    %138 = vector.shape_cast %135 : vector<24x24xf32> to vector<1x1x24x24xf32>
    tpu.vector_store %arg17[%c0_72, %c3, %c0_73, %c0_74], %138 {strides = array<i32>} : memref<1x4x24x24xf32, #tpu.memory_space<vmem>>, vector<1x1x24x24xf32>,
    %139 = arith.truncf %135 : vector<24x24xf32> to vector<24x24xbf16>
    %cst_75 = arith.constant dense<0.000000e+00> : vector<24x32xf32>
    %140 = tpu.matmul %139, %122, %cst_75 {dimension_numbers = #tpu.dot_dimension_numbers<[1], [0], [0], [1], [0, 0, 1, 1], [], []>} : vector<24x24xbf16>, vector<24x32xbf16>, vector<24x32xf32> -> vector<24x32xf32>
    %141 = arith.truncf %140 : vector<24x32xf32> to vector<24x32xbf16>
    %c96_76 = arith.constant 96 : index
    %c0_77 = arith.constant 0 : index
    %142 = vector.load %arg6[%c96_76, %c0_77] : memref<128x128xbf16, #tpu.memory_space<vmem>>, vector<32x128xbf16>
    %cst_78 = arith.constant dense<0.000000e+00> : vector<24x128xf32>
    %143 = tpu.matmul %141, %142, %cst_78 {dimension_numbers = #tpu.dot_dimension_numbers<[1], [0], [0], [1], [0, 0, 1, 1], [], []>} : vector<24x32xbf16>, vector<32x128xbf16>, vector<24x128xf32> -> vector<24x128xf32>
    %144 = arith.addf %119, %143 : vector<24x128xf32>
    %c0_79 = arith.constant 0 : index
    %c0_80 = arith.constant 0 : index
    %145 = vector.load %arg8[%c0_79, %c0_80] : memref<1x128xf32, #tpu.memory_space<vmem>>, vector<1x128xf32>
    %c0_81 = arith.constant 0 : index
    %c0_82 = arith.constant 0 : index
    %146 = vector.load %arg9[%c0_81, %c0_82] : memref<1x128xf32, #tpu.memory_space<vmem>>, vector<1x128xf32>
    %cst_83 = arith.constant dense<0.000000e+00> : vector<24xf32>
    %147 = vector.multi_reduction <add>, %144, %cst_83 [1] : vector<24x128xf32> to vector<24xf32>
    %148 = vector.shape_cast %147 : vector<24xf32> to vector<24x1xf32>
    %cst_84 = arith.constant 1.280000e+02 : f32
    %149 = vector.broadcast %cst_84 : f32 to vector<24x1xf32>
    %150 = arith.divf %148, %149 : vector<24x1xf32>
    %151 = vector.broadcast %150 : vector<24x1xf32> to vector<24x128xf32>
    %152 = arith.subf %144, %151 : vector<24x128xf32>
    %153 = vector.broadcast %150 : vector<24x1xf32> to vector<24x128xf32>
    %154 = arith.subf %144, %153 : vector<24x128xf32>
    %155 = arith.mulf %152, %154 : vector<24x128xf32>
    %cst_85 = arith.constant dense<0.000000e+00> : vector<24xf32>
    %156 = vector.multi_reduction <add>, %155, %cst_85 [1] : vector<24x128xf32> to vector<24xf32>
    %157 = vector.shape_cast %156 : vector<24xf32> to vector<24x1xf32>
    %cst_86 = arith.constant 1.280000e+02 : f32
    %158 = vector.broadcast %cst_86 : f32 to vector<24x1xf32>
    %159 = arith.divf %157, %158 : vector<24x1xf32>
    %160 = vector.broadcast %150 : vector<24x1xf32> to vector<24x128xf32>
    %161 = arith.subf %144, %160 : vector<24x128xf32>
    %cst_87 = arith.constant 9.99999997E-7 : f32
    %162 = vector.broadcast %cst_87 : f32 to vector<24x1xf32>
    %163 = arith.addf %159, %162 : vector<24x1xf32>
    %164 = math.rsqrt %163 : vector<24x1xf32>
    %165 = vector.broadcast %164 : vector<24x1xf32> to vector<24x128xf32>
    %166 = arith.mulf %161, %165 : vector<24x128xf32>
    %167 = vector.broadcast %145 : vector<1x128xf32> to vector<24x128xf32>
    %168 = arith.mulf %166, %167 : vector<24x128xf32>
    %169 = vector.broadcast %146 : vector<1x128xf32> to vector<24x128xf32>
    %170 = arith.addf %168, %169 : vector<24x128xf32>
    %171 = arith.truncf %170 : vector<24x128xf32> to vector<24x128xbf16>
    %c0_88 = arith.constant 0 : index
    %c0_89 = arith.constant 0 : index
    %172 = vector.load %arg10[%c0_88, %c0_89] : memref<128x512xbf16, #tpu.memory_space<vmem>>, vector<128x512xbf16>
    %cst_90 = arith.constant dense<0.000000e+00> : vector<24x512xf32>
    %173 = tpu.matmul %171, %172, %cst_90 {dimension_numbers = #tpu.dot_dimension_numbers<[1], [0], [0], [1], [0, 0, 1, 1], [], []>} : vector<24x128xbf16>, vector<128x512xbf16>, vector<24x512xf32> -> vector<24x512xf32>
    %c0_91 = arith.constant 0 : index
    %c0_92 = arith.constant 0 : index
    %174 = vector.load %arg11[%c0_91, %c0_92] : memref<1x512xf32, #tpu.memory_space<vmem>>, vector<1x512xf32>
    %175 = vector.broadcast %174 : vector<1x512xf32> to vector<24x512xf32>
    %176 = arith.addf %173, %175 : vector<24x512xf32>
    %cst_93 = arith.constant 5.000000e-01 : f32
    %177 = vector.broadcast %cst_93 : f32 to vector<24x512xf32>
    %178 = arith.mulf %177, %176 : vector<24x512xf32>
    %cst_94 = arith.constant 0.707106769 : f32
    %179 = vector.broadcast %cst_94 : f32 to vector<24x512xf32>
    %180 = arith.mulf %176, %179 : vector<24x512xf32>
    %181 = math.erf %180 : vector<24x512xf32>
    %cst_95 = arith.constant 1.000000e+00 : f32
    %182 = vector.broadcast %cst_95 : f32 to vector<24x512xf32>
    %183 = arith.addf %182, %181 : vector<24x512xf32>
    %184 = arith.mulf %178, %183 : vector<24x512xf32>
    %185 = arith.truncf %184 : vector<24x512xf32> to vector<24x512xbf16>
    %c0_96 = arith.constant 0 : index
    %c0_97 = arith.constant 0 : index
    %186 = vector.load %arg12[%c0_96, %c0_97] : memref<512x128xbf16, #tpu.memory_space<vmem>>, vector<512x128xbf16>
    %cst_98 = arith.constant dense<0.000000e+00> : vector<24x128xf32>
    %187 = tpu.matmul %185, %186, %cst_98 {dimension_numbers = #tpu.dot_dimension_numbers<[1], [0], [0], [1], [0, 0, 1, 1], [], []>} : vector<24x512xbf16>, vector<512x128xbf16>, vector<24x128xf32> -> vector<24x128xf32>
    %c0_99 = arith.constant 0 : index
    %c0_100 = arith.constant 0 : index
    %188 = vector.load %arg13[%c0_99, %c0_100] : memref<1x128xf32, #tpu.memory_space<vmem>>, vector<1x128xf32>
    %189 = vector.broadcast %188 : vector<1x128xf32> to vector<24x128xf32>
    %190 = arith.addf %187, %189 : vector<24x128xf32>
    %191 = arith.addf %144, %190 : vector<24x128xf32>
    %c0_101 = arith.constant 0 : index
    %c0_102 = arith.constant 0 : index
    %192 = vector.load %arg14[%c0_101, %c0_102] : memref<1x128xf32, #tpu.memory_space<vmem>>, vector<1x128xf32>
    %c0_103 = arith.constant 0 : index
    %c0_104 = arith.constant 0 : index
    %193 = vector.load %arg15[%c0_103, %c0_104] : memref<1x128xf32, #tpu.memory_space<vmem>>, vector<1x128xf32>
    %cst_105 = arith.constant dense<0.000000e+00> : vector<24xf32>
    %194 = vector.multi_reduction <add>, %191, %cst_105 [1] : vector<24x128xf32> to vector<24xf32>
    %195 = vector.shape_cast %194 : vector<24xf32> to vector<24x1xf32>
    %cst_106 = arith.constant 1.280000e+02 : f32
    %196 = vector.broadcast %cst_106 : f32 to vector<24x1xf32>
    %197 = arith.divf %195, %196 : vector<24x1xf32>
    %198 = vector.broadcast %197 : vector<24x1xf32> to vector<24x128xf32>
    %199 = arith.subf %191, %198 : vector<24x128xf32>
    %200 = vector.broadcast %197 : vector<24x1xf32> to vector<24x128xf32>
    %201 = arith.subf %191, %200 : vector<24x128xf32>
    %202 = arith.mulf %199, %201 : vector<24x128xf32>
    %cst_107 = arith.constant dense<0.000000e+00> : vector<24xf32>
    %203 = vector.multi_reduction <add>, %202, %cst_107 [1] : vector<24x128xf32> to vector<24xf32>
    %204 = vector.shape_cast %203 : vector<24xf32> to vector<24x1xf32>
    %cst_108 = arith.constant 1.280000e+02 : f32
    %205 = vector.broadcast %cst_108 : f32 to vector<24x1xf32>
    %206 = arith.divf %204, %205 : vector<24x1xf32>
    %207 = vector.broadcast %197 : vector<24x1xf32> to vector<24x128xf32>
    %208 = arith.subf %191, %207 : vector<24x128xf32>
    %cst_109 = arith.constant 9.99999997E-7 : f32
    %209 = vector.broadcast %cst_109 : f32 to vector<24x1xf32>
    %210 = arith.addf %206, %209 : vector<24x1xf32>
    %211 = math.rsqrt %210 : vector<24x1xf32>
    %212 = vector.broadcast %211 : vector<24x1xf32> to vector<24x128xf32>
    %213 = arith.mulf %208, %212 : vector<24x128xf32>
    %214 = vector.broadcast %192 : vector<1x128xf32> to vector<24x128xf32>
    %215 = arith.mulf %213, %214 : vector<24x128xf32>
    %216 = vector.broadcast %193 : vector<1x128xf32> to vector<24x128xf32>
    %217 = arith.addf %215, %216 : vector<24x128xf32>
    %c0_110 = arith.constant 0 : index
    %c0_111 = arith.constant 0 : index
    %c0_112 = arith.constant 0 : index
    %218 = vector.load %arg16[%c0_110, %c0_111, %c0_112] : memref<1x24x128xf32, #tpu.memory_space<vmem>>, vector<1x24x128xf32>
    %219 = vector.shape_cast %218 : vector<1x24x128xf32> to vector<24x128xf32>
    %220 = vector.shape_cast %217 : vector<24x128xf32> to vector<1x24x128xf32>
    tpu.vector_store %arg16[%c0_110, %c0_111, %c0_112], %220 {strides = array<i32>} : memref<1x24x128xf32, #tpu.memory_space<vmem>>, vector<1x24x128xf32>,
    return
  }
  func.func @transform_0(%arg0: i32) -> (i32, i32, i32) {
    %c0_i32 = arith.constant 0 : i32
    %c0_i32_0 = arith.constant 0 : i32
    %c0_i32_1 = arith.constant 0 : i32
    return %arg0, %c0_i32, %c0_i32_0 : i32, i32, i32
  }
  func.func @transform_1(%arg0: i32) -> (i32, i32) {
    %c0_i32 = arith.constant 0 : i32
    %c0_i32_0 = arith.constant 0 : i32
    %c0_i32_1 = arith.constant 0 : i32
    return %c0_i32, %c0_i32_0 : i32, i32
  }
  func.func @transform_2(%arg0: i32) -> (i32, i32) {
    %c0_i32 = arith.constant 0 : i32
    %c0_i32_0 = arith.constant 0 : i32
    %c0_i32_1 = arith.constant 0 : i32
    return %c0_i32, %c0_i32_0 : i32, i32
  }
  func.func @transform_3(%arg0: i32) -> (i32, i32) {
    %c0_i32 = arith.constant 0 : i32
    %c0_i32_0 = arith.constant 0 : i32
    %c0_i32_1 = arith.constant 0 : i32
    return %c0_i32, %c0_i32_0 : i32, i32
  }
  func.func @transform_4(%arg0: i32) -> (i32, i32) {
    %c0_i32 = arith.constant 0 : i32
    %c0_i32_0 = arith.constant 0 : i32
    %c0_i32_1 = arith.constant 0 : i32
    return %c0_i32, %c0_i32_0 : i32, i32
  }
  func.func @transform_5(%arg0: i32) -> (i32, i32) {
    %c0_i32 = arith.constant 0 : i32
    %c0_i32_0 = arith.constant 0 : i32
    %c0_i32_1 = arith.constant 0 : i32
    return %c0_i32, %c0_i32_0 : i32, i32
  }
  func.func @transform_6(%arg0: i32) -> (i32, i32) {
    %c0_i32 = arith.constant 0 : i32
    %c0_i32_0 = arith.constant 0 : i32
    %c0_i32_1 = arith.constant 0 : i32
    return %c0_i32, %c0_i32_0 : i32, i32
  }
  func.func @transform_7(%arg0: i32) -> (i32, i32) {
    %c0_i32 = arith.constant 0 : i32
    %c0_i32_0 = arith.constant 0 : i32
    %c0_i32_1 = arith.constant 0 : i32
    return %c0_i32, %c0_i32_0 : i32, i32
  }
  func.func @transform_8(%arg0: i32) -> (i32, i32) {
    %c0_i32 = arith.constant 0 : i32
    %c0_i32_0 = arith.constant 0 : i32
    %c0_i32_1 = arith.constant 0 : i32
    return %c0_i32, %c0_i32_0 : i32, i32
  }
  func.func @transform_9(%arg0: i32) -> (i32, i32) {
    %c0_i32 = arith.constant 0 : i32
    %c0_i32_0 = arith.constant 0 : i32
    %c0_i32_1 = arith.constant 0 : i32
    return %c0_i32, %c0_i32_0 : i32, i32
  }
  func.func @transform_10(%arg0: i32) -> (i32, i32) {
    %c0_i32 = arith.constant 0 : i32
    %c0_i32_0 = arith.constant 0 : i32
    %c0_i32_1 = arith.constant 0 : i32
    return %c0_i32, %c0_i32_0 : i32, i32
  }
  func.func @transform_11(%arg0: i32) -> (i32, i32) {
    %c0_i32 = arith.constant 0 : i32
    %c0_i32_0 = arith.constant 0 : i32
    %c0_i32_1 = arith.constant 0 : i32
    return %c0_i32, %c0_i32_0 : i32, i32
  }
  func.func @transform_12(%arg0: i32) -> (i32, i32) {
    %c0_i32 = arith.constant 0 : i32
    %c0_i32_0 = arith.constant 0 : i32
    %c0_i32_1 = arith.constant 0 : i32
    return %c0_i32, %c0_i32_0 : i32, i32
  }
  func.func @transform_13(%arg0: i32) -> (i32, i32) {
    %c0_i32 = arith.constant 0 : i32
    %c0_i32_0 = arith.constant 0 : i32
    %c0_i32_1 = arith.constant 0 : i32
    return %c0_i32, %c0_i32_0 : i32, i32
  }
  func.func @transform_14(%arg0: i32) -> (i32, i32) {
    %c0_i32 = arith.constant 0 : i32
    %c0_i32_0 = arith.constant 0 : i32
    %c0_i32_1 = arith.constant 0 : i32
    return %c0_i32, %c0_i32_0 : i32, i32
  }
  func.func @transform_15(%arg0: i32) -> (i32, i32, i32) {
    %c0_i32 = arith.constant 0 : i32
    %c0_i32_0 = arith.constant 0 : i32
    %c0_i32_1 = arith.constant 0 : i32
    return %arg0, %c0_i32, %c0_i32_0 : i32, i32, i32
  }
  func.func @transform_16(%arg0: i32) -> (i32, i32, i32, i32) {
    %c0_i32 = arith.constant 0 : i32
    %c0_i32_0 = arith.constant 0 : i32
    %c0_i32_1 = arith.constant 0 : i32
    %c0_i32_2 = arith.constant 0 : i32
    return %arg0, %c0_i32, %c0_i32_0, %c0_i32_1 : i32, i32, i32, i32
  }
}

</mosaic_0001>

<bundles_post_ra>
// kernel: forward.3
= control target key start
LH: loop header
LB: loop body
LE: loop exit
PB: predicated region body
PF: predicated region fallthrough
CT: control target
= control target key end

     0   :  { %s500_s15 = smov 0   ;;  %s575_s0 = inlined_call_operand.vmem [shape: f32[2,16,192], index: 0, kind: input, shape index: {}]   ;;  %s576_s1 = inlined_call_operand.vmem [shape: bf16[192,128], index: 1, kind: input, shape index: {}]   ;;  %s577_s2 = inlined_call_operand.vmem [shape: f32[1,128], index: 2, kind: input, shape index: {}]   ;;  %s578_s3 = inlined_call_operand.vmem [shape: f32[24,128], index: 3, kind: input, shape index: {}]   ;;  %s579_s4 = inlined_call_operand.vmem [shape: f32[2,24,128], index: 4, kind: output, shape index: {}]  }
   0x1 LB: > { %s417_s16 = sadd.s32 4294967295, %s471_s15   ;;  %p421_p0 = scmp.ge.s32.totalorder %s471_s15, 1  ;;  %s471_s15 = sphi %s500_s15, %s14_s15  }
   0x2   : > { %p162_p1 = scmp.lt.s32.totalorder %s471_s15, 3 }
   0x4   : > { %p163_p2 = pnand %p421_p0, %p162_p1 }
   0x5   : > { %p188_p3 = scmp.lt.s32.totalorder (!%p163_p2), %s417_s16, 1 }
   0x6   : > { %166 = sbr.rel (%p163_p2) target bundleno = 262 (0x106), region = 36 }
   0xb   : > { %v453_v0 = vld [vmem:[%s576_s1 + $0x38] sm:$0xff]   ;;  %v473_v1 = vmov 0   ;;  %v454_v2 = vld [vmem:[%s576_s1 + $0x30] sm:$0xff]   ;;  %s581_s16 = smov (!%p188_p3, %s417_s16), 1  ;;  %v455_v3 = vld [vmem:[%s576_s1 + $0x28] sm:$0xff]   ;;  %vm308_vm0 = vcmask 523264  }
   0xc   : > { %312 = vmatprep.subr.bf16.mxu0 %v473_v1  ;;  %s441_s23 = sshll.u32 %s581_s16, 5  ;;  %v456_v4 = vld [vmem:[%s576_s1 + $0x20] sm:$0xff]   ;;  %v457_v8 = vld [vmem:[%s576_s1 + $0x18] sm:$0xff]   ;;  %v458_v9 = vld [vmem:[%s576_s1 + $0x10] sm:$0xff]   ;;  %s442_s21 = smul.u32 24, %s581_s16  ;;  %v474_v20 = vmov 0.0  }
   0xd   : > { %313 = vmatpush1.bf16.msra.mxu0 %v453_v0  ;;  %s523_s26 = scalar_lea.vmem %s575_s0, %s441_s23  ;;  %v459_v10 = vld [vmem:[%s576_s1 + $0x8] sm:$0xff]   ;;  %v460_v11 = vld [vmem:[%s576_s1] sm:$0xff]   ;;  %v461_v12 = vld [vmem:[%s576_s1 + $0x58] sm:$0xff]  }
   0xe   : > { %314 = vmatprep.subr.bf16.mxu0 %v473_v1  ;;  %v200_v5 = vld [vmem:[%s523_s26 + $0x8] sm:$0xff]  ;;  %v202_v6 = vld [vmem:[%s523_s26 + $0x18] sm:$0xff]  ;;  %v462_v13 = vld [vmem:[%s576_s1 + $0x50] sm:$0xff]   ;;  %s197_s24 = scalar_lea.vmem %s579_s4, %s442_s21 }
   0xf   : > { %v204_v7 = vpack.c.bf16 %v202_v6, %v200_v5  ;;  %v463_v14 = vld [vmem:[%s576_s1 + $0x48] sm:$0xff]   ;;  %v464_v15 = vld [vmem:[%s576_s1 + $0x40] sm:$0xff]   ;;  %v201_v17 = vld [vmem:[%s523_s26 + $0x10] sm:$0xff]  ;;  %361 = vst [vmem:[%s197_s24 + $0x11] sm:$0x7f] %v474_v20 }
  0x10   : > { %v199_v16 = vld [vmem:[%s523_s26] sm:$0xff]  ;;  %v354_v28 = vld [vmem:[%s578_s3 + $0x9] sm:$0xff] }
  0x11   : > { %315 = vmatpush1.bf16.msra.mxu0 %v454_v2  ;;  %438 = vmatprep.mubr.msk.bf16.mxu0 %vm308_vm0, %v204_v7  ;;  %v203_v18 = vpack.c.bf16 %v201_v17, %v199_v16  ;;  %v357_v19 = vld [vmem:[%s578_s3] sm:$0x1]  ;;  %v353_v23 = vld [vmem:[%s578_s3 + $0x1] sm:$0xff] }
  0x12   : > { %316 = vmatprep.subr.bf16.mxu0 %v473_v1  ;;  %358 = vst [vmem:[%s197_s24] sm:$0x1] %v357_v19  ;;  %v425_v21 = vld [vmem:[%s577_s2] ss:$0 sm:$0xff] }
  0x15   : > { %317 = vmatpush1.bf16.msra.mxu0 %v455_v3 }
  0x16   : > { %318 = vmatprep.subr.bf16.mxu0 %v473_v1 }
  0x19   : > { %319 = vmatpush1.bf16.msra.mxu0 %v456_v4 }
  0x1a   : > { %320 = vmatprep.subr.bf16.mxu0 %v473_v1 }
  0x1d   : > { %321 = vmatpush1.bf16.msra.mxu0 %v457_v8 }
  0x1e   : > { %322 = vmatprep.subr.bf16.mxu0 %v473_v1 }
  0x21   : > { %323 = vmatpush1.bf16.msra.mxu0 %v458_v9 }
  0x22   : > { %324 = vmatprep.subr.bf16.mxu0 %v473_v1 }
  0x25   : > { %325 = vmatpush1.bf16.msra.mxu0 %v459_v10 }
  0x26   : > { %326 = vmatprep.subr.bf16.mxu0 %v473_v1 }
  0x29   : > { %327 = vmatpush1.bf16.msra.mxu0 %v460_v11 }
  0x2a   : > { %336 = vmatprep.subr.bf16.mxu0 %v473_v1 }
  0x2d   : > { %337 = vmatpush2.bf16.msra.mxu0 %v461_v12 }
  0x2e   : > { %338 = vmatprep.subr.bf16.mxu0 %v473_v1 }
  0x31   : > { %339 = vmatpush2.bf16.msra.mxu0 %v462_v13 }
  0x32   : > { %340 = vmatprep.subr.bf16.mxu0 %v473_v1 }
  0x35   : > { %341 = vmatpush2.bf16.msra.mxu0 %v463_v14 }
  0x36   : > { %342 = vmatprep.subr.bf16.mxu0 %v473_v1 }
  0x39   : > { %343 = vmatpush2.bf16.msra.mxu0 %v464_v15 }
  0x3c   : > { %345 = vmatmul.mubr.bf16.vlgmr.msra.gmra.mxu0 %v203_v18 }
  0xfc   : > { %v346_v22 = vpop.f32.mrf.mxu0 }
  0xfd   : > { %v347_v24 = vadd.f32 %v425_v21, %v346_v22 }
  0xfe   : > { %v348_v25 = vpop.f32.mrf.mxu0 }
  0xff   : > { %v355_v26 = vadd.f32 %v353_v23, %v347_v24 }
 0x100   : > { %v349_v27 = vpop.f32.mrf.mxu0 }
 0x101   : > { %359 = vst [vmem:[%s197_s24 + $0x1] sm:$0xff] %v355_v26  ;;  %v350_v29 = vadd.f32 %v425_v21, %v349_v27 }
 0x102   : > { %v351_v30 = vpop.f32.mrf.mxu0 }
 0x103   : > { %v356_v31 = vadd.f32 %v354_v28, %v350_v29 }
 0x105   : > { %360 = vst [vmem:[%s197_s24 + $0x9] sm:$0xff] %v356_v31 }
 0x106 PF: > { %s14_s15 = sadd.s32 1, %s471_s15  }
 0x107   : > { %p11_p4 = scmp.ge.s32.totalorder %s14_s15, 4  }
 0x109   :  { %13 = sbr.rel (!%p11_p4) target bundleno = 1 (0x1), region = 66 }

// kernel: forward.4
= control target key start
LH: loop header
LB: loop body
LE: loop exit
PB: predicated region body
PF: predicated region fallthrough
CT: control target
= control target key end

     0   :  { %s3454_s18 = smov 0   ;;  %s4050_s0 = inlined_call_operand.vmem [shape: f32[2,24,128], index: 0, kind: input, shape index: {}]   ;;  %s4051_s1 = inlined_call_operand.vmem [shape: f32[1,128], index: 1, kind: input, shape index: {}, may-alias: {1,7,13}]   ;;  %s4052_s2 = inlined_call_operand.vmem [shape: f32[1,128], index: 2, kind: input, shape index: {}, may-alias: {2,6,8,12,14}]   ;;  %s4053_s3 = inlined_call_operand.vmem [shape: bf16[128,384], index: 3, kind: input, shape index: {}]   ;;  %s4054_s4 = inlined_call_operand.vmem [shape: f32[1,384], index: 4, kind: input, shape index: {}]   ;;  %s4055_s5 = inlined_call_operand.vmem [shape: bf16[128,128], index: 5, kind: input, shape index: {}]   ;;  %s4056_s6 = inlined_call_operand.vmem [shape: f32[1,128], index: 6, kind: input, shape index: {}, may-alias: {2,6,8,12,14}]   ;;  %s4057_s7 = inlined_call_operand.vmem [shape: f32[1,128], index: 7, kind: input, shape index: {}, may-alias: {1,7,13}]   ;;  %s4058_s8 = inlined_call_operand.vmem [shape: f32[1,128], index: 8, kind: input, shape index: {}, may-alias: {2,6,8,12,14}]   ;;  %s4059_s9 = inlined_call_operand.vmem [shape: bf16[128,512], index: 9, kind: input, shape index: {}]   ;;  %s4060_s10 = inlined_call_operand.vmem [shape: f32[1,512], index: 10, kind: input, shape index: {}]   ;;  %s4061_s11 = inlined_call_operand.vmem [shape: bf16[512,128], index: 11, kind: input, shape index: {}]   ;;  %s4062_s12 = inlined_call_operand.vmem [shape: f32[1,128], index: 12, kind: input, shape index: {}, may-alias: {2,6,8,12,14}]   ;;  %s4063_s13 = inlined_call_operand.vmem [shape: f32[1,128], index: 13, kind: input, shape index: {}, may-alias: {1,7,13}]   ;;  %s4064_s14 = inlined_call_operand.vmem [shape: f32[1,128], index: 14, kind: input, shape index: {}, may-alias: {2,6,8,12,14}]   ;;  %s4065_s15 = inlined_call_operand.vmem [shape: f32[2,24,128], index: 15, kind: output, shape index: {}]  }
   0x1 LB: > { %s2739_s19 = sadd.s32 4294967295, %s3367_s18   ;;  %p2743_p0 = scmp.ge.s32.totalorder %s3367_s18, 1  ;;  %s3367_s18 = sphi %s3454_s18, %s25_s18  }
   0x2   : > { %p437_p1 = scmp.lt.s32.totalorder %s3367_s18, 3 }
   0x4   : > { %p438_p2 = pnand %p2743_p0, %p437_p1 }
   0x5   : > { %p485_p3 = scmp.lt.s32.totalorder (!%p438_p2), %s2739_s19, 1  ;;  %s3370_s24 = smov (!%p438_p2), 96  }
   0x6   : > { %441 = sbr.rel (%p438_p2) target bundleno = 2967 (0xb97), region = 80  ;;  %s3372_s25 = smov (!%p438_p2), 64  }
   0x7   : > { %s3373_s30 = smov (!%p438_p2), 32  }
   0xb   : > { %s4067_s19 = smov (!%p485_p3, %s2739_s19), 1  ;;  %v3148_v3 = vld [vmem:[%s4053_s3 + $0xac] ss:$12 sps:$4 sm:$0xff]   ;;  %v3150_v4 = vld [vmem:[%s4053_s3 + $0xa8] ss:$12 sps:$4 sm:$0xff]   ;;  %v3369_v32 = vmov 0  }
   0xc   : > { %s3134_s13 = smul.u32 24, %s4067_s19  ;;  %v3151_v5 = vld [vmem:[%s4053_s3 + $0xb0] ss:$12 sps:$4 sm:$0xff]   ;;  %732 = vmatprep.subr.bf16.mxu0 %v3148_v3  ;;  %v3152_v18 = vld [vmem:[%s4053_s3 + $0x94] ss:$12 sps:$4 sm:$0xff]   ;;  %764 = vmatprep.mubr.bf16.mxu0 %v3369_v32  ;;  %vm1024_vm0 = vcmask 1043456  }
   0xd   : > { %3006 = vmatprep.subr.bf16.mxu1 %v3151_v5  ;;  %733 = vmatpush1.bf16.msra.mxu0 %v3150_v4  ;;  %v3154_v19 = vld [vmem:[%s4053_s3 + $0x90] ss:$12 sps:$4 sm:$0xff]   ;;  %v3155_v20 = vld [vmem:[%s4053_s3 + $0x98] ss:$12 sps:$4 sm:$0xff]   ;;  %v3159_v23 = vld [vmem:[%s4053_s3 + $0x80] ss:$12 sps:$4 sm:$0xff]  }
   0xe   : > { %s3470_s21 = scalar_lea.vmem %s4050_s0, %s3134_s13  ;;  %3007 = vmatpush3.bf16.msra.mxu1 %v3151_v5  ;;  %734 = vmatprep.subr.bf16.mxu0 %v3152_v18  ;;  %v3156_v21 = vld [vmem:[%s4053_s3 + $0x7c] ss:$12 sps:$4 sm:$0xff]   ;;  %v3158_v22 = vld [vmem:[%s4053_s3 + $0x78] ss:$12 sps:$4 sm:$0xff]   ;;  %v3162_v25 = vld [vmem:[%s4053_s3 + $0x60] ss:$12 sps:$4 sm:$0xff]  }
   0xf   : > { %v496_v0 = vld [vmem:[%s3470_s21] sm:$0xff]  ;;  %v498_v1 = vld [vmem:[%s3470_s21 + $0x10] sm:$0xff]  ;;  %v497_v2 = vld [vmem:[%s3470_s21 + $0x8] sm:$0xff]  ;;  %3008 = vmatprep.subr.bf16.mxu1 %v3155_v20  ;;  %vm909_vm1 = vcmask 261120   ;;  %vm970_vm3 = vcmask 195584  }
  0x10   : > { %501 = vadd.xlane.f32.xlu0 %v496_v0  ;;  %505 = vadd.xlane.f32.xlu1 %v498_v1  ;;  %v3160_v24 = vld [vmem:[%s4053_s3 + $0x64] ss:$12 sps:$4 sm:$0xff]   ;;  %v3163_v26 = vld [vmem:[%s4053_s3 + $0x68] ss:$12 sps:$4 sm:$0xff]   ;;  %v3164_v27 = vld [vmem:[%s4053_s3 + $0x4c] ss:$12 sps:$4 sm:$0xff]  }
  0x11   : > { %735 = vmatpush1.bf16.msra.mxu0 %v3154_v19  ;;  %v3167_v28 = vld [vmem:[%s4053_s3 + $0x50] ss:$12 sps:$4 sm:$0xff]   ;;  %v3166_v29 = vld [vmem:[%s4053_s3 + $0x48] ss:$12 sps:$4 sm:$0xff]   ;;  %v3171_v31 = vld [vmem:[%s4053_s3 + $0x38] ss:$12 sps:$4 sm:$0xff]  }
  0x12   : > { %3009 = vmatpush3.bf16.msra.mxu1 %v3155_v20  ;;  %736 = vmatprep.subr.bf16.mxu0 %v3156_v21  ;;  %v3168_v30 = vld [vmem:[%s4053_s3 + $0x34] ss:$12 sps:$4 sm:$0xff]   ;;  %v3170_v33 = vld [vmem:[%s4053_s3 + $0x30] ss:$12 sps:$4 sm:$0xff]   ;;  %v3174_v36 = vld [vmem:[%s4053_s3 + $0x18] ss:$12 sps:$4 sm:$0xff]  }
  0x13   : > { %3010 = vmatprep.subr.bf16.mxu1 %v3159_v23  ;;  %v3172_v34 = vld [vmem:[%s4053_s3 + $0x1c] ss:$12 sps:$4 sm:$0xff]   ;;  %v3175_v35 = vld [vmem:[%s4053_s3 + $0x20] ss:$12 sps:$4 sm:$0xff]   ;;  %v3176_v37 = vld [vmem:[%s4053_s3 + $0x4] ss:$12 sps:$4 sm:$0xff]  }
  0x14   : > { %503 = vadd.xlane.f32.xlu0 %v497_v2  ;;  %v3179_v38 = vld [vmem:[%s4053_s3 + $0x8] ss:$12 sps:$4 sm:$0xff]   ;;  %v3178_v39 = vld [vmem:[%s4053_s3] ss:$12 sps:$4 sm:$0xff]  }
  0x15   : > { %737 = vmatpush1.bf16.msra.mxu0 %v3158_v22  ;;  %v2746_v51 = vld [vmem:[%s4051_s1] ss:$0 sm:$0xff] }
  0x16   : > { %3011 = vmatpush3.bf16.msra.mxu1 %v3159_v23  ;;  %738 = vmatprep.subr.bf16.mxu0 %v3160_v24  ;;  %v2747_v57 = vld [vmem:[%s4052_s2] ss:$0 sm:$0xff] }
  0x17   : > { %3012 = vmatprep.subr.bf16.mxu1 %v3163_v26  ;;  %v587_v4 = vld [vmem:[%s4054_s4] sm:$0x7] }
  0x19   : > { %739 = vmatpush1.bf16.msra.mxu0 %v3162_v25 }
  0x1a   : > { %3013 = vmatpush3.bf16.msra.mxu1 %v3163_v26  ;;  %740 = vmatprep.subr.bf16.mxu0 %v3164_v27 }
  0x1b   : > { %3014 = vmatprep.subr.bf16.mxu1 %v3167_v28 }
  0x1d   : > { %741 = vmatpush1.bf16.msra.mxu0 %v3166_v29 }
  0x1e   : > { %3015 = vmatpush3.bf16.msra.mxu1 %v3167_v28  ;;  %742 = vmatprep.subr.bf16.mxu0 %v3168_v30 }
  0x1f   : > { %3016 = vmatprep.subr.bf16.mxu1 %v3171_v31 }
  0x21   : > { %743 = vmatpush1.bf16.msra.mxu0 %v3170_v33 }
  0x22   : > { %3017 = vmatpush3.bf16.msra.mxu1 %v3171_v31  ;;  %744 = vmatprep.subr.bf16.mxu0 %v3172_v34 }
  0x23   : > { %3018 = vmatprep.subr.bf16.mxu1 %v3175_v35 }
  0x25   : > { %745 = vmatpush1.bf16.msra.mxu0 %v3174_v36 }
  0x26   : > { %3019 = vmatpush3.bf16.msra.mxu1 %v3175_v35  ;;  %746 = vmatprep.subr.bf16.mxu0 %v3176_v37 }
  0x27   : > { %3020 = vmatprep.subr.bf16.mxu1 %v3179_v38 }
  0x29   : > { %747 = vmatpush1.bf16.msra.mxu0 %v3178_v39 }
  0x2a   : > { %3021 = vmatpush3.bf16.msra.mxu1 %v3179_v38 }
  0x99   : > { %v502_v6 = vpop.xlane.xlu0 %501  ;;  %v506_v7 = vpop.xlane.xlu1 %505 }
  0x9a   : > { %v508_v8 = vmul.f32 0.0078125, %v502_v6  ;;  %v510_v9 = vmul.f32 0.0078125, %v506_v7 }
  0x9c   : > { %v3484_v10 = vsub.f32 %v496_v0, %v508_v8  ;;  %v3486_v11 = vsub.f32 %v498_v1, %v510_v9  ;;  %v589_v1 = vlaneseq }
  0x9d   : > { %v504_v12 = vpop.xlane.xlu0 %503 }
  0x9e   : > { %v509_v13 = vmul.f32 0.0078125, %v504_v12  ;;  %v514_v14 = vmul.f32 %v3484_v10, %v3484_v10  ;;  %v516_v16 = vmul.f32 %v3486_v11, %v3486_v11 }
  0xa0   : > { %v3490_v15 = vsub.f32 %v497_v2, %v509_v13  ;;  %517 = vadd.xlane.f32.xlu1 %v514_v14  ;;  %v3571_v2 = vshrl.u32 %v589_v1, 7 }
  0xa2   : > { %v515_v17 = vmul.f32 %v3490_v15, %v3490_v15  ;;  %v599_v3 = vsub.s32 2, %v3571_v2  ;;  %v591_v5 = vsub.s32 0, %v3571_v2  ;;  %v595_v6 = vsub.s32 1, %v3571_v2 }
  0xa4   : > { %521 = vadd.xlane.f32.xlu1 %v516_v16  ;;  %519 = vadd.xlane.f32.xlu0 %v515_v17  ;;  %v600_v7 = vrot.slane %v587_v4, %v599_v3  ;;  %v592_v8 = vrot.slane %v587_v4, %v591_v5  ;;  %v596_v9 = vrot.slane %v587_v4, %v595_v6 }
 0x129   : > { %v518_v40 = vpop.xlane.xlu1 %517 }
 0x12a   : > { %v523_v41 = vmul.f32 0.0078125, %v518_v40 }
 0x12c   : > { %v526_v42 = vadd.f32 1e-06, %v523_v41 }
 0x12d   : > { %v522_v43 = vpop.xlane.xlu1 %521  ;;  %v520_v44 = vpop.xlane.xlu0 %519 }
 0x12e   : > { %3274 = vrsqrt.f32 %v526_v42  ;;  %v525_v45 = vmul.f32 0.0078125, %v522_v43  ;;  %v524_v46 = vmul.f32 0.0078125, %v520_v44 }
 0x130   : > { %v528_v47 = vadd.f32 1e-06, %v525_v45  ;;  %v527_v48 = vadd.f32 1e-06, %v524_v46 }
 0x132   : > { %3276 = vrsqrt.f32 %v528_v47 }
 0x133   : > { %3278 = vrsqrt.f32 %v527_v48 }
 0x13b   : > { %v3275_v49 = vpop.eup %3274 }
 0x13c   : > { %v532_v50 = vmul.f32 %v3275_v49, %v3484_v10 }
 0x13e   : > { %v541_v56 = vmul.f32 %v2746_v51, %v532_v50 }
 0x13f   : > { %v3277_v52 = vpop.eup %3276 }
 0x140   : > { %v3279_v53 = vpop.eup %3278  ;;  %v534_v54 = vmul.f32 %v3277_v52, %v3486_v11  ;;  %v550_v61 = vadd.f32 %v2747_v57, %v541_v56 }
 0x141   : > { %v533_v55 = vmul.f32 %v3279_v53, %v3490_v15  ;;  %v871_v53 = vand.u32 127, %v589_v1 }
 0x142   : > { %v543_v58 = vmul.f32 %v2746_v51, %v534_v54 }
 0x143   : > { %v542_v59 = vmul.f32 %v2746_v51, %v533_v55  ;;  %vm872_vm2 = vcmp.lt.s32.totalorder %v871_v53, 17  ;;  %v3371_v55 = vmov -1e+30  }
 0x144   : > { %v552_v60 = vadd.f32 %v2747_v57, %v543_v58  ;;  %v3630_v56 = vsel %vm872_vm2, 0.0, %v3371_v55 }
 0x145   : > { %v551_v62 = vadd.f32 %v2747_v57, %v542_v59 }
 0x146   : > { %v554_v63 = vpack.c.bf16 %v552_v60, %v552_v60 }
 0x147   : > { %v553_v0 = vpack.c.bf16 %v551_v62, %v550_v61 }
 0x149   : > { %765 = vmatmul.mubr.bf16.vlgmr.msra.gmra.mxu0 %v553_v0  ;;  %3022 = vmatprep.mubr.bf16.mxu1 %v553_v0 }
 0x14a   : > { %3023 = vmatmul.mubr.bf16.vlgmr.msra.gmra.mxu1 %v554_v63  ;;  %774 = vmatprep.mubr.bf16.mxu0 %v3369_v32 }
 0x151   : > { %775 = vmatmul.mubr.bf16.gmra.mxu0 %v554_v63 }
 0x209   : > { %v766_v10 = vpop.f32.mrf.mxu0 }
 0x20a   : > { %v3024_v11 = vpop.f32.mrf.mxu1  ;;  %v767_v14 = vadd.f32 %v766_v10, %v592_v8 }
 0x20b   : > { %v826_v12 = vadd.f32 %v3024_v11, %v600_v7  ;;  %v768_v13 = vpop.f32.mrf.mxu0 }
 0x20c   : > { %v769_v15 = vadd.f32 %v768_v13, %v596_v9  ;;  %v817_v16 = vpop.f32.mrf.mxu1 }
 0x20d   : > { %v2891_v17 = vpack.c.bf16 %v826_v12, %v826_v12  ;;  %v818_v18 = vadd.f32 %v817_v16, %v600_v7  ;;  %v770_v19 = vpop.f32.mrf.mxu0 }
 0x20e   : > { %v2886_v20 = vpack.c.bf16 %v769_v15, %v767_v14  ;;  %v3025_v21 = vpop.f32.mrf.mxu1  ;;  %v771_v24 = vadd.f32 %v770_v19, %v592_v8 }
 0x20f   : > { %869 = vst [vmem:[#allocation2 + $0x20] sm:$0xf] %v2891_v17  ;;  %v2887_v22 = vpack.c.bf16 %v818_v18, %v818_v18  ;;  %v772_v23 = vpop.f32.mrf.mxu0 }
 0x210   : > { %864 = vst [vmem:[#allocation2] sm:$0xff] %v2886_v20  ;;  %v773_v25 = vadd.f32 %v772_v23, %v596_v9  ;;  %v820_v26 = vpop.f32.mrf.mxu1 }
 0x211   : > { %865 = vst [vmem:[#allocation2 + $0x8] sm:$0xf] %v2887_v22  ;;  %v821_v27 = vadd.f32 %v820_v26, %v600_v7  ;;  %v776_v28 = vpop.f32.mrf.mxu0 }
 0x212   : > { %v2888_v29 = vpack.c.bf16 %v773_v25, %v771_v24  ;;  %v777_v33 = vadd.f32 %v776_v28, %v592_v8 }
 0x213   : > { %v2889_v30 = vpack.c.bf16 %v821_v27, %v821_v27  ;;  %v778_v31 = vpop.f32.mrf.mxu0 }
 0x214   : > { %866 = vst [vmem:[#allocation2 + $0xc] sm:$0xff] %v2888_v29  ;;  %v779_v34 = vadd.f32 %v778_v31, %v596_v9 }
 0x215   : > { %867 = vst [vmem:[#allocation2 + $0x14] sm:$0xf] %v2889_v30  ;;  %v780_v35 = vpop.f32.mrf.mxu0 }
 0x216   : > { %v2890_v36 = vpack.c.bf16 %v779_v34, %v777_v33  ;;  %v3585_v37 = vld [vmem:[#allocation2 + $0x20] ss:$0 sps:$4 sm:$0xff]  }
 0x217   : > { %v781_v38 = vpop.f32.mrf.mxu0  ;;  %3124 = vmatprep.subr.msk.bf16.mxu1 %vm1024_vm0, %v3585_v37  ;;  %v1026_v39 = vsel %vm1024_vm0, %v3585_v37, 0 }
 0x218   : > { %868 = vst [vmem:[#allocation2 + $0x18] sm:$0xff] %v2890_v36  ;;  %3035 = vmatpush3.bf16.msra.mxu1 %v1026_v39 }
 0x21b   : > { %v3591_v40 = vld [vmem:[#allocation2 + $0x4] ss:$12 sps:$4 sm:$0xff]   ;;  %v3593_v41 = vld [vmem:[#allocation2] ss:$12 sps:$4 sm:$0xff]  }
 0x21c   : > { %v3595_v42 = vld [vmem:[#allocation2 + $0x8] ss:$12 sps:$4 sm:$0xff]   ;;  %1155 = vrot.lane.b32.xlu1 %v3591_v40, %s3370_s24  ;;  %3030 = vmatprep.mubr.msk.bf16.mxu0 %vm909_vm1, %v3593_v41  ;;  %v917_v46 = vsel %vm909_vm1, %v3591_v40, 0 }
 0x21d   : > { %3036 = vmatprep.subr.bf16.mxu1 %v3595_v42 }
 0x21e   : > { %3037 = vmatpush3.bf16.msra.mxu1 %v3595_v42 }
 0x21f   : > { %v3603_v43 = vld [vmem:[#allocation2 + $0x1c] ss:$0 sps:$4 sm:$0xff]   ;;  %v3615_v45 = vld [vmem:[#allocation2 + $0x18] ss:$0 sps:$4 sm:$0xff]  }
 0x220   : > { %1157 = vrot.lane.b32.xlu0 %v3603_v43, %s3370_s24  ;;  %3122 = vmatprep.subr.msk.bf16.mxu0 %vm909_vm1, %v3603_v43  ;;  %v920_v44 = vsel %vm909_vm1, %v3603_v43, 0 }
 0x221   : > { %1151 = vrot.lane.b32.xlu1 %v3593_v41, %s3370_s24  ;;  %3027 = vmatpush3.bf16.xpose.msra.mxu0 %v920_v44 }
 0x222   : > { %3123 = vmatprep.subr.msk.bf16.mxu0 %vm909_vm1, %v3591_v40 }
 0x225   : > { %1153 = vrot.lane.b32.xlu1 %v3615_v45, %s3370_s24 }
 0x229   : > { %3029 = vmatpush3.bf16.xpose.msra.mxu0 %v917_v46 }
 0x230   : > { %3031 = vmatmul.mubr.msk.bf16.vlgmr.msra.gmra.mxu0 %vm909_vm1, %v3615_v45 }
 0x28e   : > { %v1156_v47 = vpop.permute.xlu1 %1155 }
 0x28f   : > { %v1166_v51 = vsel %vm909_vm1, %v1156_v47, 0 }
 0x292   : > { %v1158_v48 = vpop.permute.xlu0 %1157 }
 0x293   : > { %v1169_v49 = vsel %vm909_vm1, %v1158_v48, 0  ;;  %v1152_v50 = vpop.permute.xlu1 %1151  ;;  %3125 = vmatprep.subr.msk.bf16.mxu0 %vm909_vm1, %v1158_v48 }
 0x294   : > { %3054 = vmatprep.mubr.msk.bf16.mxu0 %vm909_vm1, %v1152_v50  ;;  %3051 = vmatpush3.bf16.xpose.msra.mxu0 %v1169_v49 }
 0x295   : > { %3126 = vmatprep.subr.msk.bf16.mxu0 %vm909_vm1, %v1156_v47 }
 0x297   : > { %v1154_v52 = vpop.permute.xlu1 %1153 }
 0x29c   : > { %3053 = vmatpush3.bf16.xpose.msra.mxu0 %v1166_v51 }
 0x2a3   : > { %3055 = vmatmul.mubr.msk.bf16.vlgmr.msra.gmra.mxu0 %vm909_vm1, %v1154_v52 }
 0x2f0   : > { %v3032_v54 = vpop.f32.mrf.mxu0 }
 0x2f1   : > { %v965_v60 = vadd.f32 %v3032_v54, %v3630_v56 }
 0x2f2   : > { %v956_v57 = vpop.f32.mrf.mxu0 }
 0x2f3   : > { %v957_v58 = vadd.f32 %v956_v57, %v3630_v56  ;;  %v977_v1 = vsel %vm970_vm3, %v965_v60, -inf }
 0x2f4   : > { %v3033_v59 = vpop.f32.mrf.mxu0 }
 0x2f5   : > { %v971_v61 = vsel %vm970_vm3, %v957_v58, -inf }
 0x2f6   : > { %v959_v62 = vpop.f32.mrf.mxu0  ;;  %972 = vmax.xlane.f32.xlu0 %v971_v61 }
 0x2f7   : > { %v960_v63 = vadd.f32 %v959_v62, %v3630_v56 }
 0x2f9   : > { %v974_v0 = vsel %vm970_vm3, %v960_v63, -inf }
 0x2fa   : > { %975 = vmax.xlane.f32.xlu1 %v974_v0  ;;  %978 = vmax.xlane.f32.xlu0 %v977_v1 }
 0x363   : > { %v3056_v4 = vpop.f32.mrf.mxu0 }
 0x364   : > { %v1214_v25 = vadd.f32 %v3056_v4, %v3630_v56 }
 0x365   : > { %v1205_v7 = vpop.f32.mrf.mxu0 }
 0x366   : > { %v1206_v24 = vadd.f32 %v1205_v7, %v3630_v56  ;;  %v1225_v28 = vsel %vm970_vm3, %v1214_v25, -inf }
 0x367   : > { %v3057_v8 = vpop.f32.mrf.mxu0 }
 0x368   : > { %v1219_v26 = vsel %vm970_vm3, %v1206_v24, -inf }
 0x369   : > { %v1208_v27 = vpop.f32.mrf.mxu0 }
 0x36a   : > { %v1209_v29 = vadd.f32 %v1208_v27, %v3630_v56 }
 0x36c   : > { %v1222_v30 = vsel %vm970_vm3, %v1209_v29, -inf }
 0x37f   : > { %v973_v9 = vpop.xlane.xlu0 %972 }
 0x380   : > { %v980_v10 = vsub.f32 %v957_v58, %v973_v9 }
 0x382   : > { %v983_v11 = vmul.f32 1.442695, %v980_v10 }
 0x383   : > { %v976_v12 = vpop.xlane.xlu1 %975  ;;  %v979_v13 = vpop.xlane.xlu0 %978 }
 0x384   : > { %3280 = vpow2.f32 %v983_v11  ;;  %v981_v14 = vsub.f32 %v960_v63, %v976_v12  ;;  %v982_v15 = vsub.f32 %v965_v60, %v979_v13  ;;  %v3186_v11 = vld [vmem:[%s4055_s5 + $0x8] sm:$0xff]   ;;  %v3187_v12 = vld [vmem:[%s4055_s5] sm:$0xff]  }
 0x385   : > { %3042 = vmatprep.subr.bf16.mxu1 %v3186_v11 }
 0x386   : > { %v985_v16 = vmul.f32 1.442695, %v981_v14  ;;  %v987_v17 = vmul.f32 1.442695, %v982_v15 }
 0x388   : > { %3282 = vpow2.f32 %v985_v16 }
 0x389   : > { %3284 = vpow2.f32 %v987_v17 }
 0x391   : > { %v3281_v18 = vpop.eup %3280 }
 0x392   : > { %v989_v19 = vsel %vm970_vm3, %v3281_v18, 0.0 }
 0x393   : > { %990 = vadd.xlane.f32.xlu0 %v989_v19 }
 0x395   : > { %v3283_v20 = vpop.eup %3282 }
 0x396   : > { %v3285_v21 = vpop.eup %3284  ;;  %v992_v22 = vsel %vm970_vm3, %v3283_v20, 0.0 }
 0x397   : > { %993 = vadd.xlane.f32.xlu0 %v992_v22  ;;  %v995_v23 = vsel %vm970_vm3, %v3285_v21, 0.0 }
 0x398   : > { %996 = vadd.xlane.f32.xlu1 %v995_v23 }
 0x3a9   : > { %1398 = vrot.lane.b32.xlu1 %v3591_v40, %s3372_s25 }
 0x3ad   : > { %1394 = vrot.lane.b32.xlu1 %v3593_v41, %s3372_s25  ;;  %1400 = vrot.lane.b32.xlu0 %v3603_v43, %s3372_s25 }
 0x3b1   : > { %1396 = vrot.lane.b32.xlu1 %v3615_v45, %s3372_s25 }
 0x3cc   : > { %1220 = vmax.xlane.f32.xlu0 %v1219_v26 }
 0x3d0   : > { %1226 = vmax.xlane.f32.xlu0 %v1225_v28 }
 0x3d5   : > { %1223 = vmax.xlane.f32.xlu1 %v1222_v30 }
 0x41c   : > { %v991_v31 = vpop.xlane.xlu0 %990 }
 0x41d   : > { %3286 = vrcp.f32 %v991_v31 }
 0x420   : > { %v994_v33 = vpop.xlane.xlu0 %993 }
 0x421   : > { %v997_v34 = vpop.xlane.xlu1 %996  ;;  %3288 = vrcp.f32 %v994_v33 }
 0x422   : > { %3290 = vrcp.f32 %v997_v34 }
 0x424   : > { %v1401_v35 = vpop.permute.xlu0 %1400 }
 0x425   : > { %v1399_v36 = vpop.permute.xlu1 %1398  ;;  %v1412_v38 = vsel %vm909_vm1, %v1401_v35, 0  ;;  %3128 = vmatprep.subr.msk.bf16.mxu0 %vm909_vm1, %v1401_v35 }
 0x426   : > { %3075 = vmatpush3.bf16.xpose.msra.mxu0 %v1412_v38  ;;  %v1409_v46 = vsel %vm909_vm1, %v1399_v36, 0 }
 0x427   : > { %3129 = vmatprep.subr.msk.bf16.mxu0 %vm909_vm1, %v1399_v36 }
 0x429   : > { %v1395_v39 = vpop.permute.xlu1 %1394 }
 0x42a   : > { %3078 = vmatprep.mubr.msk.bf16.mxu0 %vm909_vm1, %v1395_v39  ;;  %v3287_v44 = vpop.eup %3286 }
 0x42b   : > { %v1004_v49 = vmul.f32 %v3287_v44, %v3281_v18 }
 0x42d   : > { %v1397_v54 = vpop.permute.xlu1 %1396 }
 0x42e   : > { %v3289_v47 = vpop.eup %3288  ;;  %3077 = vmatpush3.bf16.xpose.msra.mxu0 %v1409_v46 }
 0x42f   : > { %v3291_v48 = vpop.eup %3290  ;;  %v1005_v50 = vmul.f32 %v3289_v47, %v3283_v20 }
 0x430   : > { %v1006_v51 = vmul.f32 %v3291_v48, %v3285_v21 }
 0x431   : > { %v1007_v52 = vpack.c.bf16 %v1005_v50, %v1004_v49 }
 0x432   : > { %v1008_v53 = vpack.c.bf16 %v1006_v51, %v1006_v51 }
 0x433   : > { %3038 = vmatprep.mubr.msk.bf16.mxu1 %vm970_vm3, %v1007_v52  ;;  %v3188_v52 = vld [vmem:[%s4055_s5 + $0x18] sm:$0xff]  }
 0x434   : > { %3039 = vmatmul.mubr.msk.bf16.vlgmr.msra.gmra.mxu1 %vm970_vm3, %v1008_v53  ;;  %v3189_v53 = vld [vmem:[%s4055_s5 + $0x10] sm:$0xff]  }
 0x435   : > { %3079 = vmatmul.mubr.msk.bf16.vlgmr.msra.gmra.mxu0 %vm909_vm1, %v1397_v54  ;;  %3043 = vmatpush3.bf16.msra.mxu1 %v3186_v11 }
 0x436   : > { %3044 = vmatprep.subr.bf16.mxu1 %v3187_v12 }
 0x439   : > { %3045 = vmatpush3.bf16.msra.mxu1 %v3187_v12 }
 0x455   : > { %v1221_v55 = vpop.xlane.xlu0 %1220 }
 0x456   : > { %v1228_v57 = vsub.f32 %v1206_v24, %v1221_v55 }
 0x458   : > { %v1231_v58 = vmul.f32 1.442695, %v1228_v57 }
 0x459   : > { %v1227_v59 = vpop.xlane.xlu0 %1226 }
 0x45a   : > { %3292 = vpow2.f32 %v1231_v58  ;;  %v1230_v60 = vsub.f32 %v1214_v25, %v1227_v59 }
 0x45c   : > { %v1235_v61 = vmul.f32 1.442695, %v1230_v60 }
 0x45e   : > { %3294 = vpow2.f32 %v1235_v61  ;;  %v1224_v62 = vpop.xlane.xlu1 %1223 }
 0x45f   : > { %v1229_v63 = vsub.f32 %v1209_v29, %v1224_v62 }
 0x461   : > { %v1233_v0 = vmul.f32 1.442695, %v1229_v63 }
 0x463   : > { %3296 = vpow2.f32 %v1233_v0 }
 0x467   : > { %v3663_v1 = vpop.eup %3292 }
 0x468   : > { %v1237_v4 = vsel %vm970_vm3, %v3663_v1, 0.0 }
 0x469   : > { %1238 = vadd.xlane.f32.xlu0 %v1237_v4 }
 0x46b   : > { %v3667_v7 = vpop.eup %3294 }
 0x46c   : > { %v1243_v8 = vsel %vm970_vm3, %v3667_v7, 0.0 }
 0x46d   : > { %1244 = vadd.xlane.f32.xlu1 %v1243_v8 }
 0x470   : > { %v3671_v9 = vpop.eup %3296 }
 0x471   : > { %v1240_v10 = vsel %vm970_vm3, %v3671_v9, 0.0 }
 0x472   : > { %1241 = vadd.xlane.f32.xlu0 %v1240_v10 }
 0x47e   : > { %1257 = vrot.lane.b32.xlu1 %v3595_v42, %s3370_s24 }
 0x482   : > { %1643 = vrot.lane.b32.xlu1 %v3603_v43, %s3373_s30 }
 0x486   : > { %1641 = vrot.lane.b32.xlu1 %v3591_v40, %s3373_s30 }
 0x488   : > { %1259 = vrot.lane.b32.xlu0 %v3585_v37, %s3370_s24 }
 0x48a   : > { %1639 = vrot.lane.b32.xlu1 %v3615_v45, %s3373_s30 }
 0x48c   : > { %1637 = vrot.lane.b32.xlu0 %v3593_v41, %s3373_s30 }
 0x4f2   : > { %v1239_v17 = vpop.xlane.xlu0 %1238 }
 0x4f4   : > { %v3040_v13 = vpop.f32.mrf.mxu1 }
 0x4f5   : > { %v3080_v14 = vpop.f32.mrf.mxu0  ;;  %v1077_v25 = vpack.c.bf16 %v3040_v13, %v3040_v13 }
 0x4f6   : > { %v1062_v15 = vpop.f32.mrf.mxu1  ;;  %v1245_v16 = vpop.xlane.xlu1 %1244  ;;  %v1457_v20 = vadd.f32 %v3080_v14, %v3630_v56 }
 0x4f7   : > { %v1448_v18 = vpop.f32.mrf.mxu0  ;;  %3298 = vrcp.f32 %v1245_v16 }
 0x4f8   : > { %v1449_v43 = vadd.f32 %v1448_v18, %v3630_v56  ;;  %v3041_v19 = vpop.f32.mrf.mxu1  ;;  %3300 = vrcp.f32 %v1239_v17  ;;  %v1468_v28 = vsel %vm970_vm3, %v1457_v20, -inf }
 0x4f9   : > { %v3081_v40 = vpop.f32.mrf.mxu0 }
 0x4fa   : > { %v1065_v21 = vpop.f32.mrf.mxu1  ;;  %v1258_v22 = vpop.permute.xlu1 %1257  ;;  %v1462_v45 = vsel %vm970_vm3, %v1449_v43, -inf }
 0x4fb   : > { %v1076_v23 = vpack.c.bf16 %v1065_v21, %v1062_v15  ;;  %v1242_v41 = vpop.xlane.xlu0 %1241  ;;  %v1451_v24 = vpop.f32.mrf.mxu0  ;;  %1463 = vmax.xlane.f32.xlu0 %v1462_v45 }
 0x4fc   : > { %3302 = vrcp.f32 %v1242_v41  ;;  %v1452_v26 = vadd.f32 %v1451_v24, %v3630_v56 }
 0x4fd   : > { %3046 = vmatprep.mubr.msk.bf16.mxu1 %vm909_vm1, %v1076_v23 }
 0x4fe   : > { %3047 = vmatmul.mubr.msk.bf16.vlgmr.msra.gmra.mxu1 %vm909_vm1, %v1077_v25  ;;  %v1644_v27 = vpop.permute.xlu1 %1643  ;;  %v1465_v29 = vsel %vm970_vm3, %v1452_v26, -inf }
 0x4ff   : > { %v1655_v30 = vsel %vm909_vm1, %v1644_v27, 0  ;;  %v1260_v31 = vpop.permute.xlu0 %1259  ;;  %1469 = vmax.xlane.f32.xlu0 %v1468_v28  ;;  %1466 = vmax.xlane.f32.xlu1 %v1465_v29 }
 0x500   : > { %v1269_v33 = vsel %vm1024_vm0, %v1260_v31, 0  ;;  %3127 = vmatprep.subr.msk.bf16.mxu1 %vm1024_vm0, %v1260_v31  ;;  %3131 = vmatprep.subr.msk.bf16.mxu0 %vm909_vm1, %v1644_v27 }
 0x501   : > { %3059 = vmatpush3.bf16.msra.mxu1 %v1269_v33  ;;  %3099 = vmatpush3.bf16.xpose.msra.mxu0 %v1655_v30 }
 0x502   : > { %3060 = vmatprep.subr.bf16.mxu1 %v1258_v22  ;;  %v1642_v34 = vpop.permute.xlu1 %1641 }
 0x503   : > { %v1638_v35 = vpop.permute.xlu0 %1637  ;;  %3132 = vmatprep.subr.msk.bf16.mxu0 %vm909_vm1, %v1642_v34  ;;  %v1652_v39 = vsel %vm909_vm1, %v1642_v34, 0 }
 0x504   : > { %3102 = vmatprep.mubr.msk.bf16.mxu0 %vm909_vm1, %v1638_v35  ;;  %v3299_v36 = vpop.eup %3298 }
 0x505   : > { %3061 = vmatpush3.bf16.msra.mxu1 %v1258_v22  ;;  %v3301_v38 = vpop.eup %3300  ;;  %v1254_v46 = vmul.f32 %v3299_v36, %v3667_v7 }
 0x506   : > { %v1252_v47 = vmul.f32 %v3301_v38, %v3663_v1  ;;  %v1640_v51 = vpop.permute.xlu1 %1639  ;;  %3066 = vmatprep.subr.bf16.mxu1 %v3188_v52 }
 0x507   : > { %v1256_v50 = vpack.c.bf16 %v1254_v46, %v1254_v46 }
 0x509   : > { %v3303_v44 = vpop.eup %3302  ;;  %3101 = vmatpush3.bf16.xpose.msra.mxu0 %v1652_v39 }
 0x50a   : > { %v1253_v48 = vmul.f32 %v3303_v44, %v3671_v9 }
 0x50c   : > { %v1255_v49 = vpack.c.bf16 %v1253_v48, %v1252_v47 }
 0x50e   : > { %3062 = vmatprep.mubr.msk.bf16.mxu1 %vm970_vm3, %v1255_v49 }
 0x50f   : > { %3063 = vmatmul.mubr.msk.bf16.vlgmr.msra.gmra.mxu1 %vm970_vm3, %v1256_v50 }
 0x510   : > { %3103 = vmatmul.mubr.msk.bf16.vlgmr.msra.gmra.mxu0 %vm909_vm1, %v1640_v51  ;;  %3067 = vmatpush3.bf16.msra.mxu1 %v3188_v52 }
 0x511   : > { %2181 = vmatprep.mubr.bf16.mxu0 %v3369_v32  ;;  %3068 = vmatprep.subr.bf16.mxu1 %v3189_v53 }
 0x514   : > { %3069 = vmatpush3.bf16.msra.mxu1 %v3189_v53 }
 0x584   : > { %v1464_v54 = vpop.xlane.xlu0 %1463 }
 0x585   : > { %v1471_v55 = vsub.f32 %v1449_v43, %v1464_v54 }
 0x587   : > { %v1474_v57 = vmul.f32 1.442695, %v1471_v55 }
 0x588   : > { %v1467_v58 = vpop.xlane.xlu1 %1466  ;;  %v1470_v59 = vpop.xlane.xlu0 %1469 }
 0x589   : > { %3304 = vpow2.f32 %v1474_v57  ;;  %v1472_v60 = vsub.f32 %v1452_v26, %v1467_v58  ;;  %v1473_v61 = vsub.f32 %v1457_v20, %v1470_v59 }
 0x58b   : > { %v1476_v62 = vmul.f32 1.442695, %v1472_v60  ;;  %v1478_v63 = vmul.f32 1.442695, %v1473_v61  ;;  %v3190_v60 = vld [vmem:[%s4055_s5 + $0x28] sm:$0xff]  }
 0x58d   : > { %3306 = vpow2.f32 %v1476_v62 }
 0x58e   : > { %3308 = vpow2.f32 %v1478_v63  ;;  %v3191_v63 = vld [vmem:[%s4055_s5 + $0x20] sm:$0xff]  }
 0x596   : > { %v3305_v0 = vpop.eup %3304 }
 0x597   : > { %v1480_v1 = vsel %vm970_vm3, %v3305_v0, 0.0 }
 0x598   : > { %1481 = vadd.xlane.f32.xlu0 %v1480_v1  ;;  %v3358_v1 = vld [vmem:[%s3470_s21 + $0x10] sm:$0xff] }
 0x59a   : > { %v3307_v4 = vpop.eup %3306 }
 0x59b   : > { %v3309_v7 = vpop.eup %3308  ;;  %v1483_v8 = vsel %vm970_vm3, %v3307_v4, 0.0 }
 0x59c   : > { %1484 = vadd.xlane.f32.xlu0 %v1483_v8  ;;  %v1486_v9 = vsel %vm970_vm3, %v3309_v7, 0.0 }
 0x59d   : > { %1487 = vadd.xlane.f32.xlu1 %v1486_v9 }
 0x5ae   : > { %1500 = vrot.lane.b32.xlu1 %v3595_v42, %s3372_s25 }
 0x5b2   : > { %1502 = vrot.lane.b32.xlu0 %v3585_v37, %s3372_s25 }
 0x5be   : > { %v3728_v10 = vpop.f32.mrf.mxu1 }
 0x5c0   : > { %v3730_v11 = vpop.f32.mrf.mxu1 }
 0x5c2   : > { %v3049_v12 = vpop.f32.mrf.mxu1 }
 0x5c4   : > { %v3732_v13 = vpop.f32.mrf.mxu1 }
 0x5cf   : > { %v3064_v14 = vpop.f32.mrf.mxu1 }
 0x5d0   : > { %v3104_v15 = vpop.f32.mrf.mxu0  ;;  %v1320_v45 = vpack.c.bf16 %v3064_v14, %v3064_v14 }
 0x5d1   : > { %v1305_v16 = vpop.f32.mrf.mxu1  ;;  %v1700_v41 = vadd.f32 %v3104_v15, %v3630_v56 }
 0x5d2   : > { %v1691_v17 = vpop.f32.mrf.mxu0 }
 0x5d3   : > { %v1692_v18 = vadd.f32 %v1691_v17, %v3630_v56  ;;  %v3065_v43 = vpop.f32.mrf.mxu1  ;;  %v1711_v25 = vsel %vm970_vm3, %v1700_v41, -inf }
 0x5d4   : > { %v3105_v19 = vpop.f32.mrf.mxu0 }
 0x5d5   : > { %v1308_v40 = vpop.f32.mrf.mxu1  ;;  %v1705_v20 = vsel %vm970_vm3, %v1692_v18, -inf }
 0x5d6   : > { %v1319_v21 = vpack.c.bf16 %v1308_v40, %v1305_v16  ;;  %v1694_v22 = vpop.f32.mrf.mxu0  ;;  %1706 = vmax.xlane.f32.xlu1 %v1705_v20 }
 0x5d7   : > { %v1695_v23 = vadd.f32 %v1694_v22, %v3630_v56 }
 0x5d8   : > { %3070 = vmatprep.mubr.msk.bf16.mxu1 %vm909_vm1, %v1319_v21 }
 0x5d9   : > { %3071 = vmatmul.mubr.msk.bf16.vlgmr.msra.gmra.mxu1 %vm909_vm1, %v1320_v45  ;;  %v1708_v24 = vsel %vm970_vm3, %v1695_v23, -inf }
 0x5da   : > { %1709 = vmax.xlane.f32.xlu0 %v1708_v24 }
 0x5de   : > { %1712 = vmax.xlane.f32.xlu0 %v1711_v25 }
 0x621   : > { %v1482_v26 = vpop.xlane.xlu0 %1481 }
 0x622   : > { %3310 = vrcp.f32 %v1482_v26 }
 0x625   : > { %v1485_v27 = vpop.xlane.xlu0 %1484 }
 0x626   : > { %v1488_v28 = vpop.xlane.xlu1 %1487  ;;  %3312 = vrcp.f32 %v1485_v27 }
 0x627   : > { %3314 = vrcp.f32 %v1488_v28 }
 0x629   : > { %v1503_v29 = vpop.permute.xlu0 %1502 }
 0x62a   : > { %v1512_v30 = vsel %vm1024_vm0, %v1503_v29, 0  ;;  %3130 = vmatprep.subr.msk.bf16.mxu1 %vm1024_vm0, %v1503_v29  ;;  %v1501_v56 = vpop.permute.xlu1 %1500 }
 0x62b   : > { %3083 = vmatpush3.bf16.msra.mxu1 %v1512_v30 }
 0x62c   : > { %3084 = vmatprep.subr.bf16.mxu1 %v1501_v56 }
 0x62f   : > { %3085 = vmatpush3.bf16.msra.mxu1 %v1501_v56  ;;  %v3311_v31 = vpop.eup %3310 }
 0x630   : > { %v1495_v35 = vmul.f32 %v3311_v31, %v3305_v0  ;;  %3090 = vmatprep.subr.bf16.mxu1 %v3190_v60  ;;  %v2778_v0 = vld [vmem:[%s4056_s6] ss:$0 sm:$0xff]  ;;  %v3192_v31 = vld [vmem:[%s4055_s5 + $0x38] sm:$0xff]  }
 0x633   : > { %v3313_v33 = vpop.eup %3312 }
 0x634   : > { %v3315_v34 = vpop.eup %3314  ;;  %v1496_v36 = vmul.f32 %v3313_v33, %v3307_v4  ;;  %v883_v4 = vadd.f32 %v3358_v1, %v2778_v0  ;;  %v3193_v33 = vld [vmem:[%s4055_s5 + $0x30] sm:$0xff]  }
 0x635   : > { %v1497_v38 = vmul.f32 %v3315_v34, %v3309_v7  ;;  %v3359_v7 = vld [vmem:[%s3470_s21] sm:$0xff]  ;;  %v3360_v34 = vld [vmem:[%s3470_s21 + $0x8] sm:$0xff] }
 0x636   : > { %v1498_v39 = vpack.c.bf16 %v1496_v36, %v1495_v35  ;;  %v881_v8 = vadd.f32 %v3359_v7, %v2778_v0  ;;  %v1150_v9 = vadd.f32 %v3728_v10, %v883_v4  ;;  %v882_v35 = vadd.f32 %v3360_v34, %v2778_v0  ;;  %v3194_v0 = vld [vmem:[%s4059_s9 + $0xe0] ss:$16 sps:$4 sm:$0xff]   ;;  %v3196_v1 = vld [vmem:[%s4059_s9 + $0xe4] ss:$16 sps:$4 sm:$0xff]   ;;  %v3197_v4 = vld [vmem:[%s4059_s9 + $0xe8] ss:$16 sps:$4 sm:$0xff]  }
 0x637   : > { %v1499_v44 = vpack.c.bf16 %v1497_v38, %v1497_v38  ;;  %v3199_v7 = vld [vmem:[%s4059_s9 + $0xec] ss:$16 sps:$4 sm:$0xff]   ;;  %2149 = vmatprep.subr.bf16.mxu0 %v3196_v1  ;;  %v3227_v34 = vld [vmem:[%s4059_s9 + $0x48] ss:$16 sps:$4 sm:$0xff]  }
 0x638   : > { %3086 = vmatprep.mubr.msk.bf16.mxu1 %vm970_vm3, %v1498_v39  ;;  %v1148_v14 = vadd.f32 %v3730_v11, %v881_v8  ;;  %2150 = vmatpush1.bf16.msra.mxu0 %v3194_v0 }
 0x639   : > { %3087 = vmatmul.mubr.msk.bf16.vlgmr.msra.gmra.mxu1 %vm970_vm3, %v1499_v44  ;;  %v1149_v44 = vadd.f32 %v3732_v13, %v882_v35  ;;  %v3232_v35 = vld [vmem:[%s4059_s9 + $0x24] ss:$16 sps:$4 sm:$0xff]  }
 0x63a   : > { %3091 = vmatpush3.bf16.msra.mxu1 %v3190_v60 }
 0x63b   : > { %3092 = vmatprep.subr.bf16.mxu1 %v3191_v63 }
 0x63e   : > { %3093 = vmatpush3.bf16.msra.mxu1 %v3191_v63 }
 0x65f   : > { %v1707_v46 = vpop.xlane.xlu1 %1706 }
 0x660   : > { %v1714_v49 = vsub.f32 %v1692_v18, %v1707_v46 }
 0x662   : > { %v1717_v53 = vmul.f32 1.442695, %v1714_v49 }
 0x663   : > { %v1710_v47 = vpop.xlane.xlu0 %1709 }
 0x664   : > { %v1715_v48 = vsub.f32 %v1695_v23, %v1710_v47 }
 0x666   : > { %v1719_v50 = vmul.f32 1.442695, %v1715_v48 }
 0x667   : > { %v1713_v51 = vpop.xlane.xlu0 %1712 }
 0x668   : > { %3316 = vpow2.f32 %v1719_v50  ;;  %v1716_v52 = vsub.f32 %v1700_v41, %v1713_v51 }
 0x66a   : > { %v1721_v54 = vmul.f32 1.442695, %v1716_v52 }
 0x66c   : > { %3318 = vpow2.f32 %v1721_v54 }
 0x66d   : > { %3320 = vpow2.f32 %v1717_v53 }
 0x675   : > { %v3317_v55 = vpop.eup %3316 }
 0x676   : > { %v1726_v57 = vsel %vm970_vm3, %v3317_v55, 0.0 }
 0x677   : > { %1727 = vadd.xlane.f32.xlu0 %v1726_v57 }
 0x679   : > { %v3319_v58 = vpop.eup %3318 }
 0x67a   : > { %v1729_v59 = vsel %vm970_vm3, %v3319_v58, 0.0  ;;  %v3321_v61 = vpop.eup %3320 }
 0x67b   : > { %1730 = vadd.xlane.f32.xlu1 %v1729_v59  ;;  %v1723_v62 = vsel %vm970_vm3, %v3321_v61, 0.0 }
 0x67f   : > { %1724 = vadd.xlane.f32.xlu1 %v1723_v62 }
 0x68d   : > { %1745 = vrot.lane.b32.xlu0 %v3585_v37, %s3373_s30 }
 0x690   : > { %1743 = vrot.lane.b32.xlu1 %v3595_v42, %s3373_s30  ;;  %s494_s30 = scalar_lea.vmem %s4065_s15, %s3134_s13 }
 0x699   : > { %v3072_v12 = vpop.f32.mrf.mxu1 }
 0x69a   : > { %v1393_v15 = vadd.f32 %v3072_v12, %v1150_v9 }
 0x69b   : > { %v1377_v16 = vpop.f32.mrf.mxu1 }
 0x69c   : > { %v1391_v17 = vadd.f32 %v1377_v16, %v1148_v14 }
 0x69d   : > { %v3073_v37 = vpop.f32.mrf.mxu1 }
 0x69f   : > { %v1380_v18 = vpop.f32.mrf.mxu1 }
 0x6a0   : > { %v1392_v48 = vadd.f32 %v1380_v18, %v1149_v44  ;;  %v3238_v44 = vld [vmem:[%s4059_s9 + $0x4] ss:$16 sps:$4 sm:$0xff]  }
 0x6f9   : > { %v3088_v43 = vpop.f32.mrf.mxu1 }
 0x6fa   : > { %v1563_v22 = vpack.c.bf16 %v3088_v43, %v3088_v43 }
 0x6fb   : > { %v1548_v42 = vpop.f32.mrf.mxu1 }
 0x6fd   : > { %v3089_v19 = vpop.f32.mrf.mxu1 }
 0x6ff   : > { %v1551_v40 = vpop.f32.mrf.mxu1 }
 0x700   : > { %v1562_v20 = vpack.c.bf16 %v1551_v40, %v1548_v42  ;;  %v1728_v21 = vpop.xlane.xlu0 %1727  ;;  %v3202_v40 = vld [vmem:[%s4059_s9 + $0xc4] ss:$16 sps:$4 sm:$0xff]  }
 0x701   : > { %2151 = vmatprep.subr.bf16.mxu0 %v3202_v40  ;;  %v3246_v40 = vld [vmem:[%s4061_s11 + $0x70] sm:$0xff]  }
 0x702   : > { %3094 = vmatprep.mubr.msk.bf16.mxu1 %vm909_vm1, %v1562_v20  ;;  %v3205_v20 = vld [vmem:[%s4059_s9 + $0xcc] ss:$16 sps:$4 sm:$0xff]  }
 0x703   : > { %3095 = vmatmul.mubr.msk.bf16.vlgmr.msra.gmra.mxu1 %vm909_vm1, %v1563_v22  ;;  %v3203_v22 = vld [vmem:[%s4059_s9 + $0xc8] ss:$16 sps:$4 sm:$0xff]  }
 0x704   : > { %v1731_v10 = vpop.xlane.xlu1 %1730  ;;  %v1746_v45 = vpop.permute.xlu0 %1745 }
 0x705   : > { %v1755_v11 = vsel %vm1024_vm0, %v1746_v45, 0  ;;  %3133 = vmatprep.subr.msk.bf16.mxu1 %vm1024_vm0, %v1746_v45  ;;  %3322 = vrcp.f32 %v1731_v10  ;;  %v3208_v10 = vld [vmem:[%s4059_s9 + $0xa4] ss:$16 sps:$4 sm:$0xff]   ;;  %v3211_v45 = vld [vmem:[%s4059_s9 + $0xac] ss:$16 sps:$4 sm:$0xff]  }
 0x706   : > { %3107 = vmatpush3.bf16.msra.mxu1 %v1755_v11  ;;  %3324 = vrcp.f32 %v1728_v21  ;;  %v3200_v21 = vld [vmem:[%s4059_s9 + $0xc0] ss:$16 sps:$4 sm:$0xff]  }
 0x707   : > { %2152 = vmatpush1.bf16.msra.mxu0 %v3200_v21  ;;  %v3206_v11 = vld [vmem:[%s4059_s9 + $0xa0] ss:$16 sps:$4 sm:$0xff]  }
 0x708   : > { %v1725_v23 = vpop.xlane.xlu1 %1724  ;;  %2153 = vmatprep.subr.bf16.mxu0 %v3208_v10  ;;  %v3248_v21 = vld [vmem:[%s4061_s11 + $0x30] sm:$0xff]   ;;  %v3250_v10 = vld [vmem:[%s4061_s11 + $0x68] sm:$0xff]  }
 0x709   : > { %3326 = vrcp.f32 %v1725_v23  ;;  %v3209_v23 = vld [vmem:[%s4059_s9 + $0xa8] ss:$16 sps:$4 sm:$0xff]  }
 0x70b   : > { %2154 = vmatpush1.bf16.msra.mxu0 %v3206_v11  ;;  %v3252_v11 = vld [vmem:[%s4061_s11 + $0x28] sm:$0xff]  }
 0x70c   : > { %v1744_v41 = vpop.permute.xlu1 %1743 }
 0x70d   : > { %3108 = vmatprep.subr.bf16.mxu1 %v1744_v41 }
 0x70e   : > { %3109 = vmatpush3.bf16.msra.mxu1 %v1744_v41  ;;  %v3214_v41 = vld [vmem:[%s4059_s9 + $0x84] ss:$16 sps:$4 sm:$0xff]  }
 0x70f   : > { %3114 = vmatprep.subr.bf16.mxu1 %v3192_v31  ;;  %2155 = vmatprep.subr.bf16.mxu0 %v3214_v41  ;;  %v3254_v41 = vld [vmem:[%s4061_s11 + $0x60] sm:$0xff]  }
 0x712   : > { %v3323_v24 = vpop.eup %3322 }
 0x713   : > { %v3325_v25 = vpop.eup %3324  ;;  %v1740_v27 = vmul.f32 %v3323_v24, %v3319_v58  ;;  %v3217_v24 = vld [vmem:[%s4059_s9 + $0x8c] ss:$16 sps:$4 sm:$0xff]  }
 0x714   : > { %v1739_v29 = vmul.f32 %v3325_v25, %v3317_v55  ;;  %v3212_v25 = vld [vmem:[%s4059_s9 + $0x80] ss:$16 sps:$4 sm:$0xff]  }
 0x715   : > { %v1742_v56 = vpack.c.bf16 %v1740_v27, %v1740_v27  ;;  %2156 = vmatpush1.bf16.msra.mxu0 %v3212_v25  ;;  %v3218_v27 = vld [vmem:[%s4059_s9 + $0x60] ss:$16 sps:$4 sm:$0xff]  }
 0x716   : > { %v3327_v26 = vpop.eup %3326  ;;  %v3256_v25 = vld [vmem:[%s4061_s11 + $0x20] sm:$0xff]  }
 0x717   : > { %v1738_v28 = vmul.f32 %v3327_v26, %v3321_v61  ;;  %v3215_v26 = vld [vmem:[%s4059_s9 + $0x88] ss:$16 sps:$4 sm:$0xff]  }
 0x719   : > { %v1741_v30 = vpack.c.bf16 %v1739_v29, %v1738_v28  ;;  %v3220_v28 = vld [vmem:[%s4059_s9 + $0x64] ss:$16 sps:$4 sm:$0xff]   ;;  %v3221_v29 = vld [vmem:[%s4059_s9 + $0x68] ss:$16 sps:$4 sm:$0xff]  }
 0x71a   : > { %2157 = vmatprep.subr.bf16.mxu0 %v3220_v28  ;;  %v3259_v28 = vld [vmem:[%s4061_s11 + $0xd8] sm:$0xff]  }
 0x71b   : > { %3110 = vmatprep.mubr.msk.bf16.mxu1 %vm970_vm3, %v1741_v30  ;;  %v3223_v30 = vld [vmem:[%s4059_s9 + $0x6c] ss:$16 sps:$4 sm:$0xff]   ;;  %2158 = vmatpush1.bf16.msra.mxu0 %v3218_v27 }
 0x71c   : > { %3111 = vmatmul.mubr.msk.bf16.vlgmr.msra.gmra.mxu1 %vm970_vm3, %v1742_v56  ;;  %v3226_v56 = vld [vmem:[%s4059_s9 + $0x44] ss:$16 sps:$4 sm:$0xff]   ;;  %v3258_v27 = vld [vmem:[%s4061_s11 + $0x58] sm:$0xff]  }
 0x71d   : > { %3115 = vmatpush3.bf16.msra.mxu1 %v3192_v31  ;;  %v3229_v31 = vld [vmem:[%s4059_s9 + $0x4c] ss:$16 sps:$4 sm:$0xff]   ;;  %2159 = vmatprep.subr.bf16.mxu0 %v3226_v56  ;;  %v3262_v56 = vld [vmem:[%s4061_s11 + $0x50] sm:$0xff]  }
 0x71e   : > { %3116 = vmatprep.subr.bf16.mxu1 %v3193_v33 }
 0x721   : > { %3117 = vmatpush3.bf16.msra.mxu1 %v3193_v33  ;;  %v3224_v33 = vld [vmem:[%s4059_s9 + $0x40] ss:$16 sps:$4 sm:$0xff]  }
 0x722   : > { %2200 = vmatprep.subr.bf16.mxu1 %v3199_v7  ;;  %2160 = vmatpush1.bf16.msra.mxu0 %v3224_v33  ;;  %v2818_v7 = vld [vmem:[%s4058_s8] ss:$0 sm:$0xff]  ;;  %v3264_v33 = vld [vmem:[%s4061_s11 + $0x10] sm:$0xff]  }
 0x723   : > { %2161 = vmatprep.subr.bf16.mxu0 %v3232_v35  ;;  %v3266_v35 = vld [vmem:[%s4061_s11 + $0x48] sm:$0xff]  }
 0x7c3   : > { %v3096_v36 = vpop.f32.mrf.mxu1 }
 0x7c4   : > { %v1636_v38 = vadd.f32 %v3096_v36, %v1393_v15  ;;  %v3235_v36 = vld [vmem:[%s4059_s9 + $0x2c] ss:$16 sps:$4 sm:$0xff]  }
 0x7c5   : > { %v1620_v39 = vpop.f32.mrf.mxu1 }
 0x7c6   : > { %v1634_v46 = vadd.f32 %v1620_v39, %v1391_v17  ;;  %v3233_v39 = vld [vmem:[%s4059_s9 + $0x28] ss:$16 sps:$4 sm:$0xff]  }
 0x7c7   : > { %v3097_v47 = vpop.f32.mrf.mxu1 }
 0x7c8   : > { %v3236_v47 = vld [vmem:[%s4059_s9] ss:$16 sps:$4 sm:$0xff]  }
 0x7c9   : > { %v1623_v49 = vpop.f32.mrf.mxu1 }
 0x7ca   : > { %v1635_v50 = vadd.f32 %v1623_v49, %v1392_v48  ;;  %v3239_v48 = vld [vmem:[%s4059_s9 + $0x8] ss:$16 sps:$4 sm:$0xff]  }
 0x7dc   : > { %v3112_v51 = vpop.f32.mrf.mxu1 }
 0x7dd   : > { %v1806_v57 = vpack.c.bf16 %v3112_v51, %v3112_v51 }
 0x7de   : > { %v1791_v52 = vpop.f32.mrf.mxu1 }
 0x7e0   : > { %v3113_v53 = vpop.f32.mrf.mxu1 }
 0x7e2   : > { %v1794_v54 = vpop.f32.mrf.mxu1 }
 0x7e3   : > { %v1805_v55 = vpack.c.bf16 %v1794_v54, %v1791_v52 }
 0x7e5   : > { %3118 = vmatprep.mubr.msk.bf16.mxu1 %vm909_vm1, %v1805_v55 }
 0x7e6   : > { %3119 = vmatmul.mubr.msk.bf16.vlgmr.msra.gmra.mxu1 %vm909_vm1, %v1806_v57 }
 0x7e7   : > { %2232 = vmatprep.mubr.bf16.mxu1 %v3369_v32  ;;  %2201 = vmatpush1.bf16.msra.mxu1 %v3197_v4 }
 0x7e8   : > { %2202 = vmatprep.subr.bf16.mxu1 %v3205_v20  ;;  %v3247_v20 = vld [vmem:[%s4061_s11 + $0xf0] sm:$0xff]  }
 0x7eb   : > { %2203 = vmatpush1.bf16.msra.mxu1 %v3203_v22  ;;  %v3249_v22 = vld [vmem:[%s4061_s11 + $0xb0] sm:$0xff]  }
 0x7ec   : > { %2204 = vmatprep.subr.bf16.mxu1 %v3211_v45  ;;  %v3251_v45 = vld [vmem:[%s4061_s11 + $0xe8] sm:$0xff]  }
 0x7ef   : > { %2205 = vmatpush1.bf16.msra.mxu1 %v3209_v23  ;;  %v3253_v23 = vld [vmem:[%s4061_s11 + $0xa8] sm:$0xff]  }
 0x7f0   : > { %2206 = vmatprep.subr.bf16.mxu1 %v3217_v24  ;;  %v3255_v24 = vld [vmem:[%s4061_s11 + $0xe0] sm:$0xff]  }
 0x7f3   : > { %2207 = vmatpush1.bf16.msra.mxu1 %v3215_v26  ;;  %v3257_v26 = vld [vmem:[%s4061_s11 + $0xa0] sm:$0xff]  }
 0x7f4   : > { %2208 = vmatprep.subr.bf16.mxu1 %v3223_v30  ;;  %v3261_v30 = vld [vmem:[%s4061_s11 + $0x98] sm:$0xff]  }
 0x7f7   : > { %2209 = vmatpush1.bf16.msra.mxu1 %v3221_v29  ;;  %v3260_v29 = vld [vmem:[%s4061_s11 + $0x18] sm:$0xff]  }
 0x7f8   : > { %2210 = vmatprep.subr.bf16.mxu1 %v3229_v31  ;;  %v3263_v31 = vld [vmem:[%s4061_s11 + $0xd0] sm:$0xff]  }
 0x7fb   : > { %2211 = vmatpush1.bf16.msra.mxu1 %v3227_v34  ;;  %v3265_v34 = vld [vmem:[%s4061_s11 + $0x90] sm:$0xff]  }
 0x7fc   : > { %2212 = vmatprep.subr.bf16.mxu1 %v3235_v36  ;;  %v3267_v36 = vld [vmem:[%s4061_s11 + $0xc8] sm:$0xff]  }
 0x7ff   : > { %2213 = vmatpush1.bf16.msra.mxu1 %v3233_v39  ;;  %v3269_v39 = vld [vmem:[%s4061_s11 + $0x88] sm:$0xff]  }
 0x8a6   : > { %v3120_v58 = vpop.f32.mrf.mxu1 }
 0x8a7   : > { %v3789_v63 = vadd.f32 %v3120_v58, %v1636_v38  ;;  %v3230_v38 = vld [vmem:[%s4059_s9 + $0x20] ss:$16 sps:$4 sm:$0xff]  }
 0x8a8   : > { %v1863_v59 = vpop.f32.mrf.mxu1  ;;  %2162 = vmatpush1.bf16.msra.mxu0 %v3230_v38  ;;  %v3268_v38 = vld [vmem:[%s4061_s11 + $0x8] sm:$0xff]  }
 0x8a9   : > { %v3783_v13 = vadd.f32 %v1863_v59, %v1634_v46  ;;  %v3241_v46 = vld [vmem:[%s4059_s9 + $0xc] ss:$16 sps:$4 sm:$0xff]   ;;  %2163 = vmatprep.subr.bf16.mxu0 %v3238_v44  ;;  %v3270_v44 = vld [vmem:[%s4061_s11 + $0x40] sm:$0xff]  }
 0x8aa   : > { %v3121_v60 = vpop.f32.mrf.mxu1  ;;  %2214 = vmatprep.subr.bf16.mxu1 %v3241_v46  ;;  %v3271_v46 = vld [vmem:[%s4061_s11 + $0xc0] sm:$0xff]  }
 0x8ab   : > { %1882 = vadd.xlane.f32.xlu1 %v3783_v13  ;;  %2215 = vmatpush1.bf16.msra.mxu1 %v3239_v48  ;;  %v3273_v48 = vld [vmem:[%s4061_s11 + $0x80] sm:$0xff]  }
 0x8ac   : > { %v1866_v61 = vpop.f32.mrf.mxu1  ;;  %2164 = vmatpush1.bf16.msra.mxu0 %v3236_v47  ;;  %v3272_v47 = vld [vmem:[%s4061_s11] sm:$0xff]  }
 0x8ad   : > { %v3786_v62 = vadd.f32 %v1866_v61, %v1635_v50  ;;  %v2817_v61 = vld [vmem:[%s4057_s7] ss:$0 sm:$0xff] }
 0x8af   : > { %1884 = vadd.xlane.f32.xlu0 %v3786_v62 }
 0x8b3   : > { %1886 = vadd.xlane.f32.xlu0 %v3789_v63 }
 0x934   : > { %v1883_v8 = vpop.xlane.xlu1 %1882 }
 0x935   : > { %v1888_v9 = vmul.f32 0.0078125, %v1883_v8 }
 0x937   : > { %v3805_v12 = vsub.f32 %v3783_v13, %v1888_v9 }
 0x938   : > { %v1885_v14 = vpop.xlane.xlu0 %1884 }
 0x939   : > { %v1889_v15 = vmul.f32 0.0078125, %v1885_v14  ;;  %v1894_v16 = vmul.f32 %v3805_v12, %v3805_v12 }
 0x93b   : > { %v3810_v17 = vsub.f32 %v3786_v62, %v1889_v15  ;;  %1897 = vadd.xlane.f32.xlu1 %v1894_v16 }
 0x93c   : > { %v1887_v37 = vpop.xlane.xlu0 %1886 }
 0x93d   : > { %v1890_v18 = vmul.f32 0.0078125, %v1887_v37  ;;  %v1895_v43 = vmul.f32 %v3810_v17, %v3810_v17 }
 0x93f   : > { %v3815_v42 = vsub.f32 %v3789_v63, %v1890_v18  ;;  %1899 = vadd.xlane.f32.xlu0 %v1895_v43  ;;  %v3242_v43 = vld [vmem:[%s4061_s11 + $0x78] sm:$0xff]  }
 0x940   : > { %2950 = vmatprep.subr.bf16.mxu0 %v3242_v43 }
 0x941   : > { %v1896_v19 = vmul.f32 %v3815_v42, %v3815_v42 }
 0x943   : > { %1901 = vadd.xlane.f32.xlu1 %v1896_v19  ;;  %v3244_v19 = vld [vmem:[%s4061_s11 + $0x38] sm:$0xff]  }
 0x9c4   : > { %v1898_v49 = vpop.xlane.xlu1 %1897 }
 0x9c5   : > { %v1903_v50 = vmul.f32 0.0078125, %v1898_v49  ;;  %v1967_v49 = vld [vmem:[%s4060_s10] sm:$0xf] }
 0x9c7   : > { %v1906_v51 = vadd.f32 1e-06, %v1903_v50  ;;  %v1983_v50 = vsub.s32 3, %v3571_v2 }
 0x9c8   : > { %v1900_v52 = vpop.xlane.xlu0 %1899 }
 0x9c9   : > { %3328 = vrsqrt.f32 %v1906_v51  ;;  %v1904_v53 = vmul.f32 0.0078125, %v1900_v52  ;;  %v1972_v51 = vrot.slane %v1967_v49, %v591_v5  ;;  %v1980_v52 = vrot.slane %v1967_v49, %v599_v3 }
 0x9cb   : > { %v1907_v54 = vadd.f32 1e-06, %v1904_v53 }
 0x9cc   : > { %v1902_v55 = vpop.xlane.xlu1 %1901 }
 0x9cd   : > { %3330 = vrsqrt.f32 %v1907_v54  ;;  %v1905_v57 = vmul.f32 0.0078125, %v1902_v55  ;;  %v1976_v55 = vrot.slane %v1967_v49, %v595_v6 }
 0x9cf   : > { %v1908_v58 = vadd.f32 1e-06, %v1905_v57  ;;  %v1984_v57 = vrot.slane %v1967_v49, %v1983_v50 }
 0x9d1   : > { %3332 = vrsqrt.f32 %v1908_v58 }
 0x9d6   : > { %v3329_v59 = vpop.eup %3328 }
 0x9d7   : > { %v1912_v60 = vmul.f32 %v3329_v59, %v3805_v12 }
 0x9d9   : > { %v1921_v4 = vmul.f32 %v2817_v61, %v1912_v60 }
 0x9da   : > { %v3331_v0 = vpop.eup %3330 }
 0x9db   : > { %v1913_v1 = vmul.f32 %v3331_v0, %v3810_v17  ;;  %v1930_v14 = vadd.f32 %v2818_v7, %v1921_v4 }
 0x9dd   : > { %v1922_v8 = vmul.f32 %v2817_v61, %v1913_v1 }
 0x9de   : > { %v3333_v9 = vpop.eup %3332 }
 0x9df   : > { %v1931_v15 = vadd.f32 %v2818_v7, %v1922_v8  ;;  %v1914_v16 = vmul.f32 %v3333_v9, %v3815_v42  ;;  %v3243_v42 = vld [vmem:[%s4061_s11 + $0xf8] sm:$0xff]  }
 0x9e0   : > { %2978 = vmatprep.subr.bf16.mxu1 %v3243_v42 }
 0x9e1   : > { %v1933_v37 = vpack.c.bf16 %v1931_v15, %v1930_v14  ;;  %v1923_v12 = vmul.f32 %v2817_v61, %v1914_v16 }
 0x9e3   : > { %2182 = vmatmul.mubr.bf16.vlgmr.msra.gmra.mxu0 %v1933_v37  ;;  %2233 = vmatmul.mubr.bf16.vlgmr.msra.gmra.mxu1 %v1933_v37  ;;  %v1932_v17 = vadd.f32 %v2818_v7, %v1923_v12 }
 0x9e4   : > { %2191 = vmatprep.mubr.bf16.mxu0 %v3369_v32  ;;  %2242 = vmatprep.mubr.bf16.mxu1 %v3369_v32  ;;  %v3245_v32 = vld [vmem:[%s4061_s11 + $0xb8] sm:$0xff]  }
 0x9e5   : > { %v1934_v18 = vpack.c.bf16 %v1932_v17, %v1932_v17  ;;  %2951 = vmatpush3.bf16.msra.mxu0 %v3244_v19  ;;  %2979 = vmatpush3.bf16.msra.mxu1 %v3245_v32 }
 0x9e6   : > { %2952 = vmatprep.subr.bf16.mxu0 %v3246_v40  ;;  %2980 = vmatprep.subr.bf16.mxu1 %v3247_v20 }
 0x9e9   : > { %2953 = vmatpush3.bf16.msra.mxu0 %v3248_v21  ;;  %2981 = vmatpush3.bf16.msra.mxu1 %v3249_v22 }
 0x9ea   : > { %2954 = vmatprep.subr.bf16.mxu0 %v3250_v10  ;;  %2982 = vmatprep.subr.bf16.mxu1 %v3251_v45 }
 0x9eb   : > { %2192 = vmatmul.mubr.bf16.gmra.mxu0 %v1934_v18  ;;  %2243 = vmatmul.mubr.bf16.gmra.mxu1 %v1934_v18 }
 0x9ed   : > { %2955 = vmatpush3.bf16.msra.mxu0 %v3252_v11  ;;  %2983 = vmatpush3.bf16.msra.mxu1 %v3253_v23 }
 0x9ee   : > { %2956 = vmatprep.subr.bf16.mxu0 %v3254_v41  ;;  %2984 = vmatprep.subr.bf16.mxu1 %v3255_v24 }
 0x9f1   : > { %2957 = vmatpush3.bf16.msra.mxu0 %v3256_v25  ;;  %2985 = vmatpush3.bf16.msra.mxu1 %v3257_v26 }
 0x9f2   : > { %2958 = vmatprep.subr.bf16.mxu0 %v3258_v27  ;;  %2986 = vmatprep.subr.bf16.mxu1 %v3259_v28 }
 0x9f5   : > { %2959 = vmatpush3.bf16.msra.mxu0 %v3260_v29  ;;  %2987 = vmatpush3.bf16.msra.mxu1 %v3261_v30 }
 0x9f6   : > { %2960 = vmatprep.subr.bf16.mxu0 %v3262_v56  ;;  %2988 = vmatprep.subr.bf16.mxu1 %v3263_v31 }
 0x9f9   : > { %2961 = vmatpush3.bf16.msra.mxu0 %v3264_v33  ;;  %2989 = vmatpush3.bf16.msra.mxu1 %v3265_v34 }
 0x9fa   : > { %2962 = vmatprep.subr.bf16.mxu0 %v3266_v35  ;;  %2990 = vmatprep.subr.bf16.mxu1 %v3267_v36 }
 0x9fd   : > { %2963 = vmatpush3.bf16.msra.mxu0 %v3268_v38  ;;  %2991 = vmatpush3.bf16.msra.mxu1 %v3269_v39 }
 0x9fe   : > { %2964 = vmatprep.subr.bf16.mxu0 %v3270_v44  ;;  %2992 = vmatprep.subr.bf16.mxu1 %v3271_v46 }
 0xa01   : > { %2965 = vmatpush3.bf16.msra.mxu0 %v3272_v47  ;;  %2993 = vmatpush3.bf16.msra.mxu1 %v3273_v48 }
 0xaa3   : > { %v2183_v53 = vpop.f32.mrf.mxu0  ;;  %v2234_v54 = vpop.f32.mrf.mxu1 }
 0xaa4   : > { %v2184_v58 = vadd.f32 %v2183_v53, %v1972_v51  ;;  %v4020_v59 = vadd.f32 %v2234_v54, %v1980_v52 }
 0xaa5   : > { %v2185_v60 = vpop.f32.mrf.mxu0  ;;  %v2236_v61 = vpop.f32.mrf.mxu1 }
 0xaa6   : > { %v2263_v0 = vmul.f32 0.70710677, %v2184_v58  ;;  %v2265_v1 = vmul.f32 0.70710677, %v4020_v59  ;;  %v2186_v4 = vadd.f32 %v2185_v60, %v1976_v55  ;;  %v4023_v7 = vadd.f32 %v2236_v61, %v1984_v57 }
 0xaa7   : > { %v2187_v5 = vpop.f32.mrf.mxu0  ;;  %v2238_v8 = vpop.f32.mrf.mxu1  ;;  %v2251_v34 = vmul.f32 0.5, %v2184_v58 }
 0xaa8   : > { %v2188_v3 = vadd.f32 %v2187_v5, %v1972_v51  ;;  %v2239_v9 = vadd.f32 %v2238_v8, %v1980_v52  ;;  %3334 = verf.f32 %v2263_v0  ;;  %v2264_v14 = vmul.f32 0.70710677, %v2186_v4 }
 0xaa9   : > { %v2189_v2 = vpop.f32.mrf.mxu0  ;;  %v2240_v6 = vpop.f32.mrf.mxu1  ;;  %3336 = verf.f32 %v2265_v1  ;;  %v2266_v15 = vmul.f32 0.70710677, %v4023_v7  ;;  %v2252_v35 = vmul.f32 0.5, %v2186_v4  ;;  %v2253_v0 = vmul.f32 0.5, %v4020_v59 }
 0xaaa   : > { %v2267_v16 = vmul.f32 0.70710677, %v2188_v3  ;;  %3338 = verf.f32 %v2264_v14  ;;  %v2269_v37 = vmul.f32 0.70710677, %v2239_v9  ;;  %v2190_v12 = vadd.f32 %v2189_v2, %v1976_v55 }
 0xaab   : > { %v2241_v17 = vadd.f32 %v2240_v6, %v1984_v57  ;;  %v2193_v18 = vpop.f32.mrf.mxu0  ;;  %v2244_v43 = vpop.f32.mrf.mxu1  ;;  %3340 = verf.f32 %v2266_v15  ;;  %v2255_v47 = vmul.f32 0.5, %v2188_v3 }
 0xaac   : > { %v4026_v42 = vadd.f32 %v2193_v18, %v1972_v51  ;;  %v4028_v19 = vadd.f32 %v2244_v43, %v1980_v52  ;;  %3342 = verf.f32 %v2267_v16  ;;  %v2268_v32 = vmul.f32 0.70710677, %v2190_v12 }
 0xaad   : > { %v2195_v40 = vpop.f32.mrf.mxu0  ;;  %v2246_v20 = vpop.f32.mrf.mxu1  ;;  %3344 = verf.f32 %v2269_v37  ;;  %v2270_v21 = vmul.f32 0.70710677, %v2241_v17  ;;  %v2257_v51 = vmul.f32 0.5, %v2239_v9  ;;  %v2256_v52 = vmul.f32 0.5, %v2190_v12 }
 0xaae   : > { %v2271_v22 = vmul.f32 0.70710677, %v4026_v42  ;;  %3346 = verf.f32 %v2268_v32  ;;  %v2273_v10 = vmul.f32 0.70710677, %v4028_v19  ;;  %v2196_v45 = vadd.f32 %v2195_v40, %v1976_v55 }
 0xaaf   : > { %v2197_v11 = vpop.f32.mrf.mxu0  ;;  %v2248_v23 = vpop.f32.mrf.mxu1  ;;  %3348 = verf.f32 %v2270_v21  ;;  %v2247_v41 = vadd.f32 %v2246_v20, %v1984_v57  ;;  %v2254_v55 = vmul.f32 0.5, %v4023_v7  ;;  %v2258_v60 = vmul.f32 0.5, %v2241_v17 }
 0xab0   : > { %3350 = verf.f32 %v2271_v22  ;;  %v2272_v24 = vmul.f32 0.70710677, %v2196_v45  ;;  %v2260_v6 = vmul.f32 0.5, %v2196_v45  ;;  %v2259_v20 = vmul.f32 0.5, %v4026_v42  ;;  %v2851_v42 = vld [vmem:[%s4062_s12] ss:$0 sm:$0xff] }
 0xab1   : > { %v2198_v25 = vpop.f32.mrf.mxu0  ;;  %v2249_v26 = vpop.f32.mrf.mxu1  ;;  %3352 = verf.f32 %v2273_v10  ;;  %v2274_v27 = vmul.f32 0.70710677, %v2247_v41  ;;  %v2262_v16 = vmul.f32 0.5, %v2247_v41  ;;  %v2261_v22 = vmul.f32 0.5, %v4028_v19 }
 0xab2   : > { %3354 = verf.f32 %v2272_v24 }
 0xab3   : > { %3356 = verf.f32 %v2274_v27 }
 0xab5   : > { %v3335_v28 = vpop.eup %3334 }
 0xab6   : > { %v3337_v29 = vpop.eup %3336  ;;  %v2287_v44 = vadd.f32 1.0, %v3335_v28 }
 0xab7   : > { %v3339_v30 = vpop.eup %3338  ;;  %v2289_v50 = vadd.f32 1.0, %v3337_v29 }
 0xab8   : > { %v3341_v56 = vpop.eup %3340  ;;  %v2288_v36 = vadd.f32 1.0, %v3339_v30  ;;  %v2299_v3 = vmul.f32 %v2287_v44, %v2251_v34 }
 0xab9   : > { %v3343_v31 = vpop.eup %3342  ;;  %v2290_v46 = vadd.f32 1.0, %v3341_v56  ;;  %v2301_v15 = vmul.f32 %v2289_v50, %v2253_v0 }
 0xaba   : > { %v3345_v33 = vpop.eup %3344  ;;  %v2291_v38 = vadd.f32 1.0, %v3343_v31  ;;  %v2300_v1 = vmul.f32 %v2288_v36, %v2252_v35 }
 0xabb   : > { %v3347_v39 = vpop.eup %3346  ;;  %v2293_v48 = vadd.f32 1.0, %v3345_v33  ;;  %v2302_v14 = vmul.f32 %v2290_v46, %v2254_v55 }
 0xabc   : > { %v3349_v49 = vpop.eup %3348  ;;  %v2292_v53 = vadd.f32 1.0, %v3347_v39  ;;  %v2303_v57 = vmul.f32 %v2291_v38, %v2255_v47 }
 0xabd   : > { %v3351_v54 = vpop.eup %3350  ;;  %v2294_v61 = vadd.f32 1.0, %v3349_v49  ;;  %v2305_v4 = vmul.f32 %v2293_v48, %v2257_v51 }
 0xabe   : > { %v3353_v58 = vpop.eup %3352  ;;  %v2304_v5 = vmul.f32 %v2292_v53, %v2256_v52  ;;  %v2311_v7 = vpack.c.bf16 %v2303_v57, %v2299_v3  ;;  %v2295_v43 = vadd.f32 1.0, %v3351_v54 }
 0xabf   : > { %v3355_v8 = vpop.eup %3354  ;;  %v2306_v2 = vmul.f32 %v2294_v61, %v2258_v60  ;;  %v2313_v32 = vpack.c.bf16 %v2305_v4, %v2301_v15  ;;  %v2297_v40 = vadd.f32 1.0, %v3353_v58 }
 0xac0   : > { %v3357_v9 = vpop.eup %3356  ;;  %v2312_v37 = vpack.c.bf16 %v2304_v5, %v2300_v1  ;;  %v2296_v12 = vadd.f32 1.0, %v3355_v8  ;;  %v2307_v11 = vmul.f32 %v2295_v43, %v2259_v20 }
 0xac1   : > { %v2314_v18 = vpack.c.bf16 %v2306_v2, %v2302_v14  ;;  %v2298_v17 = vadd.f32 1.0, %v3357_v9  ;;  %v2309_v23 = vmul.f32 %v2297_v40, %v2261_v22 }
 0xac2   : > { %2614 = vmatprep.mubr.bf16.mxu0 %v2312_v37  ;;  %v2308_v59 = vmul.f32 %v2296_v12, %v2260_v6  ;;  %v2315_v41 = vpack.c.bf16 %v2307_v11, %v2307_v11 }
 0xac3   : > { %2662 = vmatprep.mubr.bf16.mxu1 %v2314_v18  ;;  %2615 = vmatmul.mubr.bf16.vlgmr.msra.gmra.mxu0 %v2311_v7  ;;  %v2310_v21 = vmul.f32 %v2298_v17, %v2262_v16  ;;  %v2317_v24 = vpack.c.bf16 %v2309_v23, %v2309_v23 }
 0xac4   : > { %2663 = vmatmul.mubr.bf16.vlgmr.msra.gmra.mxu1 %v2313_v32  ;;  %v2316_v10 = vpack.c.bf16 %v2308_v59, %v2308_v59 }
 0xac5   : > { %v2318_v45 = vpack.c.bf16 %v2310_v21, %v2310_v21 }
 0xac6   : > { %2622 = vmatprep.mubr.bf16.mxu0 %v2316_v10 }
 0xac7   : > { %2670 = vmatprep.mubr.bf16.mxu1 %v2318_v45 }
 0xacb   : > { %2623 = vmatmul.mubr.bf16.gmra.mxu0 %v2315_v41 }
 0xacc   : > { %2671 = vmatmul.mubr.bf16.gmra.mxu1 %v2317_v24 }
 0xb83   : > { %v2966_v25 = vpop.f32.mrf.mxu0 }
 0xb84   : > { %v2994_v26 = vpop.f32.mrf.mxu1 }
 0xb85   : > { %v2967_v27 = vpop.f32.mrf.mxu0 }
 0xb86   : > { %v2968_v19 = vadd.f32 %v2967_v27, %v2966_v25  ;;  %v2995_v28 = vpop.f32.mrf.mxu1 }
 0xb87   : > { %v2969_v29 = vpop.f32.mrf.mxu0  ;;  %v2996_v56 = vadd.f32 %v2995_v28, %v2994_v26 }
 0xb88   : > { %v2617_v30 = vadd.f32 %v2968_v19, %v2851_v42  ;;  %v2997_v31 = vpop.f32.mrf.mxu1 }
 0xb89   : > { %v2970_v33 = vpop.f32.mrf.mxu0 }
 0xb8a   : > { %v2665_v34 = vadd.f32 %v2996_v56, %v2617_v30  ;;  %v2971_v35 = vadd.f32 %v2970_v33, %v2969_v29  ;;  %v2998_v36 = vpop.f32.mrf.mxu1 }
 0xb8b   : > { %v2972_v38 = vpop.f32.mrf.mxu0  ;;  %v2999_v46 = vadd.f32 %v2998_v36, %v2997_v31 }
 0xb8c   : > { %v2678_v39 = vadd.f32 %v2665_v34, %v3783_v13  ;;  %v2620_v44 = vadd.f32 %v2971_v35, %v2851_v42  ;;  %v3000_v47 = vpop.f32.mrf.mxu1 }
 0xb8d   : > { %v2973_v48 = vpop.f32.mrf.mxu0 }
 0xb8e   : > { %2681 = vst [vmem:[%s494_s30] sm:$0xff] %v2678_v39  ;;  %v2668_v49 = vadd.f32 %v2999_v46, %v2620_v44  ;;  %v2974_v50 = vadd.f32 %v2973_v48, %v2972_v38  ;;  %v3001_v51 = vpop.f32.mrf.mxu1 }
 0xb8f   : > { %v2975_v52 = vpop.f32.mrf.mxu0  ;;  %v3002_v55 = vadd.f32 %v3001_v51, %v3000_v47 }
 0xb90   : > { %v2679_v53 = vadd.f32 %v2668_v49, %v3786_v62  ;;  %v2625_v54 = vadd.f32 %v2974_v50, %v2851_v42  ;;  %v3003_v57 = vpop.f32.mrf.mxu1 }
 0xb91   : > { %v2976_v60 = vpop.f32.mrf.mxu0 }
 0xb92   : > { %2682 = vst [vmem:[%s494_s30 + $0x8] sm:$0xff] %v2679_v53  ;;  %v2673_v61 = vadd.f32 %v3002_v55, %v2625_v54  ;;  %v3004_v58 = vpop.f32.mrf.mxu1 }
 0xb94   : > { %v2680_v13 = vadd.f32 %v2673_v61, %v3789_v63 }
 0xb96   : > { %2683 = vst [vmem:[%s494_s30 + $0x10] sm:$0xff] %v2680_v13 }
 0xb97 PF: > { %s25_s18 = sadd.s32 1, %s3367_s18  }
 0xb98   : > { %p22_p4 = scmp.ge.s32.totalorder %s25_s18, 4  }
 0xb9a   :  { %24 = sbr.rel (!%p22_p4) target bundleno = 1 (0x1), region = 110 }

// kernel: forward.5
= control target key start
LH: loop header
LB: loop body
LE: loop exit
PB: predicated region body
PF: predicated region fallthrough
CT: control target
= control target key end

     0   :  { %s3754_s21 = smov 0   ;;  %s4350_s0 = inlined_call_operand.vmem [shape: f32[2,24,128], index: 0, kind: input, shape index: {}]   ;;  %s4351_s1 = inlined_call_operand.vmem [shape: f32[1,128], index: 1, kind: input, shape index: {}, may-alias: {1,7,13}]   ;;  %s4352_s2 = inlined_call_operand.vmem [shape: f32[1,128], index: 2, kind: input, shape index: {}, may-alias: {2,6,8,12,14}]   ;;  %s4353_s3 = inlined_call_operand.vmem [shape: bf16[128,384], index: 3, kind: input, shape index: {}]   ;;  %s4354_s4 = inlined_call_operand.vmem [shape: f32[1,384], index: 4, kind: input, shape index: {}]   ;;  %s4355_s5 = inlined_call_operand.vmem [shape: bf16[128,128], index: 5, kind: input, shape index: {}]   ;;  %s4356_s6 = inlined_call_operand.vmem [shape: f32[1,128], index: 6, kind: input, shape index: {}, may-alias: {2,6,8,12,14}]   ;;  %s4357_s7 = inlined_call_operand.vmem [shape: f32[1,128], index: 7, kind: input, shape index: {}, may-alias: {1,7,13}]   ;;  %s4358_s8 = inlined_call_operand.vmem [shape: f32[1,128], index: 8, kind: input, shape index: {}, may-alias: {2,6,8,12,14}]   ;;  %s4359_s9 = inlined_call_operand.vmem [shape: bf16[128,512], index: 9, kind: input, shape index: {}]   ;;  %s4360_s10 = inlined_call_operand.vmem [shape: f32[1,512], index: 10, kind: input, shape index: {}]   ;;  %s4361_s11 = inlined_call_operand.vmem [shape: bf16[512,128], index: 11, kind: input, shape index: {}]   ;;  %s4362_s12 = inlined_call_operand.vmem [shape: f32[1,128], index: 12, kind: input, shape index: {}, may-alias: {2,6,8,12,14}]   ;;  %s4363_s13 = inlined_call_operand.vmem [shape: f32[1,128], index: 13, kind: input, shape index: {}, may-alias: {1,7,13}]   ;;  %s4364_s14 = inlined_call_operand.vmem [shape: f32[1,128], index: 14, kind: input, shape index: {}, may-alias: {2,6,8,12,14}]   ;;  %s4365_s15 = inlined_call_operand.vmem [shape: f32[2,24,128], index: 15, kind: output, shape index: {0}]   ;;  %s4366_s16 = inlined_call_operand.vmem [shape: f32[2,4,24,24], index: 16, kind: output, shape index: {1}]  }
   0x1   :  { %4367 = sst [smem:[#allocation3_spill]] %s4350_s0 }
   0x2 LB: > { %s2979_s22 = sadd.s32 4294967295, %s3662_s21   ;;  %p2983_p0 = scmp.ge.s32.totalorder %s3662_s21, 1  ;;  %s3662_s21 = sphi %s3754_s21, %s27_s21  }
   0x3   : > { %p465_p1 = scmp.lt.s32.totalorder %s3662_s21, 3 }
   0x5   : > { %p466_p2 = pnand %p2983_p0, %p465_p1 }
   0x6   : > { %p520_p3 = scmp.lt.s32.totalorder (!%p466_p2), %s2979_s22, 1  ;;  %s4368_s26 = sld [smem:[#allocation3_spill]] (!%p466_p2) }
   0x7   : > { %469 = sbr.rel (%p466_p2) target bundleno = 3275 (0xccb), region = 80  ;;  %s3667_s28 = smov (!%p466_p2), 64  }
   0x8   : > { %s3668_s25 = smov (!%p466_p2), 32  }
   0xc   : > { %s4370_s22 = smov (!%p520_p3, %s2979_s22), 1  ;;  %v3419_v3 = vld [vmem:[%s4353_s3 + $0xac] ss:$12 sps:$4 sm:$0xff]   ;;  %v3421_v4 = vld [vmem:[%s4353_s3 + $0xa8] ss:$12 sps:$4 sm:$0xff]   ;;  %v3664_v32 = vmov 0  }
   0xd   : > { %s3404_s23 = smul.u32 24, %s4370_s22  ;;  %v3422_v5 = vld [vmem:[%s4353_s3 + $0xb0] ss:$12 sps:$4 sm:$0xff]   ;;  %772 = vmatprep.subr.bf16.mxu0 %v3419_v3  ;;  %v3423_v18 = vld [vmem:[%s4353_s3 + $0x94] ss:$12 sps:$4 sm:$0xff]   ;;  %804 = vmatprep.mubr.bf16.mxu0 %v3664_v32  ;;  %vm1067_vm0 = vcmask 1043456  }
   0xe   : > { %3276 = vmatprep.subr.bf16.mxu1 %v3422_v5  ;;  %773 = vmatpush1.bf16.msra.mxu0 %v3421_v4  ;;  %v3425_v19 = vld [vmem:[%s4353_s3 + $0x90] ss:$12 sps:$4 sm:$0xff]   ;;  %v3426_v20 = vld [vmem:[%s4353_s3 + $0x98] ss:$12 sps:$4 sm:$0xff]   ;;  %v3430_v23 = vld [vmem:[%s4353_s3 + $0x80] ss:$12 sps:$4 sm:$0xff]  }
   0xf   : > { %s3770_s27 = scalar_lea.vmem %s4368_s26, %s3404_s23  ;;  %3277 = vmatpush3.bf16.msra.mxu1 %v3422_v5  ;;  %774 = vmatprep.subr.bf16.mxu0 %v3423_v18  ;;  %v3427_v21 = vld [vmem:[%s4353_s3 + $0x7c] ss:$12 sps:$4 sm:$0xff]   ;;  %v3429_v22 = vld [vmem:[%s4353_s3 + $0x78] ss:$12 sps:$4 sm:$0xff]   ;;  %v3433_v25 = vld [vmem:[%s4353_s3 + $0x60] ss:$12 sps:$4 sm:$0xff]   ;;  %s529_s30 = scalar_lea.vmem %s4365_s15, %s3404_s23 }
  0x10   : > { %v536_v0 = vld [vmem:[%s3770_s27] sm:$0xff]  ;;  %v538_v1 = vld [vmem:[%s3770_s27 + $0x10] sm:$0xff]  ;;  %v537_v2 = vld [vmem:[%s3770_s27 + $0x8] sm:$0xff]  ;;  %3278 = vmatprep.subr.bf16.mxu1 %v3426_v20  ;;  %vm949_vm1 = vcmask 261120   ;;  %s3665_s26 = smov 96   ;;  %vm1010_vm3 = vcmask 195584  }
  0x11   : > { %541 = vadd.xlane.f32.xlu0 %v536_v0  ;;  %545 = vadd.xlane.f32.xlu1 %v538_v1  ;;  %v3431_v24 = vld [vmem:[%s4353_s3 + $0x64] ss:$12 sps:$4 sm:$0xff]   ;;  %v3434_v26 = vld [vmem:[%s4353_s3 + $0x68] ss:$12 sps:$4 sm:$0xff]   ;;  %v3435_v27 = vld [vmem:[%s4353_s3 + $0x4c] ss:$12 sps:$4 sm:$0xff]  }
  0x12   : > { %775 = vmatpush1.bf16.msra.mxu0 %v3425_v19  ;;  %v3438_v28 = vld [vmem:[%s4353_s3 + $0x50] ss:$12 sps:$4 sm:$0xff]   ;;  %v3437_v29 = vld [vmem:[%s4353_s3 + $0x48] ss:$12 sps:$4 sm:$0xff]   ;;  %v3442_v31 = vld [vmem:[%s4353_s3 + $0x38] ss:$12 sps:$4 sm:$0xff]  }
  0x13   : > { %3279 = vmatpush3.bf16.msra.mxu1 %v3426_v20  ;;  %776 = vmatprep.subr.bf16.mxu0 %v3427_v21  ;;  %v3439_v30 = vld [vmem:[%s4353_s3 + $0x34] ss:$12 sps:$4 sm:$0xff]   ;;  %v3441_v33 = vld [vmem:[%s4353_s3 + $0x30] ss:$12 sps:$4 sm:$0xff]   ;;  %v3445_v36 = vld [vmem:[%s4353_s3 + $0x18] ss:$12 sps:$4 sm:$0xff]  }
  0x14   : > { %3280 = vmatprep.subr.bf16.mxu1 %v3430_v23  ;;  %v3443_v34 = vld [vmem:[%s4353_s3 + $0x1c] ss:$12 sps:$4 sm:$0xff]   ;;  %v3446_v35 = vld [vmem:[%s4353_s3 + $0x20] ss:$12 sps:$4 sm:$0xff]   ;;  %v3447_v37 = vld [vmem:[%s4353_s3 + $0x4] ss:$12 sps:$4 sm:$0xff]  }
  0x15   : > { %543 = vadd.xlane.f32.xlu0 %v537_v2  ;;  %v3450_v38 = vld [vmem:[%s4353_s3 + $0x8] ss:$12 sps:$4 sm:$0xff]   ;;  %v3449_v39 = vld [vmem:[%s4353_s3] ss:$12 sps:$4 sm:$0xff]   ;;  %s3405_s29 = smul.u32 96, %s4370_s22 }
  0x16   : > { %777 = vmatpush1.bf16.msra.mxu0 %v3429_v22  ;;  %v2987_v51 = vld [vmem:[%s4351_s1] ss:$0 sm:$0xff] }
  0x17   : > { %3281 = vmatpush3.bf16.msra.mxu1 %v3430_v23  ;;  %778 = vmatprep.subr.bf16.mxu0 %v3431_v24  ;;  %v2988_v57 = vld [vmem:[%s4352_s2] ss:$0 sm:$0xff]  ;;  %s3932_s17 = scalar_lea.vmem %s4366_s16, %s3405_s29 }
  0x18   : > { %3282 = vmatprep.subr.bf16.mxu1 %v3434_v26  ;;  %v627_v4 = vld [vmem:[%s4354_s4] sm:$0x7] }
  0x1a   : > { %779 = vmatpush1.bf16.msra.mxu0 %v3433_v25 }
  0x1b   : > { %3283 = vmatpush3.bf16.msra.mxu1 %v3434_v26  ;;  %780 = vmatprep.subr.bf16.mxu0 %v3435_v27 }
  0x1c   : > { %3284 = vmatprep.subr.bf16.mxu1 %v3438_v28 }
  0x1e   : > { %781 = vmatpush1.bf16.msra.mxu0 %v3437_v29 }
  0x1f   : > { %3285 = vmatpush3.bf16.msra.mxu1 %v3438_v28  ;;  %782 = vmatprep.subr.bf16.mxu0 %v3439_v30 }
  0x20   : > { %3286 = vmatprep.subr.bf16.mxu1 %v3442_v31 }
  0x22   : > { %783 = vmatpush1.bf16.msra.mxu0 %v3441_v33 }
  0x23   : > { %3287 = vmatpush3.bf16.msra.mxu1 %v3442_v31  ;;  %784 = vmatprep.subr.bf16.mxu0 %v3443_v34 }
  0x24   : > { %3288 = vmatprep.subr.bf16.mxu1 %v3446_v35 }
  0x26   : > { %785 = vmatpush1.bf16.msra.mxu0 %v3445_v36 }
  0x27   : > { %3289 = vmatpush3.bf16.msra.mxu1 %v3446_v35  ;;  %786 = vmatprep.subr.bf16.mxu0 %v3447_v37 }
  0x28   : > { %3290 = vmatprep.subr.bf16.mxu1 %v3450_v38 }
  0x2a   : > { %787 = vmatpush1.bf16.msra.mxu0 %v3449_v39 }
  0x2b   : > { %3291 = vmatpush3.bf16.msra.mxu1 %v3450_v38 }
  0x9a   : > { %v542_v6 = vpop.xlane.xlu0 %541  ;;  %v546_v7 = vpop.xlane.xlu1 %545 }
  0x9b   : > { %v548_v8 = vmul.f32 0.0078125, %v542_v6  ;;  %v550_v9 = vmul.f32 0.0078125, %v546_v7 }
  0x9d   : > { %v3784_v10 = vsub.f32 %v536_v0, %v548_v8  ;;  %v3786_v11 = vsub.f32 %v538_v1, %v550_v9  ;;  %v629_v1 = vlaneseq }
  0x9e   : > { %v544_v12 = vpop.xlane.xlu0 %543 }
  0x9f   : > { %v549_v13 = vmul.f32 0.0078125, %v544_v12  ;;  %v554_v14 = vmul.f32 %v3784_v10, %v3784_v10  ;;  %v556_v16 = vmul.f32 %v3786_v11, %v3786_v11 }
  0xa1   : > { %v3790_v15 = vsub.f32 %v537_v2, %v549_v13  ;;  %557 = vadd.xlane.f32.xlu1 %v554_v14  ;;  %v3871_v2 = vshrl.u32 %v629_v1, 7 }
  0xa3   : > { %v555_v17 = vmul.f32 %v3790_v15, %v3790_v15  ;;  %v639_v3 = vsub.s32 2, %v3871_v2  ;;  %v631_v5 = vsub.s32 0, %v3871_v2  ;;  %v635_v6 = vsub.s32 1, %v3871_v2 }
  0xa5   : > { %561 = vadd.xlane.f32.xlu1 %v556_v16  ;;  %559 = vadd.xlane.f32.xlu0 %v555_v17  ;;  %v640_v7 = vrot.slane %v627_v4, %v639_v3  ;;  %v632_v8 = vrot.slane %v627_v4, %v631_v5  ;;  %v636_v9 = vrot.slane %v627_v4, %v635_v6 }
 0x12a   : > { %v558_v40 = vpop.xlane.xlu1 %557 }
 0x12b   : > { %v563_v41 = vmul.f32 0.0078125, %v558_v40 }
 0x12d   : > { %v566_v42 = vadd.f32 1e-06, %v563_v41 }
 0x12e   : > { %v562_v43 = vpop.xlane.xlu1 %561  ;;  %v560_v44 = vpop.xlane.xlu0 %559 }
 0x12f   : > { %3563 = vrsqrt.f32 %v566_v42  ;;  %v565_v45 = vmul.f32 0.0078125, %v562_v43  ;;  %v564_v46 = vmul.f32 0.0078125, %v560_v44 }
 0x131   : > { %v568_v47 = vadd.f32 1e-06, %v565_v45  ;;  %v567_v48 = vadd.f32 1e-06, %v564_v46 }
 0x133   : > { %3565 = vrsqrt.f32 %v568_v47 }
 0x134   : > { %3567 = vrsqrt.f32 %v567_v48 }
 0x13c   : > { %v3564_v49 = vpop.eup %3563 }
 0x13d   : > { %v572_v50 = vmul.f32 %v3564_v49, %v3784_v10 }
 0x13f   : > { %v581_v56 = vmul.f32 %v2987_v51, %v572_v50 }
 0x140   : > { %v3566_v52 = vpop.eup %3565 }
 0x141   : > { %v3568_v53 = vpop.eup %3567  ;;  %v574_v54 = vmul.f32 %v3566_v52, %v3786_v11  ;;  %v590_v61 = vadd.f32 %v2988_v57, %v581_v56 }
 0x142   : > { %v573_v55 = vmul.f32 %v3568_v53, %v3790_v15 }
 0x143   : > { %v583_v58 = vmul.f32 %v2987_v51, %v574_v54 }
 0x144   : > { %v582_v59 = vmul.f32 %v2987_v51, %v573_v55 }
 0x145   : > { %v592_v60 = vadd.f32 %v2988_v57, %v583_v58 }
 0x146   : > { %v591_v62 = vadd.f32 %v2988_v57, %v582_v59  ;;  %v911_v57 = vand.u32 127, %v629_v1  ;;  %v3666_v59 = vmov -1e+30  }
 0x147   : > { %v594_v63 = vpack.c.bf16 %v592_v60, %v592_v60 }
 0x148   : > { %v593_v0 = vpack.c.bf16 %v591_v62, %v590_v61  ;;  %vm912_vm2 = vcmp.lt.s32.totalorder %v911_v57, 17 }
 0x149   : > { %v3904_v60 = vsel %vm912_vm2, 0.0, %v3666_v59 }
 0x14a   : > { %805 = vmatmul.mubr.bf16.vlgmr.msra.gmra.mxu0 %v593_v0  ;;  %3292 = vmatprep.mubr.bf16.mxu1 %v593_v0 }
 0x14b   : > { %3293 = vmatmul.mubr.bf16.vlgmr.msra.gmra.mxu1 %v594_v63  ;;  %814 = vmatprep.mubr.bf16.mxu0 %v3664_v32 }
 0x152   : > { %815 = vmatmul.mubr.bf16.gmra.mxu0 %v594_v63 }
 0x20a   : > { %v806_v10 = vpop.f32.mrf.mxu0 }
 0x20b   : > { %v3294_v11 = vpop.f32.mrf.mxu1  ;;  %v807_v14 = vadd.f32 %v806_v10, %v632_v8 }
 0x20c   : > { %v866_v12 = vadd.f32 %v3294_v11, %v640_v7  ;;  %v808_v13 = vpop.f32.mrf.mxu0 }
 0x20d   : > { %v809_v15 = vadd.f32 %v808_v13, %v636_v9  ;;  %v857_v16 = vpop.f32.mrf.mxu1 }
 0x20e   : > { %v3161_v17 = vpack.c.bf16 %v866_v12, %v866_v12  ;;  %v858_v18 = vadd.f32 %v857_v16, %v640_v7  ;;  %v810_v19 = vpop.f32.mrf.mxu0 }
 0x20f   : > { %v3156_v20 = vpack.c.bf16 %v809_v15, %v807_v14  ;;  %v3295_v21 = vpop.f32.mrf.mxu1  ;;  %v811_v24 = vadd.f32 %v810_v19, %v632_v8 }
 0x210   : > { %909 = vst [vmem:[#allocation2 + $0x20] sm:$0xf] %v3161_v17  ;;  %v3157_v22 = vpack.c.bf16 %v858_v18, %v858_v18  ;;  %v812_v23 = vpop.f32.mrf.mxu0 }
 0x211   : > { %904 = vst [vmem:[#allocation2] sm:$0xff] %v3156_v20  ;;  %v813_v25 = vadd.f32 %v812_v23, %v636_v9  ;;  %v860_v26 = vpop.f32.mrf.mxu1 }
 0x212   : > { %905 = vst [vmem:[#allocation2 + $0x8] sm:$0xf] %v3157_v22  ;;  %v861_v27 = vadd.f32 %v860_v26, %v640_v7  ;;  %v816_v28 = vpop.f32.mrf.mxu0 }
 0x213   : > { %v3158_v29 = vpack.c.bf16 %v813_v25, %v811_v24  ;;  %v817_v33 = vadd.f32 %v816_v28, %v632_v8 }
 0x214   : > { %v3159_v30 = vpack.c.bf16 %v861_v27, %v861_v27  ;;  %v818_v31 = vpop.f32.mrf.mxu0 }
 0x215   : > { %906 = vst [vmem:[#allocation2 + $0xc] sm:$0xff] %v3158_v29  ;;  %v819_v34 = vadd.f32 %v818_v31, %v636_v9 }
 0x216   : > { %907 = vst [vmem:[#allocation2 + $0x14] sm:$0xf] %v3159_v30  ;;  %v820_v35 = vpop.f32.mrf.mxu0 }
 0x217   : > { %v3160_v36 = vpack.c.bf16 %v819_v34, %v817_v33  ;;  %v3451_v37 = vld [vmem:[#allocation2 + $0x20] ss:$0 sps:$4 sm:$0xff]  }
 0x218   : > { %v821_v38 = vpop.f32.mrf.mxu0  ;;  %3394 = vmatprep.subr.msk.bf16.mxu1 %vm1067_vm0, %v3451_v37  ;;  %v1069_v39 = vsel %vm1067_vm0, %v3451_v37, 0 }
 0x219   : > { %908 = vst [vmem:[#allocation2 + $0x18] sm:$0xff] %v3160_v36  ;;  %3305 = vmatpush3.bf16.msra.mxu1 %v1069_v39 }
 0x21c   : > { %v3452_v40 = vld [vmem:[#allocation2 + $0x4] ss:$12 sps:$4 sm:$0xff]   ;;  %v3453_v41 = vld [vmem:[#allocation2] ss:$12 sps:$4 sm:$0xff]  }
 0x21d   : > { %v3454_v42 = vld [vmem:[#allocation2 + $0x8] ss:$12 sps:$4 sm:$0xff]   ;;  %1223 = vrot.lane.b32.xlu1 %v3452_v40, %s3665_s26  ;;  %3300 = vmatprep.mubr.msk.bf16.mxu0 %vm949_vm1, %v3453_v41  ;;  %v3457_v43 = vld [vmem:[#allocation2] ss:$12 sps:$4 sm:$0xff]   ;;  %v3458_v47 = vld [vmem:[#allocation2 + $0x4] ss:$12 sps:$4 sm:$0xff]  }
 0x21e   : > { %3306 = vmatprep.subr.bf16.mxu1 %v3454_v42  ;;  %v957_v49 = vsel %vm949_vm1, %v3458_v47, 0  ;;  %v3461_v28 = vld [vmem:[#allocation2 + $0x4] ss:$12 sps:$4 sm:$0xff]   ;;  %v3462_v29 = vld [vmem:[#allocation2] ss:$12 sps:$4 sm:$0xff]  }
 0x21f   : > { %3307 = vmatpush3.bf16.msra.mxu1 %v3454_v42 }
 0x220   : > { %v3455_v44 = vld [vmem:[#allocation2 + $0x1c] ss:$0 sps:$4 sm:$0xff]   ;;  %v3459_v48 = vld [vmem:[#allocation2 + $0x18] ss:$0 sps:$4 sm:$0xff]  }
 0x221   : > { %v3456_v45 = vld [vmem:[#allocation2 + $0x1c] ss:$0 sps:$4 sm:$0xff]   ;;  %1225 = vrot.lane.b32.xlu0 %v3455_v44, %s3665_s26  ;;  %1211 = vrot.lane.b32.xlu1 %v3457_v43, %s3665_s26  ;;  %v3460_v50 = vld [vmem:[#allocation2 + $0x18] ss:$0 sps:$4 sm:$0xff]  }
 0x222   : > { %3392 = vmatprep.subr.msk.bf16.mxu0 %vm949_vm1, %v3456_v45  ;;  %v960_v46 = vsel %vm949_vm1, %v3456_v45, 0  ;;  %v3463_v30 = vld [vmem:[#allocation2 + $0x1c] ss:$0 sps:$4 sm:$0xff]   ;;  %v3464_v31 = vld [vmem:[#allocation2 + $0x18] ss:$0 sps:$4 sm:$0xff]  }
 0x223   : > { %3297 = vmatpush3.bf16.xpose.msra.mxu0 %v960_v46 }
 0x224   : > { %3393 = vmatprep.subr.msk.bf16.mxu0 %vm949_vm1, %v3458_v47 }
 0x225   : > { %1213 = vrot.lane.b32.xlu1 %v3459_v48, %s3665_s26 }
 0x22b   : > { %3299 = vmatpush3.bf16.xpose.msra.mxu0 %v957_v49 }
 0x232   : > { %3301 = vmatmul.mubr.msk.bf16.vlgmr.msra.gmra.mxu0 %vm949_vm1, %v3460_v50 }
 0x28f   : > { %v1224_v51 = vpop.permute.xlu1 %1223 }
 0x290   : > { %v1234_v55 = vsel %vm949_vm1, %v1224_v51, 0 }
 0x293   : > { %v1226_v52 = vpop.permute.xlu0 %1225  ;;  %v1212_v53 = vpop.permute.xlu1 %1211 }
 0x294   : > { %v1237_v54 = vsel %vm949_vm1, %v1226_v52, 0  ;;  %3395 = vmatprep.subr.msk.bf16.mxu0 %vm949_vm1, %v1226_v52  ;;  %3324 = vmatprep.mubr.msk.bf16.mxu0 %vm949_vm1, %v1212_v53 }
 0x295   : > { %3321 = vmatpush3.bf16.xpose.msra.mxu0 %v1237_v54 }
 0x296   : > { %3396 = vmatprep.subr.msk.bf16.mxu0 %vm949_vm1, %v1224_v51 }
 0x297   : > { %v1214_v56 = vpop.permute.xlu1 %1213 }
 0x29d   : > { %3323 = vmatpush3.bf16.xpose.msra.mxu0 %v1234_v55 }
 0x2a4   : > { %3325 = vmatmul.mubr.msk.bf16.vlgmr.msra.gmra.mxu0 %vm949_vm1, %v1214_v56 }
 0x2f2   : > { %v3302_v58 = vpop.f32.mrf.mxu0 }
 0x2f3   : > { %v1005_v0 = vadd.f32 %v3302_v58, %v3904_v60 }
 0x2f4   : > { %v996_v61 = vpop.f32.mrf.mxu0 }
 0x2f5   : > { %v997_v62 = vadd.f32 %v996_v61, %v3904_v60  ;;  %v1017_v9 = vsel %vm1010_vm3, %v1005_v0, -inf }
 0x2f6   : > { %v3303_v63 = vpop.f32.mrf.mxu0 }
 0x2f7   : > { %v1011_v4 = vsel %vm1010_vm3, %v997_v62, -inf }
 0x2f8   : > { %v999_v7 = vpop.f32.mrf.mxu0  ;;  %1012 = vmax.xlane.f32.xlu0 %v1011_v4 }
 0x2f9   : > { %v1000_v8 = vadd.f32 %v999_v7, %v3904_v60 }
 0x2fb   : > { %v1014_v1 = vsel %vm1010_vm3, %v1000_v8, -inf }
 0x2fc   : > { %1015 = vmax.xlane.f32.xlu1 %v1014_v1  ;;  %1018 = vmax.xlane.f32.xlu0 %v1017_v9 }
 0x364   : > { %v3326_v10 = vpop.f32.mrf.mxu0 }
 0x365   : > { %v1282_v34 = vadd.f32 %v3326_v10, %v3904_v60 }
 0x366   : > { %v1273_v11 = vpop.f32.mrf.mxu0 }
 0x367   : > { %v1274_v33 = vadd.f32 %v1273_v11, %v3904_v60  ;;  %v1293_v37 = vsel %vm1010_vm3, %v1282_v34, -inf }
 0x368   : > { %v3327_v12 = vpop.f32.mrf.mxu0 }
 0x369   : > { %v1287_v35 = vsel %vm1010_vm3, %v1274_v33, -inf }
 0x36a   : > { %v1276_v36 = vpop.f32.mrf.mxu0 }
 0x36b   : > { %v1277_v38 = vadd.f32 %v1276_v36, %v3904_v60 }
 0x36d   : > { %v1290_v39 = vsel %vm1010_vm3, %v1277_v38, -inf }
 0x381   : > { %v1013_v13 = vpop.xlane.xlu0 %1012 }
 0x382   : > { %v1020_v14 = vsub.f32 %v997_v62, %v1013_v13  ;;  %v3471_v13 = vld [vmem:[%s4355_s5 + $0x8] sm:$0xff]  }
 0x383   : > { %3312 = vmatprep.subr.bf16.mxu1 %v3471_v13 }
 0x384   : > { %v1023_v15 = vmul.f32 1.442695, %v1020_v14  ;;  %v3472_v14 = vld [vmem:[%s4355_s5] sm:$0xff]  }
 0x385   : > { %v1016_v16 = vpop.xlane.xlu1 %1015  ;;  %v1019_v17 = vpop.xlane.xlu0 %1018 }
 0x386   : > { %3569 = vpow2.f32 %v1023_v15  ;;  %v1021_v18 = vsub.f32 %v1000_v8, %v1016_v16  ;;  %v1022_v19 = vsub.f32 %v1005_v0, %v1019_v17  ;;  %v3465_v15 = vld [vmem:[#allocation2 + $0x8] ss:$12 sps:$4 sm:$0xff]   ;;  %v3466_v16 = vld [vmem:[#allocation2 + $0x1c] ss:$0 sps:$4 sm:$0xff]   ;;  %v3467_v17 = vld [vmem:[#allocation2 + $0x4] ss:$12 sps:$4 sm:$0xff]  }
 0x388   : > { %v1025_v20 = vmul.f32 1.442695, %v1021_v18  ;;  %v1027_v21 = vmul.f32 1.442695, %v1022_v19  ;;  %v3468_v18 = vld [vmem:[#allocation2 + $0x20] ss:$0 sps:$4 sm:$0xff]  }
 0x389   : > { %v3469_v19 = vld [vmem:[#allocation2 + $0x18] ss:$0 sps:$4 sm:$0xff]  }
 0x38a   : > { %3571 = vpow2.f32 %v1025_v20  ;;  %v3470_v20 = vld [vmem:[#allocation2] ss:$12 sps:$4 sm:$0xff]  }
 0x38b   : > { %3573 = vpow2.f32 %v1027_v21 }
 0x393   : > { %v3570_v22 = vpop.eup %3569 }
 0x394   : > { %v1029_v23 = vsel %vm1010_vm3, %v3570_v22, 0.0 }
 0x395   : > { %1030 = vadd.xlane.f32.xlu0 %v1029_v23 }
 0x397   : > { %v3572_v24 = vpop.eup %3571 }
 0x398   : > { %v3574_v25 = vpop.eup %3573  ;;  %v1032_v26 = vsel %vm1010_vm3, %v3572_v24, 0.0 }
 0x399   : > { %1033 = vadd.xlane.f32.xlu0 %v1032_v26  ;;  %v1035_v27 = vsel %vm1010_vm3, %v3574_v25, 0.0 }
 0x39a   : > { %1036 = vadd.xlane.f32.xlu1 %v1035_v27 }
 0x3ab   : > { %1503 = vrot.lane.b32.xlu1 %v3461_v28, %s3667_s28 }
 0x3af   : > { %1491 = vrot.lane.b32.xlu1 %v3462_v29, %s3667_s28  ;;  %1505 = vrot.lane.b32.xlu0 %v3463_v30, %s3667_s28 }
 0x3b3   : > { %1493 = vrot.lane.b32.xlu1 %v3464_v31, %s3667_s28 }
 0x3ce   : > { %1288 = vmax.xlane.f32.xlu0 %v1287_v35 }
 0x3d2   : > { %1294 = vmax.xlane.f32.xlu0 %v1293_v37 }
 0x3d7   : > { %1291 = vmax.xlane.f32.xlu1 %v1290_v39 }
 0x41e   : > { %v1031_v40 = vpop.xlane.xlu0 %1030 }
 0x41f   : > { %3575 = vrcp.f32 %v1031_v40 }
 0x422   : > { %v1034_v41 = vpop.xlane.xlu0 %1033 }
 0x423   : > { %v1037_v42 = vpop.xlane.xlu1 %1036  ;;  %3577 = vrcp.f32 %v1034_v41 }
 0x424   : > { %3579 = vrcp.f32 %v1037_v42 }
 0x426   : > { %v1506_v43 = vpop.permute.xlu0 %1505 }
 0x427   : > { %v1504_v44 = vpop.permute.xlu1 %1503  ;;  %v1517_v45 = vsel %vm949_vm1, %v1506_v43, 0  ;;  %3398 = vmatprep.subr.msk.bf16.mxu0 %vm949_vm1, %v1506_v43 }
 0x428   : > { %3345 = vmatpush3.bf16.xpose.msra.mxu0 %v1517_v45  ;;  %v1514_v49 = vsel %vm949_vm1, %v1504_v44, 0 }
 0x429   : > { %3399 = vmatprep.subr.msk.bf16.mxu0 %vm949_vm1, %v1504_v44 }
 0x42b   : > { %v1492_v46 = vpop.permute.xlu1 %1491 }
 0x42c   : > { %v3576_v47 = vpop.eup %3575  ;;  %3348 = vmatprep.mubr.msk.bf16.mxu0 %vm949_vm1, %v1492_v46 }
 0x42d   : > { %v1044_v48 = vmul.f32 %v3576_v47, %v3570_v22 }
 0x42f   : > { %1047 = vst.msk [vmem:[%s3932_s17] sm:$0xff] %vm1010_vm3, %v1044_v48  ;;  %v1494_v56 = vpop.permute.xlu1 %1493 }
 0x430   : > { %v3578_v50 = vpop.eup %3577  ;;  %3347 = vmatpush3.bf16.xpose.msra.mxu0 %v1514_v49 }
 0x431   : > { %v3580_v51 = vpop.eup %3579  ;;  %v1045_v52 = vmul.f32 %v3578_v50, %v3572_v24 }
 0x432   : > { %v1046_v53 = vmul.f32 %v3580_v51, %v3574_v25 }
 0x433   : > { %1048 = vst.msk [vmem:[%s3932_s17 + $0x8] sm:$0xff] %vm1010_vm3, %v1045_v52  ;;  %v1050_v54 = vpack.c.bf16 %v1045_v52, %v1044_v48 }
 0x434   : > { %1049 = vst.msk [vmem:[%s3932_s17 + $0x10] sm:$0xff] %vm1010_vm3, %v1046_v53  ;;  %v1051_v55 = vpack.c.bf16 %v1046_v53, %v1046_v53 }
 0x435   : > { %3308 = vmatprep.mubr.msk.bf16.mxu1 %vm1010_vm3, %v1050_v54 }
 0x436   : > { %3309 = vmatmul.mubr.msk.bf16.vlgmr.msra.gmra.mxu1 %vm1010_vm3, %v1051_v55 }
 0x437   : > { %3349 = vmatmul.mubr.msk.bf16.vlgmr.msra.gmra.mxu0 %vm949_vm1, %v1494_v56  ;;  %3313 = vmatpush3.bf16.msra.mxu1 %v3471_v13 }
 0x438   : > { %3314 = vmatprep.subr.bf16.mxu1 %v3472_v14 }
 0x43b   : > { %3315 = vmatpush3.bf16.msra.mxu1 %v3472_v14 }
 0x457   : > { %v1289_v57 = vpop.xlane.xlu0 %1288 }
 0x458   : > { %v1296_v58 = vsub.f32 %v1274_v33, %v1289_v57 }
 0x45a   : > { %v1299_v59 = vmul.f32 1.442695, %v1296_v58  ;;  %v3475_v58 = vld [vmem:[%s4355_s5 + $0x18] sm:$0xff]  }
 0x45b   : > { %v1295_v61 = vpop.xlane.xlu0 %1294 }
 0x45c   : > { %3581 = vpow2.f32 %v1299_v59  ;;  %v1298_v62 = vsub.f32 %v1282_v34, %v1295_v61  ;;  %v3476_v59 = vld [vmem:[%s4355_s5 + $0x10] sm:$0xff]  }
 0x45e   : > { %v1303_v63 = vmul.f32 1.442695, %v1298_v62 }
 0x460   : > { %3583 = vpow2.f32 %v1303_v63  ;;  %v1292_v0 = vpop.xlane.xlu1 %1291 }
 0x461   : > { %v1297_v4 = vsub.f32 %v1277_v38, %v1292_v0 }
 0x463   : > { %v1301_v7 = vmul.f32 1.442695, %v1297_v4 }
 0x465   : > { %3585 = vpow2.f32 %v1301_v7 }
 0x469   : > { %v3945_v8 = vpop.eup %3581 }
 0x46a   : > { %v1305_v1 = vsel %vm1010_vm3, %v3945_v8, 0.0 }
 0x46b   : > { %1306 = vadd.xlane.f32.xlu0 %v1305_v1 }
 0x46d   : > { %v3949_v9 = vpop.eup %3583 }
 0x46e   : > { %v1311_v10 = vsel %vm1010_vm3, %v3949_v9, 0.0 }
 0x46f   : > { %1312 = vadd.xlane.f32.xlu1 %v1311_v10 }
 0x472   : > { %v3953_v11 = vpop.eup %3585 }
 0x473   : > { %v1308_v12 = vsel %vm1010_vm3, %v3953_v11, 0.0 }
 0x474   : > { %1309 = vadd.xlane.f32.xlu0 %v1308_v12 }
 0x480   : > { %1337 = vrot.lane.b32.xlu1 %v3465_v15, %s3665_s26 }
 0x484   : > { %1785 = vrot.lane.b32.xlu1 %v3466_v16, %s3668_s25  ;;  %v3473_v16 = vld [vmem:[#allocation2 + $0x8] ss:$12 sps:$4 sm:$0xff]  }
 0x488   : > { %1783 = vrot.lane.b32.xlu1 %v3467_v17, %s3668_s25  ;;  %v3474_v17 = vld [vmem:[#allocation2 + $0x20] ss:$0 sps:$4 sm:$0xff]  }
 0x48a   : > { %1339 = vrot.lane.b32.xlu0 %v3468_v18, %s3665_s26 }
 0x48c   : > { %1773 = vrot.lane.b32.xlu1 %v3469_v19, %s3668_s25 }
 0x48e   : > { %1771 = vrot.lane.b32.xlu0 %v3470_v20, %s3668_s25 }
 0x4f4   : > { %v1307_v21 = vpop.xlane.xlu0 %1306 }
 0x4f5   : > { %3587 = vrcp.f32 %v1307_v21 }
 0x4f6   : > { %v3310_v22 = vpop.f32.mrf.mxu1 }
 0x4f7   : > { %v3350_v23 = vpop.f32.mrf.mxu0  ;;  %v1120_v38 = vpack.c.bf16 %v3310_v22, %v3310_v22 }
 0x4f8   : > { %v1105_v24 = vpop.f32.mrf.mxu1  ;;  %v1313_v25 = vpop.xlane.xlu1 %1312  ;;  %v3971_v30 = vadd.f32 %v3350_v23, %v3904_v60 }
 0x4f9   : > { %3589 = vrcp.f32 %v1313_v25  ;;  %v1553_v26 = vpop.f32.mrf.mxu0 }
 0x4fa   : > { %v1554_v27 = vadd.f32 %v1553_v26, %v3904_v60  ;;  %v3311_v28 = vpop.f32.mrf.mxu1  ;;  %v1573_v41 = vsel %vm1010_vm3, %v3971_v30, -inf }
 0x4fb   : > { %v3351_v29 = vpop.f32.mrf.mxu0 }
 0x4fc   : > { %v1108_v31 = vpop.f32.mrf.mxu1  ;;  %v1338_v33 = vpop.permute.xlu1 %1337  ;;  %v1567_v34 = vsel %vm1010_vm3, %v1554_v27, -inf }
 0x4fd   : > { %v1119_v35 = vpack.c.bf16 %v1108_v31, %v1105_v24  ;;  %v1310_v36 = vpop.xlane.xlu0 %1309  ;;  %v1556_v37 = vpop.f32.mrf.mxu0  ;;  %1568 = vmax.xlane.f32.xlu0 %v1567_v34 }
 0x4fe   : > { %3591 = vrcp.f32 %v1310_v36  ;;  %v1557_v39 = vadd.f32 %v1556_v37, %v3904_v60 }
 0x4ff   : > { %3316 = vmatprep.mubr.msk.bf16.mxu1 %vm949_vm1, %v1119_v35 }
 0x500   : > { %3317 = vmatmul.mubr.msk.bf16.vlgmr.msra.gmra.mxu1 %vm949_vm1, %v1120_v38  ;;  %v1786_v40 = vpop.permute.xlu1 %1785  ;;  %v1570_v42 = vsel %vm1010_vm3, %v1557_v39, -inf }
 0x501   : > { %v1797_v43 = vsel %vm949_vm1, %v1786_v40, 0  ;;  %v1340_v44 = vpop.permute.xlu0 %1339  ;;  %1574 = vmax.xlane.f32.xlu0 %v1573_v41  ;;  %1571 = vmax.xlane.f32.xlu1 %v1570_v42 }
 0x502   : > { %v3588_v45 = vpop.eup %3587  ;;  %v1349_v46 = vsel %vm1067_vm0, %v1340_v44, 0  ;;  %3397 = vmatprep.subr.msk.bf16.mxu1 %vm1067_vm0, %v1340_v44  ;;  %3401 = vmatprep.subr.msk.bf16.mxu0 %vm949_vm1, %v1786_v40 }
 0x503   : > { %3329 = vmatpush3.bf16.msra.mxu1 %v1349_v46  ;;  %3369 = vmatpush3.bf16.xpose.msra.mxu0 %v1797_v43  ;;  %v1320_v47 = vmul.f32 %v3588_v45, %v3945_v8 }
 0x504   : > { %3330 = vmatprep.subr.bf16.mxu1 %v1338_v33  ;;  %v1784_v48 = vpop.permute.xlu1 %1783 }
 0x505   : > { %v1772_v49 = vpop.permute.xlu0 %1771  ;;  %3402 = vmatprep.subr.msk.bf16.mxu0 %vm949_vm1, %v1784_v48  ;;  %3040 = vst.msk [vmem:[%s3932_s17 + $0x18] sm:$0xff] %vm1010_vm3, %v1320_v47  ;;  %v1794_v52 = vsel %vm949_vm1, %v1784_v48, 0 }
 0x506   : > { %v3590_v50 = vpop.eup %3589  ;;  %3372 = vmatprep.mubr.msk.bf16.mxu0 %vm949_vm1, %v1772_v49 }
 0x507   : > { %3331 = vmatpush3.bf16.msra.mxu1 %v1338_v33  ;;  %v1322_v51 = vmul.f32 %v3590_v50, %v3949_v9 }
 0x508   : > { %v1774_v57 = vpop.permute.xlu1 %1773  ;;  %3336 = vmatprep.subr.bf16.mxu1 %v3475_v58 }
 0x509   : > { %3042 = vst.msk [vmem:[%s3932_s17 + $0x28] sm:$0xff] %vm1010_vm3, %v1322_v51  ;;  %v1328_v56 = vpack.c.bf16 %v1322_v51, %v1322_v51 }
 0x50b   : > { %v3592_v53 = vpop.eup %3591  ;;  %3371 = vmatpush3.bf16.xpose.msra.mxu0 %v1794_v52 }
 0x50c   : > { %v1321_v54 = vmul.f32 %v3592_v53, %v3953_v11 }
 0x50e   : > { %3041 = vst.msk [vmem:[%s3932_s17 + $0x20] sm:$0xff] %vm1010_vm3, %v1321_v54  ;;  %v1327_v55 = vpack.c.bf16 %v1321_v54, %v1320_v47 }
 0x510   : > { %3332 = vmatprep.mubr.msk.bf16.mxu1 %vm1010_vm3, %v1327_v55 }
 0x511   : > { %3333 = vmatmul.mubr.msk.bf16.vlgmr.msra.gmra.mxu1 %vm1010_vm3, %v1328_v56 }
 0x512   : > { %3373 = vmatmul.mubr.msk.bf16.vlgmr.msra.gmra.mxu0 %vm949_vm1, %v1774_v57  ;;  %3337 = vmatpush3.bf16.msra.mxu1 %v3475_v58 }
 0x513   : > { %2335 = vmatprep.mubr.bf16.mxu0 %v3664_v32  ;;  %3338 = vmatprep.subr.bf16.mxu1 %v3476_v59 }
 0x516   : > { %3339 = vmatpush3.bf16.msra.mxu1 %v3476_v59 }
 0x586   : > { %v1569_v61 = vpop.xlane.xlu0 %1568 }
 0x587   : > { %v1576_v62 = vsub.f32 %v1554_v27, %v1569_v61 }
 0x589   : > { %v1579_v63 = vmul.f32 1.442695, %v1576_v62 }
 0x58a   : > { %v1572_v0 = vpop.xlane.xlu1 %1571  ;;  %v1575_v4 = vpop.xlane.xlu0 %1574 }
 0x58b   : > { %3593 = vpow2.f32 %v1579_v63  ;;  %v1577_v7 = vsub.f32 %v1557_v39, %v1572_v0  ;;  %v1578_v8 = vsub.f32 %v3971_v30, %v1575_v4 }
 0x58d   : > { %v1581_v1 = vmul.f32 1.442695, %v1577_v7  ;;  %v1583_v9 = vmul.f32 1.442695, %v1578_v8  ;;  %v3479_v8 = vld [vmem:[%s4355_s5 + $0x28] sm:$0xff]  }
 0x58f   : > { %3595 = vpow2.f32 %v1581_v1 }
 0x590   : > { %3597 = vpow2.f32 %v1583_v9  ;;  %v3480_v9 = vld [vmem:[%s4355_s5 + $0x20] sm:$0xff]  }
 0x598   : > { %v3594_v10 = vpop.eup %3593 }
 0x599   : > { %v1585_v11 = vsel %vm1010_vm3, %v3594_v10, 0.0 }
 0x59a   : > { %1586 = vadd.xlane.f32.xlu0 %v1585_v11  ;;  %v3478_v11 = vld [vmem:[#allocation2 + $0x8] ss:$12 sps:$4 sm:$0xff]  }
 0x59c   : > { %v3596_v12 = vpop.eup %3595 }
 0x59d   : > { %v3598_v13 = vpop.eup %3597  ;;  %v1588_v14 = vsel %vm1010_vm3, %v3596_v12, 0.0 }
 0x59e   : > { %1589 = vadd.xlane.f32.xlu0 %v1588_v14  ;;  %v1591_v15 = vsel %vm1010_vm3, %v3598_v13, 0.0 }
 0x59f   : > { %1592 = vadd.xlane.f32.xlu1 %v1591_v15  ;;  %v3654_v15 = vld [vmem:[%s3770_s27] sm:$0xff] }
 0x5b0   : > { %1617 = vrot.lane.b32.xlu1 %v3473_v16, %s3667_s28 }
 0x5b4   : > { %1619 = vrot.lane.b32.xlu0 %v3474_v17, %s3667_s28 }
 0x5c0   : > { %v4012_v18 = vpop.f32.mrf.mxu1 }
 0x5c2   : > { %v4014_v19 = vpop.f32.mrf.mxu1 }
 0x5c4   : > { %v3319_v20 = vpop.f32.mrf.mxu1 }
 0x5c6   : > { %v4016_v21 = vpop.f32.mrf.mxu1 }
 0x5d1   : > { %v3334_v22 = vpop.f32.mrf.mxu1 }
 0x5d2   : > { %v3374_v23 = vpop.f32.mrf.mxu0  ;;  %v1400_v34 = vpack.c.bf16 %v3334_v22, %v3334_v22 }
 0x5d3   : > { %v1385_v24 = vpop.f32.mrf.mxu1  ;;  %v1842_v36 = vadd.f32 %v3374_v23, %v3904_v60 }
 0x5d4   : > { %v1833_v25 = vpop.f32.mrf.mxu0 }
 0x5d5   : > { %v1834_v26 = vadd.f32 %v1833_v25, %v3904_v60  ;;  %v3335_v27 = vpop.f32.mrf.mxu1  ;;  %v1853_v38 = vsel %vm1010_vm3, %v1842_v36, -inf }
 0x5d6   : > { %v3375_v28 = vpop.f32.mrf.mxu0 }
 0x5d7   : > { %v1388_v29 = vpop.f32.mrf.mxu1  ;;  %v1847_v30 = vsel %vm1010_vm3, %v1834_v26, -inf }
 0x5d8   : > { %v1399_v31 = vpack.c.bf16 %v1388_v29, %v1385_v24  ;;  %v1836_v33 = vpop.f32.mrf.mxu0  ;;  %1848 = vmax.xlane.f32.xlu1 %v1847_v30 }
 0x5d9   : > { %v1837_v35 = vadd.f32 %v1836_v33, %v3904_v60 }
 0x5da   : > { %3340 = vmatprep.mubr.msk.bf16.mxu1 %vm949_vm1, %v1399_v31 }
 0x5db   : > { %3341 = vmatmul.mubr.msk.bf16.vlgmr.msra.gmra.mxu1 %vm949_vm1, %v1400_v34  ;;  %v1850_v37 = vsel %vm1010_vm3, %v1837_v35, -inf }
 0x5dc   : > { %1851 = vmax.xlane.f32.xlu0 %v1850_v37 }
 0x5e0   : > { %1854 = vmax.xlane.f32.xlu0 %v1853_v38 }
 0x623   : > { %v1587_v39 = vpop.xlane.xlu0 %1586 }
 0x624   : > { %3599 = vrcp.f32 %v1587_v39 }
 0x627   : > { %v1590_v40 = vpop.xlane.xlu0 %1589 }
 0x628   : > { %v1593_v41 = vpop.xlane.xlu1 %1592  ;;  %3601 = vrcp.f32 %v1590_v40 }
 0x629   : > { %3603 = vrcp.f32 %v1593_v41 }
 0x62b   : > { %v1620_v42 = vpop.permute.xlu0 %1619 }
 0x62c   : > { %v1629_v60 = vsel %vm1067_vm0, %v1620_v42, 0  ;;  %3400 = vmatprep.subr.msk.bf16.mxu1 %vm1067_vm0, %v1620_v42  ;;  %v1618_v43 = vpop.permute.xlu1 %1617 }
 0x62d   : > { %3353 = vmatpush3.bf16.msra.mxu1 %v1629_v60 }
 0x62e   : > { %3354 = vmatprep.subr.bf16.mxu1 %v1618_v43 }
 0x631   : > { %v3600_v44 = vpop.eup %3599  ;;  %3355 = vmatpush3.bf16.msra.mxu1 %v1618_v43 }
 0x632   : > { %v1600_v45 = vmul.f32 %v3600_v44, %v3594_v10  ;;  %3360 = vmatprep.subr.bf16.mxu1 %v3479_v8  ;;  %v3477_v10 = vld [vmem:[#allocation2 + $0x20] ss:$0 sps:$4 sm:$0xff]  }
 0x634   : > { %3057 = vst.msk [vmem:[%s3932_s17 + $0x30] sm:$0xff] %vm1010_vm3, %v1600_v45 }
 0x635   : > { %v3602_v46 = vpop.eup %3601 }
 0x636   : > { %v3604_v47 = vpop.eup %3603  ;;  %v1601_v48 = vmul.f32 %v3602_v46, %v3596_v12  ;;  %v3019_v12 = vld [vmem:[%s4356_s6] ss:$0 sm:$0xff]  ;;  %v3481_v46 = vld [vmem:[%s4355_s5 + $0x38] sm:$0xff]  }
 0x637   : > { %v1602_v49 = vmul.f32 %v3604_v47, %v3598_v13  ;;  %v3653_v13 = vld [vmem:[%s3770_s27 + $0x10] sm:$0xff]  ;;  %v921_v16 = vadd.f32 %v3654_v15, %v3019_v12  ;;  %v3488_v15 = vld [vmem:[%s4359_s9 + $0xec] ss:$16 sps:$4 sm:$0xff]  }
 0x638   : > { %3058 = vst.msk [vmem:[%s3932_s17 + $0x38] sm:$0xff] %vm1010_vm3, %v1601_v48  ;;  %v1607_v50 = vpack.c.bf16 %v1601_v48, %v1600_v45  ;;  %v923_v14 = vadd.f32 %v3653_v13, %v3019_v12  ;;  %v3482_v47 = vld [vmem:[%s4355_s5 + $0x30] sm:$0xff]   ;;  %v3655_v48 = vld [vmem:[%s3770_s27 + $0x8] sm:$0xff] }
 0x639   : > { %3059 = vst.msk [vmem:[%s3932_s17 + $0x40] sm:$0xff] %vm1010_vm3, %v1602_v49  ;;  %v1608_v51 = vpack.c.bf16 %v1602_v49, %v1602_v49  ;;  %v1191_v22 = vadd.f32 %v4014_v19, %v921_v16  ;;  %v922_v49 = vadd.f32 %v3655_v48, %v3019_v12  ;;  %v3483_v12 = vld [vmem:[%s4359_s9 + $0xe0] ss:$16 sps:$4 sm:$0xff]   ;;  %v3485_v13 = vld [vmem:[%s4359_s9 + $0xe4] ss:$16 sps:$4 sm:$0xff]  }
 0x63a   : > { %3356 = vmatprep.mubr.msk.bf16.mxu1 %vm1010_vm3, %v1607_v50  ;;  %v1193_v17 = vadd.f32 %v4012_v18, %v923_v14  ;;  %v3486_v14 = vld [vmem:[%s4359_s9 + $0xe8] ss:$16 sps:$4 sm:$0xff]   ;;  %2303 = vmatprep.subr.bf16.mxu0 %v3485_v13 }
 0x63b   : > { %3357 = vmatmul.mubr.msk.bf16.vlgmr.msra.gmra.mxu1 %vm1010_vm3, %v1608_v51  ;;  %2304 = vmatpush1.bf16.msra.mxu0 %v3483_v12  ;;  %v3516_v48 = vld [vmem:[%s4359_s9 + $0x48] ss:$16 sps:$4 sm:$0xff]  }
 0x63c   : > { %3361 = vmatpush3.bf16.msra.mxu1 %v3479_v8 }
 0x63d   : > { %3362 = vmatprep.subr.bf16.mxu1 %v3480_v9 }
 0x640   : > { %3363 = vmatpush3.bf16.msra.mxu1 %v3480_v9 }
 0x661   : > { %v1849_v52 = vpop.xlane.xlu1 %1848 }
 0x662   : > { %v1856_v55 = vsub.f32 %v1834_v26, %v1849_v52 }
 0x664   : > { %v1859_v59 = vmul.f32 1.442695, %v1856_v55 }
 0x665   : > { %v1852_v53 = vpop.xlane.xlu0 %1851 }
 0x666   : > { %v1857_v54 = vsub.f32 %v1837_v35, %v1852_v53  ;;  %v1192_v53 = vadd.f32 %v4016_v21, %v922_v49  ;;  %v3521_v49 = vld [vmem:[%s4359_s9 + $0x24] ss:$16 sps:$4 sm:$0xff]  }
 0x668   : > { %v1861_v56 = vmul.f32 1.442695, %v1857_v54 }
 0x669   : > { %v1855_v57 = vpop.xlane.xlu0 %1854 }
 0x66a   : > { %3605 = vpow2.f32 %v1861_v56  ;;  %v1858_v58 = vsub.f32 %v1842_v36, %v1855_v57 }
 0x66c   : > { %v1863_v61 = vmul.f32 1.442695, %v1858_v58 }
 0x66e   : > { %3607 = vpow2.f32 %v1863_v61 }
 0x66f   : > { %3609 = vpow2.f32 %v1859_v59 }
 0x677   : > { %v3606_v62 = vpop.eup %3605 }
 0x678   : > { %v1868_v63 = vsel %vm1010_vm3, %v3606_v62, 0.0 }
 0x679   : > { %1869 = vadd.xlane.f32.xlu0 %v1868_v63 }
 0x67b   : > { %v3608_v0 = vpop.eup %3607 }
 0x67c   : > { %v1871_v4 = vsel %vm1010_vm3, %v3608_v0, 0.0  ;;  %v3610_v7 = vpop.eup %3609 }
 0x67d   : > { %1872 = vadd.xlane.f32.xlu1 %v1871_v4  ;;  %v1865_v1 = vsel %vm1010_vm3, %v3610_v7, 0.0 }
 0x681   : > { %1866 = vadd.xlane.f32.xlu1 %v1865_v1 }
 0x68f   : > { %1899 = vrot.lane.b32.xlu0 %v3477_v10, %s3668_s25 }
 0x692   : > { %1897 = vrot.lane.b32.xlu1 %v3478_v11, %s3668_s25 }
 0x69b   : > { %v3342_v20 = vpop.f32.mrf.mxu1 }
 0x69c   : > { %v1473_v23 = vadd.f32 %v3342_v20, %v1193_v17 }
 0x69d   : > { %v1457_v24 = vpop.f32.mrf.mxu1 }
 0x69e   : > { %v1471_v25 = vadd.f32 %v1457_v24, %v1191_v22 }
 0x69f   : > { %v3343_v26 = vpop.f32.mrf.mxu1 }
 0x6a1   : > { %v1460_v27 = vpop.f32.mrf.mxu1 }
 0x6a2   : > { %v1472_v56 = vadd.f32 %v1460_v27, %v1192_v53  ;;  %v3527_v53 = vld [vmem:[%s4359_s9 + $0x4] ss:$16 sps:$4 sm:$0xff]  }
 0x6fb   : > { %v3358_v28 = vpop.f32.mrf.mxu1 }
 0x6fc   : > { %v1680_v35 = vpack.c.bf16 %v3358_v28, %v3358_v28 }
 0x6fd   : > { %v1665_v29 = vpop.f32.mrf.mxu1 }
 0x6ff   : > { %v3359_v30 = vpop.f32.mrf.mxu1 }
 0x701   : > { %v1668_v31 = vpop.f32.mrf.mxu1 }
 0x702   : > { %v1679_v33 = vpack.c.bf16 %v1668_v31, %v1665_v29  ;;  %v1870_v34 = vpop.xlane.xlu0 %1869  ;;  %v3489_v31 = vld [vmem:[%s4359_s9 + $0xc0] ss:$16 sps:$4 sm:$0xff]  }
 0x703   : > { %3611 = vrcp.f32 %v1870_v34  ;;  %v3492_v34 = vld [vmem:[%s4359_s9 + $0xc8] ss:$16 sps:$4 sm:$0xff]  }
 0x704   : > { %3364 = vmatprep.mubr.msk.bf16.mxu1 %vm949_vm1, %v1679_v33  ;;  %v3491_v33 = vld [vmem:[%s4359_s9 + $0xc4] ss:$16 sps:$4 sm:$0xff]  }
 0x705   : > { %3365 = vmatmul.mubr.msk.bf16.vlgmr.msra.gmra.mxu1 %vm949_vm1, %v1680_v35  ;;  %v3494_v35 = vld [vmem:[%s4359_s9 + $0xcc] ss:$16 sps:$4 sm:$0xff]   ;;  %2305 = vmatprep.subr.bf16.mxu0 %v3491_v33  ;;  %v3536_v33 = vld [vmem:[%s4361_s11 + $0xf0] sm:$0xff]  }
 0x706   : > { %v1873_v18 = vpop.xlane.xlu1 %1872  ;;  %v1900_v19 = vpop.permute.xlu0 %1899  ;;  %2306 = vmatpush1.bf16.msra.mxu0 %v3489_v31  ;;  %v3535_v31 = vld [vmem:[%s4361_s11 + $0x70] sm:$0xff]  }
 0x707   : > { %3613 = vrcp.f32 %v1873_v18  ;;  %v1909_v36 = vsel %vm1067_vm0, %v1900_v19, 0  ;;  %3403 = vmatprep.subr.msk.bf16.mxu1 %vm1067_vm0, %v1900_v19  ;;  %v3495_v18 = vld [vmem:[%s4359_s9 + $0xa0] ss:$16 sps:$4 sm:$0xff]   ;;  %v3497_v19 = vld [vmem:[%s4359_s9 + $0xa4] ss:$16 sps:$4 sm:$0xff]  }
 0x708   : > { %3377 = vmatpush3.bf16.msra.mxu1 %v1909_v36  ;;  %v3498_v36 = vld [vmem:[%s4359_s9 + $0xa8] ss:$16 sps:$4 sm:$0xff]   ;;  %2307 = vmatprep.subr.bf16.mxu0 %v3497_v19 }
 0x709   : > { %v3540_v19 = vld [vmem:[%s4361_s11 + $0xe8] sm:$0xff]  }
 0x70a   : > { %v1867_v37 = vpop.xlane.xlu1 %1866  ;;  %2308 = vmatpush1.bf16.msra.mxu0 %v3495_v18  ;;  %v3539_v18 = vld [vmem:[%s4361_s11 + $0x68] sm:$0xff]  }
 0x70b   : > { %3615 = vrcp.f32 %v1867_v37  ;;  %v3500_v37 = vld [vmem:[%s4359_s9 + $0xac] ss:$16 sps:$4 sm:$0xff]  }
 0x70e   : > { %v1898_v38 = vpop.permute.xlu1 %1897 }
 0x70f   : > { %3378 = vmatprep.subr.bf16.mxu1 %v1898_v38 }
 0x710   : > { %v3612_v39 = vpop.eup %3611  ;;  %3379 = vmatpush3.bf16.msra.mxu1 %v1898_v38  ;;  %v3501_v38 = vld [vmem:[%s4359_s9 + $0x80] ss:$16 sps:$4 sm:$0xff]  }
 0x711   : > { %v1881_v40 = vmul.f32 %v3612_v39, %v3606_v62  ;;  %3384 = vmatprep.subr.bf16.mxu1 %v3481_v46  ;;  %v3503_v39 = vld [vmem:[%s4359_s9 + $0x84] ss:$16 sps:$4 sm:$0xff]  }
 0x712   : > { %2309 = vmatprep.subr.bf16.mxu0 %v3503_v39  ;;  %v3544_v39 = vld [vmem:[%s4361_s11 + $0xe0] sm:$0xff]  }
 0x713   : > { %3075 = vst.msk [vmem:[%s3932_s17 + $0x50] sm:$0xff] %vm1010_vm3, %v1881_v40  ;;  %2310 = vmatpush1.bf16.msra.mxu0 %v3501_v38  ;;  %v3543_v38 = vld [vmem:[%s4361_s11 + $0x60] sm:$0xff]  }
 0x714   : > { %v3614_v41 = vpop.eup %3613 }
 0x715   : > { %v1882_v42 = vmul.f32 %v3614_v41, %v3608_v0  ;;  %v3506_v41 = vld [vmem:[%s4359_s9 + $0x8c] ss:$16 sps:$4 sm:$0xff]  }
 0x717   : > { %3076 = vst.msk [vmem:[%s3932_s17 + $0x58] sm:$0xff] %vm1010_vm3, %v1882_v42  ;;  %v1888_v45 = vpack.c.bf16 %v1882_v42, %v1882_v42  ;;  %v3509_v42 = vld [vmem:[%s4359_s9 + $0x64] ss:$16 sps:$4 sm:$0xff]  }
 0x718   : > { %v3616_v60 = vpop.eup %3615  ;;  %2311 = vmatprep.subr.bf16.mxu0 %v3509_v42  ;;  %v3547_v42 = vld [vmem:[%s4361_s11 + $0x58] sm:$0xff]  }
 0x719   : > { %v1880_v43 = vmul.f32 %v3616_v60, %v3610_v7  ;;  %v3512_v60 = vld [vmem:[%s4359_s9 + $0x6c] ss:$16 sps:$4 sm:$0xff]  }
 0x71b   : > { %3074 = vst.msk [vmem:[%s3932_s17 + $0x48] sm:$0xff] %vm1010_vm3, %v1880_v43  ;;  %v1887_v44 = vpack.c.bf16 %v1881_v40, %v1880_v43  ;;  %v3504_v40 = vld [vmem:[%s4359_s9 + $0x88] ss:$16 sps:$4 sm:$0xff]   ;;  %v3507_v43 = vld [vmem:[%s4359_s9 + $0x60] ss:$16 sps:$4 sm:$0xff]  }
 0x71c   : > { %2312 = vmatpush1.bf16.msra.mxu0 %v3507_v43  ;;  %v3549_v43 = vld [vmem:[%s4361_s11 + $0x18] sm:$0xff]  }
 0x71d   : > { %3380 = vmatprep.mubr.msk.bf16.mxu1 %vm1010_vm3, %v1887_v44  ;;  %v3510_v44 = vld [vmem:[%s4359_s9 + $0x68] ss:$16 sps:$4 sm:$0xff]  }
 0x71e   : > { %3381 = vmatmul.mubr.msk.bf16.vlgmr.msra.gmra.mxu1 %vm1010_vm3, %v1888_v45  ;;  %v3515_v45 = vld [vmem:[%s4359_s9 + $0x44] ss:$16 sps:$4 sm:$0xff]  }
 0x71f   : > { %3385 = vmatpush3.bf16.msra.mxu1 %v3481_v46  ;;  %v3518_v46 = vld [vmem:[%s4359_s9 + $0x4c] ss:$16 sps:$4 sm:$0xff]   ;;  %2313 = vmatprep.subr.bf16.mxu0 %v3515_v45  ;;  %v3551_v45 = vld [vmem:[%s4361_s11 + $0x50] sm:$0xff]  }
 0x720   : > { %3386 = vmatprep.subr.bf16.mxu1 %v3482_v47 }
 0x723   : > { %3387 = vmatpush3.bf16.msra.mxu1 %v3482_v47  ;;  %v3513_v47 = vld [vmem:[%s4359_s9 + $0x40] ss:$16 sps:$4 sm:$0xff]  }
 0x724   : > { %2354 = vmatprep.subr.bf16.mxu1 %v3488_v15  ;;  %2314 = vmatpush1.bf16.msra.mxu0 %v3513_v47  ;;  %v3086_v15 = vld [vmem:[%s4358_s8] ss:$0 sm:$0xff]  ;;  %v3553_v47 = vld [vmem:[%s4361_s11 + $0x10] sm:$0xff]  }
 0x725   : > { %2315 = vmatprep.subr.bf16.mxu0 %v3521_v49  ;;  %v3555_v49 = vld [vmem:[%s4361_s11 + $0x48] sm:$0xff]  }
 0x7c5   : > { %v3366_v50 = vpop.f32.mrf.mxu1 }
 0x7c6   : > { %v1753_v51 = vadd.f32 %v3366_v50, %v1473_v23  ;;  %v3524_v50 = vld [vmem:[%s4359_s9 + $0x2c] ss:$16 sps:$4 sm:$0xff]  }
 0x7c7   : > { %v1737_v52 = vpop.f32.mrf.mxu1 }
 0x7c8   : > { %v1751_v54 = vadd.f32 %v1737_v52, %v1471_v25  ;;  %v3522_v52 = vld [vmem:[%s4359_s9 + $0x28] ss:$16 sps:$4 sm:$0xff]  }
 0x7c9   : > { %v3367_v55 = vpop.f32.mrf.mxu1 }
 0x7ca   : > { %v3525_v55 = vld [vmem:[%s4359_s9] ss:$16 sps:$4 sm:$0xff]  }
 0x7cb   : > { %v1740_v57 = vpop.f32.mrf.mxu1 }
 0x7cc   : > { %v1752_v58 = vadd.f32 %v1740_v57, %v1472_v56  ;;  %v3528_v56 = vld [vmem:[%s4359_s9 + $0x8] ss:$16 sps:$4 sm:$0xff]  }
 0x7de   : > { %v3382_v59 = vpop.f32.mrf.mxu1 }
 0x7df   : > { %v1960_v4 = vpack.c.bf16 %v3382_v59, %v3382_v59 }
 0x7e0   : > { %v1945_v61 = vpop.f32.mrf.mxu1 }
 0x7e2   : > { %v3383_v62 = vpop.f32.mrf.mxu1 }
 0x7e4   : > { %v1948_v63 = vpop.f32.mrf.mxu1 }
 0x7e5   : > { %v1959_v0 = vpack.c.bf16 %v1948_v63, %v1945_v61 }
 0x7e7   : > { %3388 = vmatprep.mubr.msk.bf16.mxu1 %vm949_vm1, %v1959_v0 }
 0x7e8   : > { %3389 = vmatmul.mubr.msk.bf16.vlgmr.msra.gmra.mxu1 %vm949_vm1, %v1960_v4 }
 0x7e9   : > { %2386 = vmatprep.mubr.bf16.mxu1 %v3664_v32  ;;  %2355 = vmatpush1.bf16.msra.mxu1 %v3486_v14 }
 0x7ea   : > { %2356 = vmatprep.subr.bf16.mxu1 %v3494_v35  ;;  %v3538_v35 = vld [vmem:[%s4361_s11 + $0xb0] sm:$0xff]  }
 0x7ed   : > { %2357 = vmatpush1.bf16.msra.mxu1 %v3492_v34  ;;  %v3537_v34 = vld [vmem:[%s4361_s11 + $0x30] sm:$0xff]  }
 0x7ee   : > { %2358 = vmatprep.subr.bf16.mxu1 %v3500_v37  ;;  %v3542_v37 = vld [vmem:[%s4361_s11 + $0xa8] sm:$0xff]  }
 0x7f1   : > { %2359 = vmatpush1.bf16.msra.mxu1 %v3498_v36  ;;  %v3541_v36 = vld [vmem:[%s4361_s11 + $0x28] sm:$0xff]  }
 0x7f2   : > { %2360 = vmatprep.subr.bf16.mxu1 %v3506_v41  ;;  %v3546_v41 = vld [vmem:[%s4361_s11 + $0xa0] sm:$0xff]  }
 0x7f5   : > { %2361 = vmatpush1.bf16.msra.mxu1 %v3504_v40  ;;  %v3545_v40 = vld [vmem:[%s4361_s11 + $0x20] sm:$0xff]  }
 0x7f6   : > { %2362 = vmatprep.subr.bf16.mxu1 %v3512_v60  ;;  %v3548_v60 = vld [vmem:[%s4361_s11 + $0xd8] sm:$0xff]  }
 0x7f9   : > { %2363 = vmatpush1.bf16.msra.mxu1 %v3510_v44  ;;  %v3550_v44 = vld [vmem:[%s4361_s11 + $0x98] sm:$0xff]  }
 0x7fa   : > { %2364 = vmatprep.subr.bf16.mxu1 %v3518_v46  ;;  %v3552_v46 = vld [vmem:[%s4361_s11 + $0xd0] sm:$0xff]  }
 0x7fd   : > { %2365 = vmatpush1.bf16.msra.mxu1 %v3516_v48  ;;  %v3554_v48 = vld [vmem:[%s4361_s11 + $0x90] sm:$0xff]  }
 0x7fe   : > { %2366 = vmatprep.subr.bf16.mxu1 %v3524_v50  ;;  %v3556_v50 = vld [vmem:[%s4361_s11 + $0xc8] sm:$0xff]  }
 0x801   : > { %2367 = vmatpush1.bf16.msra.mxu1 %v3522_v52  ;;  %v3558_v52 = vld [vmem:[%s4361_s11 + $0x88] sm:$0xff]  }
 0x8a8   : > { %v3390_v7 = vpop.f32.mrf.mxu1 }
 0x8a9   : > { %v4083_v11 = vadd.f32 %v3390_v7, %v1753_v51  ;;  %v3519_v51 = vld [vmem:[%s4359_s9 + $0x20] ss:$16 sps:$4 sm:$0xff]  }
 0x8aa   : > { %v2017_v8 = vpop.f32.mrf.mxu1  ;;  %2316 = vmatpush1.bf16.msra.mxu0 %v3519_v51  ;;  %v3557_v51 = vld [vmem:[%s4361_s11 + $0x8] sm:$0xff]  }
 0x8ab   : > { %v4077_v21 = vadd.f32 %v2017_v8, %v1751_v54  ;;  %v3530_v54 = vld [vmem:[%s4359_s9 + $0xc] ss:$16 sps:$4 sm:$0xff]   ;;  %2317 = vmatprep.subr.bf16.mxu0 %v3527_v53  ;;  %v3559_v53 = vld [vmem:[%s4361_s11 + $0x40] sm:$0xff]  }
 0x8ac   : > { %v3391_v1 = vpop.f32.mrf.mxu1  ;;  %2368 = vmatprep.subr.bf16.mxu1 %v3530_v54  ;;  %v3560_v54 = vld [vmem:[%s4361_s11 + $0xc0] sm:$0xff]  }
 0x8ad   : > { %2036 = vadd.xlane.f32.xlu1 %v4077_v21  ;;  %2369 = vmatpush1.bf16.msra.mxu1 %v3528_v56  ;;  %v3562_v56 = vld [vmem:[%s4361_s11 + $0x80] sm:$0xff]  }
 0x8ae   : > { %v2020_v9 = vpop.f32.mrf.mxu1  ;;  %2318 = vmatpush1.bf16.msra.mxu0 %v3525_v55  ;;  %v3561_v55 = vld [vmem:[%s4361_s11] sm:$0xff]  }
 0x8af   : > { %v4080_v10 = vadd.f32 %v2020_v9, %v1752_v58  ;;  %v3085_v9 = vld [vmem:[%s4357_s7] ss:$0 sm:$0xff] }
 0x8b1   : > { %2038 = vadd.xlane.f32.xlu0 %v4080_v10 }
 0x8b5   : > { %2040 = vadd.xlane.f32.xlu0 %v4083_v11 }
 0x936   : > { %v2037_v16 = vpop.xlane.xlu1 %2036 }
 0x937   : > { %v2042_v17 = vmul.f32 0.0078125, %v2037_v16 }
 0x939   : > { %v4099_v20 = vsub.f32 %v4077_v21, %v2042_v17 }
 0x93a   : > { %v2039_v22 = vpop.xlane.xlu0 %2038 }
 0x93b   : > { %v2043_v23 = vmul.f32 0.0078125, %v2039_v22  ;;  %v2048_v24 = vmul.f32 %v4099_v20, %v4099_v20 }
 0x93d   : > { %v4104_v25 = vsub.f32 %v4080_v10, %v2043_v23  ;;  %2051 = vadd.xlane.f32.xlu1 %v2048_v24 }
 0x93e   : > { %v2041_v26 = vpop.xlane.xlu0 %2040 }
 0x93f   : > { %v2044_v27 = vmul.f32 0.0078125, %v2041_v26  ;;  %v2049_v28 = vmul.f32 %v4104_v25, %v4104_v25 }
 0x941   : > { %v4109_v29 = vsub.f32 %v4083_v11, %v2044_v27  ;;  %2053 = vadd.xlane.f32.xlu0 %v2049_v28  ;;  %v3531_v28 = vld [vmem:[%s4361_s11 + $0x78] sm:$0xff]  }
 0x942   : > { %3220 = vmatprep.subr.bf16.mxu0 %v3531_v28 }
 0x943   : > { %v2050_v30 = vmul.f32 %v4109_v29, %v4109_v29 }
 0x945   : > { %2055 = vadd.xlane.f32.xlu1 %v2050_v30  ;;  %v3533_v30 = vld [vmem:[%s4361_s11 + $0x38] sm:$0xff]  }
 0x9c6   : > { %v2052_v57 = vpop.xlane.xlu1 %2051 }
 0x9c7   : > { %v2057_v58 = vmul.f32 0.0078125, %v2052_v57  ;;  %v2121_v57 = vld [vmem:[%s4360_s10] sm:$0xf] }
 0x9c9   : > { %v2060_v59 = vadd.f32 1e-06, %v2057_v58  ;;  %v2137_v58 = vsub.s32 3, %v3871_v2 }
 0x9ca   : > { %v2054_v61 = vpop.xlane.xlu0 %2053 }
 0x9cb   : > { %3617 = vrsqrt.f32 %v2060_v59  ;;  %v2058_v62 = vmul.f32 0.0078125, %v2054_v61  ;;  %v2126_v59 = vrot.slane %v2121_v57, %v631_v5  ;;  %v2134_v61 = vrot.slane %v2121_v57, %v639_v3 }
 0x9cd   : > { %v2061_v63 = vadd.f32 1e-06, %v2058_v62 }
 0x9ce   : > { %v2056_v0 = vpop.xlane.xlu1 %2055 }
 0x9cf   : > { %3619 = vrsqrt.f32 %v2061_v63  ;;  %v2059_v4 = vmul.f32 0.0078125, %v2056_v0  ;;  %v2130_v0 = vrot.slane %v2121_v57, %v635_v6 }
 0x9d1   : > { %v2062_v7 = vadd.f32 1e-06, %v2059_v4  ;;  %v2138_v4 = vrot.slane %v2121_v57, %v2137_v58 }
 0x9d3   : > { %3621 = vrsqrt.f32 %v2062_v7 }
 0x9d8   : > { %v3618_v8 = vpop.eup %3617 }
 0x9d9   : > { %v2066_v1 = vmul.f32 %v3618_v8, %v4099_v20 }
 0x9db   : > { %v2075_v14 = vmul.f32 %v3085_v9, %v2066_v1 }
 0x9dc   : > { %v3620_v12 = vpop.eup %3619 }
 0x9dd   : > { %v2067_v13 = vmul.f32 %v3620_v12, %v4104_v25  ;;  %v2084_v22 = vadd.f32 %v3086_v15, %v2075_v14 }
 0x9df   : > { %v2076_v16 = vmul.f32 %v3085_v9, %v2067_v13 }
 0x9e0   : > { %v3622_v17 = vpop.eup %3621 }
 0x9e1   : > { %v2085_v23 = vadd.f32 %v3086_v15, %v2076_v16  ;;  %v2068_v24 = vmul.f32 %v3622_v17, %v4109_v29  ;;  %v3532_v29 = vld [vmem:[%s4361_s11 + $0xf8] sm:$0xff]  }
 0x9e2   : > { %3248 = vmatprep.subr.bf16.mxu1 %v3532_v29 }
 0x9e3   : > { %v2087_v26 = vpack.c.bf16 %v2085_v23, %v2084_v22  ;;  %v2077_v20 = vmul.f32 %v3085_v9, %v2068_v24 }
 0x9e5   : > { %2336 = vmatmul.mubr.bf16.vlgmr.msra.gmra.mxu0 %v2087_v26  ;;  %2387 = vmatmul.mubr.bf16.vlgmr.msra.gmra.mxu1 %v2087_v26  ;;  %v2086_v25 = vadd.f32 %v3086_v15, %v2077_v20 }
 0x9e6   : > { %2345 = vmatprep.mubr.bf16.mxu0 %v3664_v32  ;;  %2396 = vmatprep.mubr.bf16.mxu1 %v3664_v32  ;;  %v3534_v32 = vld [vmem:[%s4361_s11 + $0xb8] sm:$0xff]  }
 0x9e7   : > { %v2088_v27 = vpack.c.bf16 %v2086_v25, %v2086_v25  ;;  %3221 = vmatpush3.bf16.msra.mxu0 %v3533_v30  ;;  %3249 = vmatpush3.bf16.msra.mxu1 %v3534_v32 }
 0x9e8   : > { %3222 = vmatprep.subr.bf16.mxu0 %v3535_v31  ;;  %3250 = vmatprep.subr.bf16.mxu1 %v3536_v33 }
 0x9eb   : > { %3223 = vmatpush3.bf16.msra.mxu0 %v3537_v34  ;;  %3251 = vmatpush3.bf16.msra.mxu1 %v3538_v35 }
 0x9ec   : > { %3224 = vmatprep.subr.bf16.mxu0 %v3539_v18  ;;  %3252 = vmatprep.subr.bf16.mxu1 %v3540_v19 }
 0x9ed   : > { %2346 = vmatmul.mubr.bf16.gmra.mxu0 %v2088_v27  ;;  %2397 = vmatmul.mubr.bf16.gmra.mxu1 %v2088_v27 }
 0x9ef   : > { %3225 = vmatpush3.bf16.msra.mxu0 %v3541_v36  ;;  %3253 = vmatpush3.bf16.msra.mxu1 %v3542_v37 }
 0x9f0   : > { %3226 = vmatprep.subr.bf16.mxu0 %v3543_v38  ;;  %3254 = vmatprep.subr.bf16.mxu1 %v3544_v39 }
 0x9f3   : > { %3227 = vmatpush3.bf16.msra.mxu0 %v3545_v40  ;;  %3255 = vmatpush3.bf16.msra.mxu1 %v3546_v41 }
 0x9f4   : > { %3228 = vmatprep.subr.bf16.mxu0 %v3547_v42  ;;  %3256 = vmatprep.subr.bf16.mxu1 %v3548_v60 }
 0x9f7   : > { %3229 = vmatpush3.bf16.msra.mxu0 %v3549_v43  ;;  %3257 = vmatpush3.bf16.msra.mxu1 %v3550_v44 }
 0x9f8   : > { %3230 = vmatprep.subr.bf16.mxu0 %v3551_v45  ;;  %3258 = vmatprep.subr.bf16.mxu1 %v3552_v46 }
 0x9fb   : > { %3231 = vmatpush3.bf16.msra.mxu0 %v3553_v47  ;;  %3259 = vmatpush3.bf16.msra.mxu1 %v3554_v48 }
 0x9fc   : > { %3232 = vmatprep.subr.bf16.mxu0 %v3555_v49  ;;  %3260 = vmatprep.subr.bf16.mxu1 %v3556_v50 }
 0x9ff   : > { %3233 = vmatpush3.bf16.msra.mxu0 %v3557_v51  ;;  %3261 = vmatpush3.bf16.msra.mxu1 %v3558_v52 }
 0xa00   : > { %3234 = vmatprep.subr.bf16.mxu0 %v3559_v53  ;;  %3262 = vmatprep.subr.bf16.mxu1 %v3560_v54 }
 0xa03   : > { %3235 = vmatpush3.bf16.msra.mxu0 %v3561_v55  ;;  %3263 = vmatpush3.bf16.msra.mxu1 %v3562_v56 }
 0xaa5   : > { %v2337_v62 = vpop.f32.mrf.mxu0  ;;  %v2388_v63 = vpop.f32.mrf.mxu1 }
 0xaa6   : > { %v2338_v7 = vadd.f32 %v2337_v62, %v2126_v59  ;;  %v4314_v8 = vadd.f32 %v2388_v63, %v2134_v61 }
 0xaa7   : > { %v2339_v1 = vpop.f32.mrf.mxu0  ;;  %v2390_v9 = vpop.f32.mrf.mxu1 }
 0xaa8   : > { %v2417_v12 = vmul.f32 0.70710677, %v2338_v7  ;;  %v2419_v13 = vmul.f32 0.70710677, %v4314_v8  ;;  %v2340_v14 = vadd.f32 %v2339_v1, %v2130_v0  ;;  %v4317_v15 = vadd.f32 %v2390_v9, %v2138_v4 }
 0xaa9   : > { %v2341_v5 = vpop.f32.mrf.mxu0  ;;  %v2392_v16 = vpop.f32.mrf.mxu1  ;;  %v2405_v48 = vmul.f32 0.5, %v2338_v7 }
 0xaaa   : > { %v2342_v3 = vadd.f32 %v2341_v5, %v2126_v59  ;;  %v2393_v17 = vadd.f32 %v2392_v16, %v2134_v61  ;;  %3623 = verf.f32 %v2417_v12  ;;  %v2418_v22 = vmul.f32 0.70710677, %v2340_v14 }
 0xaab   : > { %v2343_v2 = vpop.f32.mrf.mxu0  ;;  %v2394_v6 = vpop.f32.mrf.mxu1  ;;  %3625 = verf.f32 %v2419_v13  ;;  %v2420_v23 = vmul.f32 0.70710677, %v4317_v15  ;;  %v2406_v49 = vmul.f32 0.5, %v2340_v14  ;;  %v2407_v12 = vmul.f32 0.5, %v4314_v8 }
 0xaac   : > { %v2421_v24 = vmul.f32 0.70710677, %v2342_v3  ;;  %3627 = verf.f32 %v2418_v22  ;;  %v2423_v26 = vmul.f32 0.70710677, %v2393_v17  ;;  %v2344_v20 = vadd.f32 %v2343_v2, %v2130_v0 }
 0xaad   : > { %v2395_v25 = vadd.f32 %v2394_v6, %v2138_v4  ;;  %v2347_v27 = vpop.f32.mrf.mxu0  ;;  %v2398_v28 = vpop.f32.mrf.mxu1  ;;  %3629 = verf.f32 %v2420_v23  ;;  %v2409_v55 = vmul.f32 0.5, %v2342_v3 }
 0xaae   : > { %v4320_v29 = vadd.f32 %v2347_v27, %v2126_v59  ;;  %v4322_v30 = vadd.f32 %v2398_v28, %v2134_v61  ;;  %3631 = verf.f32 %v2421_v24  ;;  %v2422_v32 = vmul.f32 0.70710677, %v2344_v20 }
 0xaaf   : > { %v2349_v31 = vpop.f32.mrf.mxu0  ;;  %v2400_v33 = vpop.f32.mrf.mxu1  ;;  %3633 = verf.f32 %v2423_v26  ;;  %v2424_v34 = vmul.f32 0.70710677, %v2395_v25  ;;  %v2411_v59 = vmul.f32 0.5, %v2393_v17  ;;  %v2410_v61 = vmul.f32 0.5, %v2344_v20 }
 0xab0   : > { %v2425_v35 = vmul.f32 0.70710677, %v4320_v29  ;;  %3635 = verf.f32 %v2422_v32  ;;  %v2427_v18 = vmul.f32 0.70710677, %v4322_v30  ;;  %v2350_v19 = vadd.f32 %v2349_v31, %v2130_v0 }
 0xab1   : > { %v2351_v36 = vpop.f32.mrf.mxu0  ;;  %v2402_v37 = vpop.f32.mrf.mxu1  ;;  %3637 = verf.f32 %v2424_v34  ;;  %v2401_v38 = vadd.f32 %v2400_v33, %v2138_v4  ;;  %v2408_v0 = vmul.f32 0.5, %v4317_v15  ;;  %v2412_v1 = vmul.f32 0.5, %v2395_v25 }
 0xab2   : > { %3639 = verf.f32 %v2425_v35  ;;  %v2426_v39 = vmul.f32 0.70710677, %v2350_v19  ;;  %v2414_v6 = vmul.f32 0.5, %v2350_v19  ;;  %v2413_v33 = vmul.f32 0.5, %v4320_v29  ;;  %v3119_v29 = vld [vmem:[%s4362_s12] ss:$0 sm:$0xff] }
 0xab3   : > { %v2352_v40 = vpop.f32.mrf.mxu0  ;;  %v2403_v41 = vpop.f32.mrf.mxu1  ;;  %3641 = verf.f32 %v2427_v18  ;;  %v2428_v42 = vmul.f32 0.70710677, %v2401_v38  ;;  %v2416_v24 = vmul.f32 0.5, %v2401_v38  ;;  %v2415_v35 = vmul.f32 0.5, %v4322_v30 }
 0xab4   : > { %3643 = verf.f32 %v2426_v39 }
 0xab5   : > { %3645 = verf.f32 %v2428_v42 }
 0xab7   : > { %v3624_v60 = vpop.eup %3623 }
 0xab8   : > { %v3626_v43 = vpop.eup %3625  ;;  %v2441_v53 = vadd.f32 1.0, %v3624_v60 }
 0xab9   : > { %v3628_v44 = vpop.eup %3627  ;;  %v2443_v58 = vadd.f32 1.0, %v3626_v43 }
 0xaba   : > { %v3630_v45 = vpop.eup %3629  ;;  %v2442_v50 = vadd.f32 1.0, %v3628_v44  ;;  %v2453_v3 = vmul.f32 %v2441_v53, %v2405_v48 }
 0xabb   : > { %v3632_v46 = vpop.eup %3631  ;;  %v2444_v54 = vadd.f32 1.0, %v3630_v45  ;;  %v2455_v23 = vmul.f32 %v2443_v58, %v2407_v12 }
 0xabc   : > { %v3634_v47 = vpop.eup %3633  ;;  %v2445_v51 = vadd.f32 1.0, %v3632_v46  ;;  %v2454_v13 = vmul.f32 %v2442_v50, %v2406_v49 }
 0xabd   : > { %v3636_v52 = vpop.eup %3635  ;;  %v2447_v56 = vadd.f32 1.0, %v3634_v47  ;;  %v2456_v22 = vmul.f32 %v2444_v54, %v2408_v0 }
 0xabe   : > { %v3638_v57 = vpop.eup %3637  ;;  %v2446_v62 = vadd.f32 1.0, %v3636_v52  ;;  %v2457_v4 = vmul.f32 %v2445_v51, %v2409_v55 }
 0xabf   : > { %v3640_v63 = vpop.eup %3639  ;;  %v2448_v9 = vadd.f32 1.0, %v3638_v57  ;;  %v2459_v14 = vmul.f32 %v2447_v56, %v2411_v59 }
 0xac0   : > { %v3642_v7 = vpop.eup %3641  ;;  %v2458_v5 = vmul.f32 %v2446_v62, %v2410_v61  ;;  %v2465_v15 = vpack.c.bf16 %v2457_v4, %v2453_v3  ;;  %v2449_v28 = vadd.f32 1.0, %v3640_v63 }
 0xac1   : > { %v3644_v16 = vpop.eup %3643  ;;  %v2460_v2 = vmul.f32 %v2448_v9, %v2412_v1  ;;  %v2467_v32 = vpack.c.bf16 %v2459_v14, %v2455_v23  ;;  %v2451_v31 = vadd.f32 1.0, %v3642_v7 }
 0xac2   : > { %v3646_v17 = vpop.eup %3645  ;;  %v2466_v26 = vpack.c.bf16 %v2458_v5, %v2454_v13  ;;  %v2450_v20 = vadd.f32 1.0, %v3644_v16  ;;  %v2461_v36 = vmul.f32 %v2449_v28, %v2413_v33 }
 0xac3   : > { %v2468_v27 = vpack.c.bf16 %v2460_v2, %v2456_v22  ;;  %v2452_v25 = vadd.f32 1.0, %v3646_v17  ;;  %v2463_v37 = vmul.f32 %v2451_v31, %v2415_v35  ;;  %v3152_v31 = vld [vmem:[%s4363_s13] ss:$0 sm:$0xff] }
 0xac4   : > { %2768 = vmatprep.mubr.bf16.mxu0 %v2466_v26  ;;  %v2462_v8 = vmul.f32 %v2450_v20, %v2414_v6  ;;  %v2469_v38 = vpack.c.bf16 %v2461_v36, %v2461_v36 }
 0xac5   : > { %2816 = vmatprep.mubr.bf16.mxu1 %v2468_v27  ;;  %2769 = vmatmul.mubr.bf16.vlgmr.msra.gmra.mxu0 %v2465_v15  ;;  %v2464_v34 = vmul.f32 %v2452_v25, %v2416_v24  ;;  %v2471_v39 = vpack.c.bf16 %v2463_v37, %v2463_v37 }
 0xac6   : > { %2817 = vmatmul.mubr.bf16.vlgmr.msra.gmra.mxu1 %v2467_v32  ;;  %v2470_v18 = vpack.c.bf16 %v2462_v8, %v2462_v8 }
 0xac7   : > { %v2472_v19 = vpack.c.bf16 %v2464_v34, %v2464_v34  ;;  %v3153_v34 = vld [vmem:[%s4364_s14] ss:$0 sm:$0xff] }
 0xac8   : > { %2776 = vmatprep.mubr.bf16.mxu0 %v2470_v18 }
 0xac9   : > { %2824 = vmatprep.mubr.bf16.mxu1 %v2472_v19 }
 0xacd   : > { %2777 = vmatmul.mubr.bf16.gmra.mxu0 %v2469_v38 }
 0xace   : > { %2825 = vmatmul.mubr.bf16.gmra.mxu1 %v2471_v39 }
 0xb85   : > { %v3236_v40 = vpop.f32.mrf.mxu0 }
 0xb86   : > { %v3264_v41 = vpop.f32.mrf.mxu1 }
 0xb87   : > { %v3237_v42 = vpop.f32.mrf.mxu0 }
 0xb88   : > { %v3238_v60 = vadd.f32 %v3237_v42, %v3236_v40  ;;  %v3265_v30 = vpop.f32.mrf.mxu1 }
 0xb89   : > { %v3239_v43 = vpop.f32.mrf.mxu0  ;;  %v3266_v45 = vadd.f32 %v3265_v30, %v3264_v41 }
 0xb8a   : > { %v2771_v44 = vadd.f32 %v3238_v60, %v3119_v29  ;;  %v3267_v46 = vpop.f32.mrf.mxu1 }
 0xb8b   : > { %v3240_v47 = vpop.f32.mrf.mxu0 }
 0xb8c   : > { %v2819_v48 = vadd.f32 %v3266_v45, %v2771_v44  ;;  %v3241_v49 = vadd.f32 %v3240_v47, %v3239_v43  ;;  %v3268_v50 = vpop.f32.mrf.mxu1 }
 0xb8d   : > { %v3242_v51 = vpop.f32.mrf.mxu0  ;;  %v3269_v53 = vadd.f32 %v3268_v50, %v3267_v46 }
 0xb8e   : > { %v2774_v52 = vadd.f32 %v3241_v49, %v3119_v29  ;;  %v3270_v54 = vpop.f32.mrf.mxu1  ;;  %v2832_v55 = vadd.f32 %v2819_v48, %v4077_v21 }
 0xb8f   : > { %v3243_v56 = vpop.f32.mrf.mxu0 }
 0xb90   : > { %v2822_v57 = vadd.f32 %v3269_v53, %v2774_v52  ;;  %v3244_v58 = vadd.f32 %v3243_v56, %v3242_v51  ;;  %v3271_v59 = vpop.f32.mrf.mxu1  ;;  %2837 = vadd.xlane.f32.xlu0 %v2832_v55 }
 0xb91   : > { %v3245_v61 = vpop.f32.mrf.mxu0  ;;  %v3272_v63 = vadd.f32 %v3271_v59, %v3270_v54 }
 0xb92   : > { %v2779_v62 = vadd.f32 %v3244_v58, %v3119_v29  ;;  %v3273_v0 = vpop.f32.mrf.mxu1  ;;  %v2833_v4 = vadd.f32 %v2822_v57, %v4080_v10 }
 0xb93   : > { %v3246_v1 = vpop.f32.mrf.mxu0 }
 0xb94   : > { %v2827_v9 = vadd.f32 %v3272_v63, %v2779_v62  ;;  %v3274_v7 = vpop.f32.mrf.mxu1  ;;  %2839 = vadd.xlane.f32.xlu1 %v2833_v4 }
 0xb96   : > { %v2834_v12 = vadd.f32 %v2827_v9, %v4083_v11 }
 0xb98   : > { %2841 = vadd.xlane.f32.xlu0 %v2834_v12 }
 0xc19   : > { %v2838_v13 = vpop.xlane.xlu0 %2837 }
 0xc1a   : > { %v2843_v21 = vmul.f32 0.0078125, %v2838_v13 }
 0xc1c   : > { %v2846_v14 = vsub.f32 %v2832_v55, %v2843_v21 }
 0xc1d   : > { %v2840_v5 = vpop.xlane.xlu1 %2839 }
 0xc1e   : > { %v2844_v16 = vmul.f32 0.0078125, %v2840_v5  ;;  %v2849_v3 = vmul.f32 %v2846_v14, %v2846_v14 }
 0xc20   : > { %v2847_v22 = vsub.f32 %v2833_v4, %v2844_v16  ;;  %2852 = vadd.xlane.f32.xlu1 %v2849_v3 }
 0xc21   : > { %v2842_v2 = vpop.xlane.xlu0 %2841 }
 0xc22   : > { %v2845_v6 = vmul.f32 0.0078125, %v2842_v2  ;;  %v2850_v17 = vmul.f32 %v2847_v22, %v2847_v22 }
 0xc24   : > { %v2848_v23 = vsub.f32 %v2834_v12, %v2845_v6  ;;  %2854 = vadd.xlane.f32.xlu0 %v2850_v17 }
 0xc26   : > { %v2851_v10 = vmul.f32 %v2848_v23, %v2848_v23 }
 0xc28   : > { %2856 = vadd.xlane.f32.xlu1 %v2851_v10 }
 0xca9   : > { %v2853_v24 = vpop.xlane.xlu1 %2852 }
 0xcaa   : > { %v2858_v26 = vmul.f32 0.0078125, %v2853_v24 }
 0xcac   : > { %v2861_v20 = vadd.f32 1e-06, %v2858_v26 }
 0xcad   : > { %v2855_v11 = vpop.xlane.xlu0 %2854 }
 0xcae   : > { %3647 = vrsqrt.f32 %v2861_v20  ;;  %v2859_v15 = vmul.f32 0.0078125, %v2855_v11 }
 0xcb0   : > { %v2862_v27 = vadd.f32 1e-06, %v2859_v15 }
 0xcb1   : > { %v2857_v25 = vpop.xlane.xlu1 %2856 }
 0xcb2   : > { %3649 = vrsqrt.f32 %v2862_v27  ;;  %v2860_v28 = vmul.f32 0.0078125, %v2857_v25 }
 0xcb4   : > { %v2863_v32 = vadd.f32 1e-06, %v2860_v28 }
 0xcb6   : > { %3651 = vrsqrt.f32 %v2863_v32 }
 0xcbb   : > { %v3648_v8 = vpop.eup %3647 }
 0xcbc   : > { %v2867_v33 = vmul.f32 %v3648_v8, %v2846_v14 }
 0xcbe   : > { %v2876_v35 = vmul.f32 %v3152_v31, %v2867_v33 }
 0xcbf   : > { %v3650_v18 = vpop.eup %3649 }
 0xcc0   : > { %v2885_v19 = vadd.f32 %v3153_v34, %v2876_v35  ;;  %v2868_v36 = vmul.f32 %v3650_v18, %v2847_v22 }
 0xcc2   : > { %2888 = vst [vmem:[%s529_s30] sm:$0xff] %v2885_v19  ;;  %v2877_v37 = vmul.f32 %v3152_v31, %v2868_v36 }
 0xcc3   : > { %v3652_v38 = vpop.eup %3651 }
 0xcc4   : > { %v2886_v39 = vadd.f32 %v3153_v34, %v2877_v37  ;;  %v2869_v40 = vmul.f32 %v3652_v38, %v2848_v23 }
 0xcc6   : > { %2889 = vst [vmem:[%s529_s30 + $0x8] sm:$0xff] %v2886_v39  ;;  %v2878_v41 = vmul.f32 %v3152_v31, %v2869_v40 }
 0xcc8   : > { %v2887_v29 = vadd.f32 %v3153_v34, %v2878_v41 }
 0xcca   : > { %2890 = vst [vmem:[%s529_s30 + $0x10] sm:$0xff] %v2887_v29 }
 0xccb PF: > { %s27_s21 = sadd.s32 1, %s3662_s21  }
 0xccc   : > { %p24_p4 = scmp.ge.s32.totalorder %s27_s21, 4  }
 0xcce   :  { %26 = sbr.rel (!%p24_p4) target bundleno = 2 (0x2), region = 125 }

</bundles_post_ra>
